<compile_context>
chip_gen: v6e
topology: v6e:2x2x1
jax: 0.10.0
libtpu: 0.0.40
codegen_flags: <defaults>
</compile_context>

<pallas_src>
import functools

import jax
import jax.numpy as jnp
from jax import lax
from jax.experimental import pallas as pl
from jax.experimental.pallas import tpu as pltpu  # noqa: F401  (kept for TPU-specific params if needed)


# ------------------------------------------------------------------ helpers

def _layernorm(v, g, b, eps=1e-5):
    """Two-pass LayerNorm over the last axis (f32 math), matching nn.LayerNorm."""
    mu = jnp.mean(v, axis=-1, keepdims=True)
    var = jnp.mean((v - mu) * (v - mu), axis=-1, keepdims=True)
    return (v - mu) * lax.rsqrt(var + eps) * g + b


# ------------------------------------------------------------------ fused forward kernel

def fused_forward_kernel(x_ref,
                         ln1g_ref, ln1b_ref, wqkv_ref, wp_ref, bp_ref,
                         ln2g_ref, ln2b_ref, w1_ref, b1_ref, w2_ref, b2_ref,
                         lnfg_ref, lnfb_ref, wout_ref, bout_ref,
                         out_ref, *, n_head):
    """Whole network in one kernel invocation.

    x_ref:    (B, T, C) f32                residual stream input
    per-layer weights stacked on axis 0:   ln*(L,1,C), wqkv (L,C,3C) bf16,
                                           wp (L,C,C) bf16, bp (L,1,C),
                                           w1 (L,C,4C) bf16, b1 (L,1,4C),
                                           w2 (L,4C,C) bf16, b2 (L,1,C)
    lnf (1,C), wout (C,Vp) bf16, bout (1,Vp)   fused lm_head + duration + time_remaining
    out_ref:  (B, T, Vp) f32
    """
    B, T, C = x_ref.shape
    n_layer = wqkv_ref.shape[0]
    hs = C // n_head
    scale = hs ** -0.5
    bf16 = jnp.bfloat16

    # residual stream, flattened so every GEMM runs at M = B*T
    x = x_ref[...].reshape(B * T, C)                                  # (BT, C) f32

    # causal mask built in-kernel (no (T,T) HBM tril); finite fill -> no NaN
    row = lax.broadcasted_iota(jnp.int32, (T, T), 0)
    col = lax.broadcasted_iota(jnp.int32, (T, T), 1)
    causal = col <= row

    for l in range(n_layer):
        # -------- self-attention branch --------
        ln1 = _layernorm(x, ln1g_ref[l], ln1b_ref[l]).astype(bf16)    # (BT, C) bf16
        qkv = jnp.dot(ln1, wqkv_ref[l],
                      preferred_element_type=jnp.float32)             # (BT, 3C) f32
        qkv = qkv.reshape(B, T, 3 * C)

        heads_out = []
        for b in range(B):                                            # static unroll (B small)
            q_b = qkv[b, :, 0 * C:1 * C]
            k_b = qkv[b, :, 1 * C:2 * C]
            v_b = qkv[b, :, 2 * C:3 * C]
            per_head = []
            for h in range(n_head):                                   # static unroll
                sl = slice(h * hs, (h + 1) * hs)
                qh = q_b[:, sl].astype(bf16)
                kh = k_b[:, sl].astype(bf16)
                vh = v_b[:, sl].astype(bf16)
                # scores = q @ k^T * hs^-0.5   (contract last dims; scale on f32 scores,
                # exactly the PyTorch order of operations)
                s = lax.dot_general(qh, kh,
                                    dimension_numbers=(((1,), (1,)), ((), ())),
                                    preferred_element_type=jnp.float32) * scale
                s = jnp.where(causal, s, -1e30)
                m = jnp.max(s, axis=-1, keepdims=True)
                p = jnp.exp(s - m)
                p = p / jnp.sum(p, axis=-1, keepdims=True)            # exact softmax
                # dropout(p) -> identity (eval mode)
                per_head.append(jnp.dot(p.astype(bf16), vh,
                                        preferred_element_type=jnp.float32))  # (T, hs)
            heads_out.append(jnp.concatenate(per_head, axis=-1))      # (T, C)
        att = jnp.concatenate(heads_out, axis=0).astype(bf16)         # (BT, C) bf16

        # single lane-dense output projection at K = C
        sa = jnp.dot(att, wp_ref[l], preferred_element_type=jnp.float32) + bp_ref[l]
        # dropout(proj) -> identity (eval mode)
        x = x + sa                                                     # residual, f32

        # -------- feed-forward branch --------
        ln2 = _layernorm(x, ln2g_ref[l], ln2b_ref[l]).astype(bf16)
        h1 = jnp.dot(ln2, w1_ref[l], preferred_element_type=jnp.float32) + b1_ref[l]
        h1 = jnp.maximum(h1, 0.0).astype(bf16)
        h2 = jnp.dot(h1, w2_ref[l], preferred_element_type=jnp.float32) + b2_ref[l]
        # dropout(h2) -> identity (eval mode)
        x = x + h2

    # -------- final LN + fused output heads (lm_head | duration | time_remaining) ------
    ln = _layernorm(x, lnfg_ref[...], lnfb_ref[...]).astype(bf16)
    out = jnp.dot(ln, wout_ref[...], preferred_element_type=jnp.float32) + bout_ref[...]
    out_ref[...] = out.reshape(out_ref.shape)


# ------------------------------------------------------------------ wrapper-side weight prep

def _prep_fused_params(params):
    """One-time weight massaging: per-layer stacking, QKV fusion, head fusion, bf16 cast."""
    blocks = params["blocks"]
    bf = jnp.bfloat16
    C = blocks[0]["wq"].shape[0]
    V = params["w_lm"].shape[1]
    Vp = ((V + 2 + 127) // 128) * 128          # lm_head + dur + trem columns, lane-padded

    def stack(name):
        return jnp.stack([blk[name] for blk in blocks])

    w_qkv = jnp.stack([jnp.concatenate([blk["wq"], blk["wk"], blk["wv"]], axis=1)
                       for blk in blocks]).astype(bf)                  # (L, C, 3C)

    w_out = jnp.zeros((C, Vp), jnp.float32)
    w_out = w_out.at[:, :V].set(params["w_lm"])
    w_out = w_out.at[:, V].set(params["w_dur"][0])
    w_out = w_out.at[:, V + 1].set(params["w_tr"][0])
    b_out = jnp.zeros((1, Vp), jnp.float32)
    b_out = b_out.at[0, :V].set(params["b_lm"][0])
    b_out = b_out.at[0, V].set(params["b_dur"][0, 0])
    b_out = b_out.at[0, V + 1].set(params["b_tr"][0, 0])

    return dict(
        ln1_g=stack("ln1_g"), ln1_b=stack("ln1_b"),
        w_qkv=w_qkv,
        w_p=stack("wp").astype(bf), b_p=stack("bp"),
        ln2_g=stack("ln2_g"), ln2_b=stack("ln2_b"),
        w1=stack("w1").astype(bf), b1=stack("b1"),
        w2=stack("w2").astype(bf), b2=stack("b2"),
        lnf_g=params["lnf_g"], lnf_b=params["lnf_b"],
        w_out=w_out.astype(bf), b_out=b_out,
    ), V, Vp


# ------------------------------------------------------------------ full model forward

@functools.partial(jax.jit, static_argnames=("n_head",))
def event_metadata_lm_forward(idx, metadata_embedding, event_metadata_embedding, params, *, n_head):
    # Embedding gathers + concatenations are data-dependent / one-time reshapes -> plain JAX.
    T_idx = idx.shape[1]
    tok = jnp.take(params["tok_emb"], idx, axis=0)                      # (B, T, n_embd)
    x = tok + params["pos_emb"][:T_idx][None, :, :]
    x = jnp.concatenate([metadata_embedding[:, None, :], x], axis=1)    # (B, T+1, n_embd)
    x = jnp.concatenate([x, event_metadata_embedding], axis=2)          # (B, T+1, C)

    B, T_model, C = x.shape
    L = len(params["blocks"])
    H = 4 * C

    # pad the model sequence length to a sublane multiple (mask/causality keeps pads inert)
    Tp = ((T_model + 7) // 8) * 8
    if Tp != T_model:
        x = jnp.pad(x, ((0, 0), (0, Tp - T_model), (0, 0)))

    kp, V, Vp = _prep_fused_params(params)

    def full(shape):
        return pl.BlockSpec(shape, lambda i, _n=len(shape): (0,) * _n)

    out = pl.pallas_call(
        functools.partial(fused_forward_kernel, n_head=n_head),
        out_shape=jax.ShapeDtypeStruct((B, Tp, Vp), jnp.float32),
        grid=(1,),                                   # single step: everything stays in VMEM
        in_specs=[
            full((B, Tp, C)),                        # x
            full((L, 1, C)), full((L, 1, C)),        # ln1 gamma / beta
            full((L, C, 3 * C)),                     # fused W_qkv (bf16)
            full((L, C, C)),                         # W_proj (bf16)
            full((L, 1, C)),                         # b_proj
            full((L, 1, C)), full((L, 1, C)),        # ln2 gamma / beta
            full((L, C, H)), full((L, 1, H)),        # W1 (bf16), b1
            full((L, H, C)), full((L, 1, C)),        # W2 (bf16), b2
            full((1, C)), full((1, C)),              # ln_f gamma / beta
            full((C, Vp)), full((1, Vp)),            # fused lm_head|dur|trem weight + bias
        ],
        out_specs=full((B, Tp, Vp)),
    )(x, kp["ln1_g"], kp["ln1_b"], kp["w_qkv"], kp["w_p"], kp["b_p"],
      kp["ln2_g"], kp["ln2_b"], kp["w1"], kp["b1"], kp["w2"], kp["b2"],
      kp["lnf_g"], kp["lnf_b"], kp["w_out"], kp["b_out"])

    out = out[:, :T_model, :]
    logits = out[..., :V]
    dur = out[..., V:V + 1]
    trem = out[..., V + 1:V + 2]
    return logits, dur, trem


# ------------------------------------------------------------------ params + pure-JAX reference

def init_params(key, *, vocab_size, n_embd, n_head, n_layer, block_size):
    C = 2 * n_embd
    H = 4 * C
    keys = iter(jax.random.split(key, 16 + 16 * n_layer))   # generous: 8 + 9*n_layer needed

    def nrm(shape, std=0.02):
        return (std * jax.random.normal(next(keys), shape)).astype(jnp.float32)

    blocks = []
    for _ in range(n_layer):
        blocks.append(dict(
            ln1_g=jnp.ones((1, C), jnp.float32), ln1_b=jnp.zeros((1, C), jnp.float32),
            wq=nrm((C, C)), wk=nrm((C, C)), wv=nrm((C, C)),
            wp=nrm((C, C)), bp=nrm((1, C)),
            ln2_g=jnp.ones((1, C), jnp.float32), ln2_b=jnp.zeros((1, C), jnp.float32),
            w1=nrm((C, H)), b1=nrm((1, H)),
            w2=nrm((H, C)), b2=nrm((1, C)),
        ))

    return dict(
        tok_emb=nrm((vocab_size, n_embd)),
        pos_emb=nrm((block_size, n_embd)),
        blocks=blocks,
        lnf_g=jnp.ones((1, C), jnp.float32), lnf_b=jnp.zeros((1, C), jnp.float32),
        w_lm=nrm((C, vocab_size)), b_lm=nrm((1, vocab_size)),
        w_dur=nrm((1, C)), b_dur=nrm((1, 1)),
        w_tr=nrm((1, C)), b_tr=nrm((1, 1)),
    )


def _reference_block(x, p, *, n_head):
    """Pure-JAX Block.forward (eval mode), same bf16/f32 numerics, original weight layout."""
    B, T, C = x.shape
    hs = C // n_head
    bf = jnp.bfloat16
    tvec = jnp.arange(T)
    causal = tvec[None, :] <= tvec[:, None]

    ln1 = _layernorm(x, p["ln1_g"], p["ln1_b"]).astype(bf)
    q = jnp.einsum("btc,cd->btd", ln1, p["wq"].astype(bf), preferred_element_type=jnp.float32)
    k = jnp.einsum("btc,cd->btd", ln1, p["wk"].astype(bf), preferred_element_type=jnp.float32)
    v = jnp.einsum("btc,cd->btd", ln1, p["wv"].astype(bf), preferred_element_type=jnp.float32)

    outs = []
    for h in range(n_head):
        sl = slice(h * hs, (h + 1) * hs)
        wei = jnp.einsum("btd,bsd->bts", q[..., sl].astype(bf), k[..., sl].astype(bf),
                         preferred_element_type=jnp.float32) * (hs ** -0.5)
        wei = jnp.where(causal, wei, -1e30)
        wei = jax.nn.softmax(wei, axis=-1)
        outs.append(jnp.einsum("bts,bsd->btd", wei.astype(bf), v[..., sl].astype(bf),
                               preferred_element_type=jnp.float32))
    sa = jnp.concatenate(outs, axis=-1)
    sa = jnp.einsum("btd,dc->btc", sa.astype(bf), p["wp"].astype(bf),
                    preferred_element_type=jnp.float32) + p["bp"][0]
    x1 = x + sa

    ln2 = _layernorm(x1, p["ln2_g"], p["ln2_b"]).astype(bf)
    h1 = jnp.maximum(jnp.einsum("btc,ch->bth", ln2, p["w1"].astype(bf),
                                preferred_element_type=jnp.float32) + p["b1"][0], 0.0)
    h2 = jnp.einsum("bth,hc->btc", h1.astype(bf), p["w2"].astype(bf),
                    preferred_element_type=jnp.float32) + p["b2"][0]
    return x1 + h2


def reference_forward(idx, metadata_embedding, event_metadata_embedding, params, *, n_head):
    bf = jnp.bfloat16
    T = idx.shape[1]
    tok = jnp.take(params["tok_emb"], idx, axis=0)
    x = tok + params["pos_emb"][:T][None, :, :]
    x = jnp.concatenate([metadata_embedding[:, None, :], x], axis=1)
    x = jnp.concatenate([x, event_metadata_embedding], axis=2)
    for blk in params["blocks"]:
        x = _reference_block(x, blk, n_head=n_head)
    ln = _layernorm(x, params["lnf_g"], params["lnf_b"])
    ln_bf = ln.astype(bf)
    logits = jnp.einsum("btc,cv->btv", ln_bf, params["w_lm"].astype(bf),
                        preferred_element_type=jnp.float32) + params["b_lm"][0]
    dur = jnp.einsum("btc,c->bt", ln_bf, params["w_dur"][0].astype(bf),
                     preferred_element_type=jnp.float32)[..., None] + params["b_dur"][0, 0]
    trem = jnp.einsum("btc,c->bt", ln_bf, params["w_tr"][0].astype(bf),
                      preferred_element_type=jnp.float32)[..., None] + params["b_tr"][0, 0]
    return logits, dur, trem


# ------------------------------------------------------------------ main

if __name__ == "__main__":
    vocab_size = 128
    n_embd = 64          # block channel dim = 2*n_embd = 128 -> lane-dense residual stream
    n_head = 4           # head_size = 32
    n_layer = 2
    block_size = 16
    B, T_idx = 2, 7      # model sequence length = T_idx + 1 = 8 (metadata token prepended)

    key = jax.random.PRNGKey(0)
    k_idx, k_meta, k_event, k_params = jax.random.split(key, 4)

    idx = jax.random.randint(k_idx, (B, T_idx), 0, vocab_size)
    metadata_embedding = 0.02 * jax.random.normal(k_meta, (B, n_embd), jnp.float32)
    event_metadata_embedding = 0.02 * jax.random.normal(
        k_event, (B, T_idx + 1, n_embd), jnp.float32)

    params = init_params(k_params, vocab_size=vocab_size, n_embd=n_embd,
                         n_head=n_head, n_layer=n_layer, block_size=block_size)

    logits, dur, trem = event_metadata_lm_forward(
        idx, metadata_embedding, event_metadata_embedding, params, n_head=n_head)
    logits, dur, trem = jax.block_until_ready((logits, dur, trem))

    ref_logits, ref_dur, ref_trem = reference_forward(
        idx, metadata_embedding, event_metadata_embedding, params, n_head=n_head)

    T_model = T_idx + 1
    assert logits.shape == (B, T_model, vocab_size)
    assert dur.shape == (B, T_model, 1)
    assert trem.shape == (B, T_model, 1)
    for name, got, ref in (("logits", logits, ref_logits),
                           ("duration", dur, ref_dur),
                           ("time_remaining", trem, ref_trem)):
        assert jnp.allclose(got, ref, atol=2e-2, rtol=2e-2), f"{name} mismatch vs reference"

    print("KERNEL_OK")
</pallas_src>

<mosaic_0001>
module attributes {stable_mosaic.version = 11 : i64} {
  func.func @fused_forward_kernel(%arg0: i32, %arg1: memref<2x8x128xf32, #tpu.memory_space<vmem>>, %arg2: memref<2x1x128xf32, #tpu.memory_space<vmem>>, %arg3: memref<2x1x128xf32, #tpu.memory_space<vmem>>, %arg4: memref<2x128x384xbf16, #tpu.memory_space<vmem>>, %arg5: memref<2x128x128xbf16, #tpu.memory_space<vmem>>, %arg6: memref<2x1x128xf32, #tpu.memory_space<vmem>>, %arg7: memref<2x1x128xf32, #tpu.memory_space<vmem>>, %arg8: memref<2x1x128xf32, #tpu.memory_space<vmem>>, %arg9: memref<2x128x512xbf16, #tpu.memory_space<vmem>>, %arg10: memref<2x1x512xf32, #tpu.memory_space<vmem>>, %arg11: memref<2x512x128xbf16, #tpu.memory_space<vmem>>, %arg12: memref<2x1x128xf32, #tpu.memory_space<vmem>>, %arg13: memref<1x128xf32, #tpu.memory_space<vmem>>, %arg14: memref<1x128xf32, #tpu.memory_space<vmem>>, %arg15: memref<128x256xbf16, #tpu.memory_space<vmem>>, %arg16: memref<1x256xf32, #tpu.memory_space<vmem>>, %arg17: memref<2x8x256xf32, #tpu.memory_space<vmem>>) attributes {dimension_semantics = [#tpu.dimension_semantics<arbitrary>], iteration_bounds = array<i64: 1>, scalar_prefetch = 0 : i64, scratch_operands = 0 : i64, tpu.core_type = #tpu.core_type<tc>, window_params = [{pipeline_mode = #tpu.pipeline_mode<synchronous>, transform_indices = @transform_0, window_bounds = array<i64: 2, 8, 128>}, {pipeline_mode = #tpu.pipeline_mode<synchronous>, transform_indices = @transform_1, window_bounds = array<i64: 2, 1, 128>}, {pipeline_mode = #tpu.pipeline_mode<synchronous>, transform_indices = @transform_2, window_bounds = array<i64: 2, 1, 128>}, {pipeline_mode = #tpu.pipeline_mode<synchronous>, transform_indices = @transform_3, window_bounds = array<i64: 2, 128, 384>}, {pipeline_mode = #tpu.pipeline_mode<synchronous>, transform_indices = @transform_4, window_bounds = array<i64: 2, 128, 128>}, {pipeline_mode = #tpu.pipeline_mode<synchronous>, transform_indices = @transform_5, window_bounds = array<i64: 2, 1, 128>}, {pipeline_mode = #tpu.pipeline_mode<synchronous>, transform_indices = @transform_6, window_bounds = array<i64: 2, 1, 128>}, {pipeline_mode = #tpu.pipeline_mode<synchronous>, transform_indices = @transform_7, window_bounds = array<i64: 2, 1, 128>}, {pipeline_mode = #tpu.pipeline_mode<synchronous>, transform_indices = @transform_8, window_bounds = array<i64: 2, 128, 512>}, {pipeline_mode = #tpu.pipeline_mode<synchronous>, transform_indices = @transform_9, window_bounds = array<i64: 2, 1, 512>}, {pipeline_mode = #tpu.pipeline_mode<synchronous>, transform_indices = @transform_10, window_bounds = array<i64: 2, 512, 128>}, {pipeline_mode = #tpu.pipeline_mode<synchronous>, transform_indices = @transform_11, window_bounds = array<i64: 2, 1, 128>}, {pipeline_mode = #tpu.pipeline_mode<synchronous>, transform_indices = @transform_12, window_bounds = array<i64: 1, 128>}, {pipeline_mode = #tpu.pipeline_mode<synchronous>, transform_indices = @transform_13, window_bounds = array<i64: 1, 128>}, {pipeline_mode = #tpu.pipeline_mode<synchronous>, transform_indices = @transform_14, window_bounds = array<i64: 128, 256>}, {pipeline_mode = #tpu.pipeline_mode<synchronous>, transform_indices = @transform_15, window_bounds = array<i64: 1, 256>}, {pipeline_mode = #tpu.pipeline_mode<synchronous>, transform_indices = @transform_16, window_bounds = array<i64: 2, 8, 256>}]} {
    %c0 = arith.constant 0 : index
    %c0_0 = arith.constant 0 : index
    %c0_1 = arith.constant 0 : index
    %0 = vector.load %arg1[%c0, %c0_0, %c0_1] : memref<2x8x128xf32, #tpu.memory_space<vmem>>, vector<2x8x128xf32>
    %1 = vector.shape_cast %0 : vector<2x8x128xf32> to vector<16x128xf32>
    %2 = tpu.iota {dimensions = array<i32: 0>} : vector<8x8xi32>
    %3 = tpu.iota {dimensions = array<i32: 1>} : vector<8x8xi32>
    %4 = arith.cmpi sle, %3, %2 : vector<8x8xi32>
    %c0_2 = arith.constant 0 : index
    %c0_3 = arith.constant 0 : index
    %c0_4 = arith.constant 0 : index
    %5 = vector.load %arg2[%c0_2, %c0_3, %c0_4] : memref<2x1x128xf32, #tpu.memory_space<vmem>>, vector<1x1x128xf32>
    %6 = vector.shape_cast %5 : vector<1x1x128xf32> to vector<1x128xf32>
    %c0_5 = arith.constant 0 : index
    %c0_6 = arith.constant 0 : index
    %c0_7 = arith.constant 0 : index
    %7 = vector.load %arg3[%c0_5, %c0_6, %c0_7] : memref<2x1x128xf32, #tpu.memory_space<vmem>>, vector<1x1x128xf32>
    %8 = vector.shape_cast %7 : vector<1x1x128xf32> to vector<1x128xf32>
    %cst = arith.constant dense<0.000000e+00> : vector<16xf32>
    %9 = vector.multi_reduction <add>, %1, %cst [1] : vector<16x128xf32> to vector<16xf32>
    %10 = vector.shape_cast %9 : vector<16xf32> to vector<16x1xf32>
    %cst_8 = arith.constant 1.280000e+02 : f32
    %11 = vector.broadcast %cst_8 : f32 to vector<16x1xf32>
    %12 = arith.divf %10, %11 : vector<16x1xf32>
    %13 = vector.broadcast %12 : vector<16x1xf32> to vector<16x128xf32>
    %14 = arith.subf %1, %13 : vector<16x128xf32>
    %15 = vector.broadcast %12 : vector<16x1xf32> to vector<16x128xf32>
    %16 = arith.subf %1, %15 : vector<16x128xf32>
    %17 = arith.mulf %14, %16 : vector<16x128xf32>
    %cst_9 = arith.constant dense<0.000000e+00> : vector<16xf32>
    %18 = vector.multi_reduction <add>, %17, %cst_9 [1] : vector<16x128xf32> to vector<16xf32>
    %19 = vector.shape_cast %18 : vector<16xf32> to vector<16x1xf32>
    %cst_10 = arith.constant 1.280000e+02 : f32
    %20 = vector.broadcast %cst_10 : f32 to vector<16x1xf32>
    %21 = arith.divf %19, %20 : vector<16x1xf32>
    %22 = vector.broadcast %12 : vector<16x1xf32> to vector<16x128xf32>
    %23 = arith.subf %1, %22 : vector<16x128xf32>
    %cst_11 = arith.constant 9.99999974E-6 : f32
    %24 = vector.broadcast %cst_11 : f32 to vector<16x1xf32>
    %25 = arith.addf %21, %24 : vector<16x1xf32>
    %26 = math.rsqrt %25 : vector<16x1xf32>
    %27 = vector.broadcast %26 : vector<16x1xf32> to vector<16x128xf32>
    %28 = arith.mulf %23, %27 : vector<16x128xf32>
    %29 = vector.broadcast %6 : vector<1x128xf32> to vector<16x128xf32>
    %30 = arith.mulf %28, %29 : vector<16x128xf32>
    %31 = vector.broadcast %8 : vector<1x128xf32> to vector<16x128xf32>
    %32 = arith.addf %30, %31 : vector<16x128xf32>
    %33 = arith.truncf %32 : vector<16x128xf32> to vector<16x128xbf16>
    %c0_12 = arith.constant 0 : index
    %c0_13 = arith.constant 0 : index
    %c0_14 = arith.constant 0 : index
    %34 = vector.load %arg4[%c0_12, %c0_13, %c0_14] : memref<2x128x384xbf16, #tpu.memory_space<vmem>>, vector<1x128x384xbf16>
    %35 = vector.shape_cast %34 : vector<1x128x384xbf16> to vector<128x384xbf16>
    %cst_15 = arith.constant dense<0.000000e+00> : vector<16x384xf32>
    %36 = tpu.matmul %33, %35, %cst_15 {dimension_numbers = #tpu.dot_dimension_numbers<[1], [0], [0], [1], [0, 0, 1, 1], [], []>} : vector<16x128xbf16>, vector<128x384xbf16>, vector<16x384xf32> -> vector<16x384xf32>
    %37 = vector.shape_cast %36 : vector<16x384xf32> to vector<2x8x384xf32>
    %38 = vector.extract_strided_slice %37 {offsets = [0, 0, 0], sizes = [1, 8, 128], strides = [1, 1, 1]} : vector<2x8x384xf32> to vector<1x8x128xf32>
    %39 = vector.shape_cast %38 : vector<1x8x128xf32> to vector<8x128xf32>
    %40 = vector.extract_strided_slice %37 {offsets = [0, 0, 128], sizes = [1, 8, 128], strides = [1, 1, 1]} : vector<2x8x384xf32> to vector<1x8x128xf32>
    %41 = vector.shape_cast %40 : vector<1x8x128xf32> to vector<8x128xf32>
    %42 = vector.extract_strided_slice %37 {offsets = [0, 0, 256], sizes = [1, 8, 128], strides = [1, 1, 1]} : vector<2x8x384xf32> to vector<1x8x128xf32>
    %43 = vector.shape_cast %42 : vector<1x8x128xf32> to vector<8x128xf32>
    %44 = vector.extract_strided_slice %39 {offsets = [0, 0], sizes = [8, 32], strides = [1, 1]} : vector<8x128xf32> to vector<8x32xf32>
    %45 = arith.truncf %44 : vector<8x32xf32> to vector<8x32xbf16>
    %46 = vector.extract_strided_slice %41 {offsets = [0, 0], sizes = [8, 32], strides = [1, 1]} : vector<8x128xf32> to vector<8x32xf32>
    %47 = arith.truncf %46 : vector<8x32xf32> to vector<8x32xbf16>
    %48 = vector.extract_strided_slice %43 {offsets = [0, 0], sizes = [8, 32], strides = [1, 1]} : vector<8x128xf32> to vector<8x32xf32>
    %49 = arith.truncf %48 : vector<8x32xf32> to vector<8x32xbf16>
    %cst_16 = arith.constant dense<0.000000e+00> : vector<8x8xf32>
    %50 = tpu.matmul %45, %47, %cst_16 {dimension_numbers = #tpu.dot_dimension_numbers<[1], [1], [0], [0], [0, 0, 1, 0], [], []>} : vector<8x32xbf16>, vector<8x32xbf16>, vector<8x8xf32> -> vector<8x8xf32>
    %cst_17 = arith.constant 0.176776692 : f32
    %51 = vector.broadcast %cst_17 : f32 to vector<8x8xf32>
    %52 = arith.mulf %50, %51 : vector<8x8xf32>
    %cst_18 = arith.constant -1.000000e+30 : f32
    %53 = vector.broadcast %cst_18 : f32 to vector<8x8xf32>
    %54 = arith.select %4, %52, %53 : vector<8x8xi1>, vector<8x8xf32>
    %cst_19 = arith.constant dense<0xFF800000> : vector<8xf32>
    %55 = vector.multi_reduction <maximumf>, %54, %cst_19 [1] : vector<8x8xf32> to vector<8xf32>
    %56 = vector.shape_cast %55 : vector<8xf32> to vector<8x1xf32>
    %57 = vector.broadcast %56 : vector<8x1xf32> to vector<8x8xf32>
    %58 = arith.subf %54, %57 : vector<8x8xf32>
    %59 = math.exp %58 : vector<8x8xf32>
    %cst_20 = arith.constant dense<0.000000e+00> : vector<8xf32>
    %60 = vector.multi_reduction <add>, %59, %cst_20 [1] : vector<8x8xf32> to vector<8xf32>
    %61 = vector.shape_cast %60 : vector<8xf32> to vector<8x1xf32>
    %62 = vector.broadcast %61 : vector<8x1xf32> to vector<8x8xf32>
    %63 = arith.divf %59, %62 : vector<8x8xf32>
    %64 = arith.truncf %63 : vector<8x8xf32> to vector<8x8xbf16>
    %cst_21 = arith.constant dense<0.000000e+00> : vector<8x32xf32>
    %65 = tpu.matmul %64, %49, %cst_21 {dimension_numbers = #tpu.dot_dimension_numbers<[1], [0], [0], [1], [0, 0, 1, 1], [], []>} : vector<8x8xbf16>, vector<8x32xbf16>, vector<8x32xf32> -> vector<8x32xf32>
    %66 = vector.extract_strided_slice %39 {offsets = [0, 32], sizes = [8, 32], strides = [1, 1]} : vector<8x128xf32> to vector<8x32xf32>
    %67 = arith.truncf %66 : vector<8x32xf32> to vector<8x32xbf16>
    %68 = vector.extract_strided_slice %41 {offsets = [0, 32], sizes = [8, 32], strides = [1, 1]} : vector<8x128xf32> to vector<8x32xf32>
    %69 = arith.truncf %68 : vector<8x32xf32> to vector<8x32xbf16>
    %70 = vector.extract_strided_slice %43 {offsets = [0, 32], sizes = [8, 32], strides = [1, 1]} : vector<8x128xf32> to vector<8x32xf32>
    %71 = arith.truncf %70 : vector<8x32xf32> to vector<8x32xbf16>
    %cst_22 = arith.constant dense<0.000000e+00> : vector<8x8xf32>
    %72 = tpu.matmul %67, %69, %cst_22 {dimension_numbers = #tpu.dot_dimension_numbers<[1], [1], [0], [0], [0, 0, 1, 0], [], []>} : vector<8x32xbf16>, vector<8x32xbf16>, vector<8x8xf32> -> vector<8x8xf32>
    %cst_23 = arith.constant 0.176776692 : f32
    %73 = vector.broadcast %cst_23 : f32 to vector<8x8xf32>
    %74 = arith.mulf %72, %73 : vector<8x8xf32>
    %cst_24 = arith.constant -1.000000e+30 : f32
    %75 = vector.broadcast %cst_24 : f32 to vector<8x8xf32>
    %76 = arith.select %4, %74, %75 : vector<8x8xi1>, vector<8x8xf32>
    %cst_25 = arith.constant dense<0xFF800000> : vector<8xf32>
    %77 = vector.multi_reduction <maximumf>, %76, %cst_25 [1] : vector<8x8xf32> to vector<8xf32>
    %78 = vector.shape_cast %77 : vector<8xf32> to vector<8x1xf32>
    %79 = vector.broadcast %78 : vector<8x1xf32> to vector<8x8xf32>
    %80 = arith.subf %76, %79 : vector<8x8xf32>
    %81 = math.exp %80 : vector<8x8xf32>
    %cst_26 = arith.constant dense<0.000000e+00> : vector<8xf32>
    %82 = vector.multi_reduction <add>, %81, %cst_26 [1] : vector<8x8xf32> to vector<8xf32>
    %83 = vector.shape_cast %82 : vector<8xf32> to vector<8x1xf32>
    %84 = vector.broadcast %83 : vector<8x1xf32> to vector<8x8xf32>
    %85 = arith.divf %81, %84 : vector<8x8xf32>
    %86 = arith.truncf %85 : vector<8x8xf32> to vector<8x8xbf16>
    %cst_27 = arith.constant dense<0.000000e+00> : vector<8x32xf32>
    %87 = tpu.matmul %86, %71, %cst_27 {dimension_numbers = #tpu.dot_dimension_numbers<[1], [0], [0], [1], [0, 0, 1, 1], [], []>} : vector<8x8xbf16>, vector<8x32xbf16>, vector<8x32xf32> -> vector<8x32xf32>
    %88 = vector.extract_strided_slice %39 {offsets = [0, 64], sizes = [8, 32], strides = [1, 1]} : vector<8x128xf32> to vector<8x32xf32>
    %89 = arith.truncf %88 : vector<8x32xf32> to vector<8x32xbf16>
    %90 = vector.extract_strided_slice %41 {offsets = [0, 64], sizes = [8, 32], strides = [1, 1]} : vector<8x128xf32> to vector<8x32xf32>
    %91 = arith.truncf %90 : vector<8x32xf32> to vector<8x32xbf16>
    %92 = vector.extract_strided_slice %43 {offsets = [0, 64], sizes = [8, 32], strides = [1, 1]} : vector<8x128xf32> to vector<8x32xf32>
    %93 = arith.truncf %92 : vector<8x32xf32> to vector<8x32xbf16>
    %cst_28 = arith.constant dense<0.000000e+00> : vector<8x8xf32>
    %94 = tpu.matmul %89, %91, %cst_28 {dimension_numbers = #tpu.dot_dimension_numbers<[1], [1], [0], [0], [0, 0, 1, 0], [], []>} : vector<8x32xbf16>, vector<8x32xbf16>, vector<8x8xf32> -> vector<8x8xf32>
    %cst_29 = arith.constant 0.176776692 : f32
    %95 = vector.broadcast %cst_29 : f32 to vector<8x8xf32>
    %96 = arith.mulf %94, %95 : vector<8x8xf32>
    %cst_30 = arith.constant -1.000000e+30 : f32
    %97 = vector.broadcast %cst_30 : f32 to vector<8x8xf32>
    %98 = arith.select %4, %96, %97 : vector<8x8xi1>, vector<8x8xf32>
    %cst_31 = arith.constant dense<0xFF800000> : vector<8xf32>
    %99 = vector.multi_reduction <maximumf>, %98, %cst_31 [1] : vector<8x8xf32> to vector<8xf32>
    %100 = vector.shape_cast %99 : vector<8xf32> to vector<8x1xf32>
    %101 = vector.broadcast %100 : vector<8x1xf32> to vector<8x8xf32>
    %102 = arith.subf %98, %101 : vector<8x8xf32>
    %103 = math.exp %102 : vector<8x8xf32>
    %cst_32 = arith.constant dense<0.000000e+00> : vector<8xf32>
    %104 = vector.multi_reduction <add>, %103, %cst_32 [1] : vector<8x8xf32> to vector<8xf32>
    %105 = vector.shape_cast %104 : vector<8xf32> to vector<8x1xf32>
    %106 = vector.broadcast %105 : vector<8x1xf32> to vector<8x8xf32>
    %107 = arith.divf %103, %106 : vector<8x8xf32>
    %108 = arith.truncf %107 : vector<8x8xf32> to vector<8x8xbf16>
    %cst_33 = arith.constant dense<0.000000e+00> : vector<8x32xf32>
    %109 = tpu.matmul %108, %93, %cst_33 {dimension_numbers = #tpu.dot_dimension_numbers<[1], [0], [0], [1], [0, 0, 1, 1], [], []>} : vector<8x8xbf16>, vector<8x32xbf16>, vector<8x32xf32> -> vector<8x32xf32>
    %110 = vector.extract_strided_slice %39 {offsets = [0, 96], sizes = [8, 32], strides = [1, 1]} : vector<8x128xf32> to vector<8x32xf32>
    %111 = arith.truncf %110 : vector<8x32xf32> to vector<8x32xbf16>
    %112 = vector.extract_strided_slice %41 {offsets = [0, 96], sizes = [8, 32], strides = [1, 1]} : vector<8x128xf32> to vector<8x32xf32>
    %113 = arith.truncf %112 : vector<8x32xf32> to vector<8x32xbf16>
    %114 = vector.extract_strided_slice %43 {offsets = [0, 96], sizes = [8, 32], strides = [1, 1]} : vector<8x128xf32> to vector<8x32xf32>
    %115 = arith.truncf %114 : vector<8x32xf32> to vector<8x32xbf16>
    %cst_34 = arith.constant dense<0.000000e+00> : vector<8x8xf32>
    %116 = tpu.matmul %111, %113, %cst_34 {dimension_numbers = #tpu.dot_dimension_numbers<[1], [1], [0], [0], [0, 0, 1, 0], [], []>} : vector<8x32xbf16>, vector<8x32xbf16>, vector<8x8xf32> -> vector<8x8xf32>
    %cst_35 = arith.constant 0.176776692 : f32
    %117 = vector.broadcast %cst_35 : f32 to vector<8x8xf32>
    %118 = arith.mulf %116, %117 : vector<8x8xf32>
    %cst_36 = arith.constant -1.000000e+30 : f32
    %119 = vector.broadcast %cst_36 : f32 to vector<8x8xf32>
    %120 = arith.select %4, %118, %119 : vector<8x8xi1>, vector<8x8xf32>
    %cst_37 = arith.constant dense<0xFF800000> : vector<8xf32>
    %121 = vector.multi_reduction <maximumf>, %120, %cst_37 [1] : vector<8x8xf32> to vector<8xf32>
    %122 = vector.shape_cast %121 : vector<8xf32> to vector<8x1xf32>
    %123 = vector.broadcast %122 : vector<8x1xf32> to vector<8x8xf32>
    %124 = arith.subf %120, %123 : vector<8x8xf32>
    %125 = math.exp %124 : vector<8x8xf32>
    %cst_38 = arith.constant dense<0.000000e+00> : vector<8xf32>
    %126 = vector.multi_reduction <add>, %125, %cst_38 [1] : vector<8x8xf32> to vector<8xf32>
    %127 = vector.shape_cast %126 : vector<8xf32> to vector<8x1xf32>
    %128 = vector.broadcast %127 : vector<8x1xf32> to vector<8x8xf32>
    %129 = arith.divf %125, %128 : vector<8x8xf32>
    %130 = arith.truncf %129 : vector<8x8xf32> to vector<8x8xbf16>
    %cst_39 = arith.constant dense<0.000000e+00> : vector<8x32xf32>
    %131 = tpu.matmul %130, %115, %cst_39 {dimension_numbers = #tpu.dot_dimension_numbers<[1], [0], [0], [1], [0, 0, 1, 1], [], []>} : vector<8x8xbf16>, vector<8x32xbf16>, vector<8x32xf32> -> vector<8x32xf32>
    %132 = tpu.concatenate %65, %87, %109, %131 in 1 : vector<8x32xf32>, vector<8x32xf32>, vector<8x32xf32>, vector<8x32xf32> -> vector<8x128xf32>
    %133 = vector.extract_strided_slice %37 {offsets = [1, 0, 0], sizes = [1, 8, 128], strides = [1, 1, 1]} : vector<2x8x384xf32> to vector<1x8x128xf32>
    %134 = vector.shape_cast %133 : vector<1x8x128xf32> to vector<8x128xf32>
    %135 = vector.extract_strided_slice %37 {offsets = [1, 0, 128], sizes = [1, 8, 128], strides = [1, 1, 1]} : vector<2x8x384xf32> to vector<1x8x128xf32>
    %136 = vector.shape_cast %135 : vector<1x8x128xf32> to vector<8x128xf32>
    %137 = vector.extract_strided_slice %37 {offsets = [1, 0, 256], sizes = [1, 8, 128], strides = [1, 1, 1]} : vector<2x8x384xf32> to vector<1x8x128xf32>
    %138 = vector.shape_cast %137 : vector<1x8x128xf32> to vector<8x128xf32>
    %139 = vector.extract_strided_slice %134 {offsets = [0, 0], sizes = [8, 32], strides = [1, 1]} : vector<8x128xf32> to vector<8x32xf32>
    %140 = arith.truncf %139 : vector<8x32xf32> to vector<8x32xbf16>
    %141 = vector.extract_strided_slice %136 {offsets = [0, 0], sizes = [8, 32], strides = [1, 1]} : vector<8x128xf32> to vector<8x32xf32>
    %142 = arith.truncf %141 : vector<8x32xf32> to vector<8x32xbf16>
    %143 = vector.extract_strided_slice %138 {offsets = [0, 0], sizes = [8, 32], strides = [1, 1]} : vector<8x128xf32> to vector<8x32xf32>
    %144 = arith.truncf %143 : vector<8x32xf32> to vector<8x32xbf16>
    %cst_40 = arith.constant dense<0.000000e+00> : vector<8x8xf32>
    %145 = tpu.matmul %140, %142, %cst_40 {dimension_numbers = #tpu.dot_dimension_numbers<[1], [1], [0], [0], [0, 0, 1, 0], [], []>} : vector<8x32xbf16>, vector<8x32xbf16>, vector<8x8xf32> -> vector<8x8xf32>
    %cst_41 = arith.constant 0.176776692 : f32
    %146 = vector.broadcast %cst_41 : f32 to vector<8x8xf32>
    %147 = arith.mulf %145, %146 : vector<8x8xf32>
    %cst_42 = arith.constant -1.000000e+30 : f32
    %148 = vector.broadcast %cst_42 : f32 to vector<8x8xf32>
    %149 = arith.select %4, %147, %148 : vector<8x8xi1>, vector<8x8xf32>
    %cst_43 = arith.constant dense<0xFF800000> : vector<8xf32>
    %150 = vector.multi_reduction <maximumf>, %149, %cst_43 [1] : vector<8x8xf32> to vector<8xf32>
    %151 = vector.shape_cast %150 : vector<8xf32> to vector<8x1xf32>
    %152 = vector.broadcast %151 : vector<8x1xf32> to vector<8x8xf32>
    %153 = arith.subf %149, %152 : vector<8x8xf32>
    %154 = math.exp %153 : vector<8x8xf32>
    %cst_44 = arith.constant dense<0.000000e+00> : vector<8xf32>
    %155 = vector.multi_reduction <add>, %154, %cst_44 [1] : vector<8x8xf32> to vector<8xf32>
    %156 = vector.shape_cast %155 : vector<8xf32> to vector<8x1xf32>
    %157 = vector.broadcast %156 : vector<8x1xf32> to vector<8x8xf32>
    %158 = arith.divf %154, %157 : vector<8x8xf32>
    %159 = arith.truncf %158 : vector<8x8xf32> to vector<8x8xbf16>
    %cst_45 = arith.constant dense<0.000000e+00> : vector<8x32xf32>
    %160 = tpu.matmul %159, %144, %cst_45 {dimension_numbers = #tpu.dot_dimension_numbers<[1], [0], [0], [1], [0, 0, 1, 1], [], []>} : vector<8x8xbf16>, vector<8x32xbf16>, vector<8x32xf32> -> vector<8x32xf32>
    %161 = vector.extract_strided_slice %134 {offsets = [0, 32], sizes = [8, 32], strides = [1, 1]} : vector<8x128xf32> to vector<8x32xf32>
    %162 = arith.truncf %161 : vector<8x32xf32> to vector<8x32xbf16>
    %163 = vector.extract_strided_slice %136 {offsets = [0, 32], sizes = [8, 32], strides = [1, 1]} : vector<8x128xf32> to vector<8x32xf32>
    %164 = arith.truncf %163 : vector<8x32xf32> to vector<8x32xbf16>
    %165 = vector.extract_strided_slice %138 {offsets = [0, 32], sizes = [8, 32], strides = [1, 1]} : vector<8x128xf32> to vector<8x32xf32>
    %166 = arith.truncf %165 : vector<8x32xf32> to vector<8x32xbf16>
    %cst_46 = arith.constant dense<0.000000e+00> : vector<8x8xf32>
    %167 = tpu.matmul %162, %164, %cst_46 {dimension_numbers = #tpu.dot_dimension_numbers<[1], [1], [0], [0], [0, 0, 1, 0], [], []>} : vector<8x32xbf16>, vector<8x32xbf16>, vector<8x8xf32> -> vector<8x8xf32>
    %cst_47 = arith.constant 0.176776692 : f32
    %168 = vector.broadcast %cst_47 : f32 to vector<8x8xf32>
    %169 = arith.mulf %167, %168 : vector<8x8xf32>
    %cst_48 = arith.constant -1.000000e+30 : f32
    %170 = vector.broadcast %cst_48 : f32 to vector<8x8xf32>
    %171 = arith.select %4, %169, %170 : vector<8x8xi1>, vector<8x8xf32>
    %cst_49 = arith.constant dense<0xFF800000> : vector<8xf32>
    %172 = vector.multi_reduction <maximumf>, %171, %cst_49 [1] : vector<8x8xf32> to vector<8xf32>
    %173 = vector.shape_cast %172 : vector<8xf32> to vector<8x1xf32>
    %174 = vector.broadcast %173 : vector<8x1xf32> to vector<8x8xf32>
    %175 = arith.subf %171, %174 : vector<8x8xf32>
    %176 = math.exp %175 : vector<8x8xf32>
    %cst_50 = arith.constant dense<0.000000e+00> : vector<8xf32>
    %177 = vector.multi_reduction <add>, %176, %cst_50 [1] : vector<8x8xf32> to vector<8xf32>
    %178 = vector.shape_cast %177 : vector<8xf32> to vector<8x1xf32>
    %179 = vector.broadcast %178 : vector<8x1xf32> to vector<8x8xf32>
    %180 = arith.divf %176, %179 : vector<8x8xf32>
    %181 = arith.truncf %180 : vector<8x8xf32> to vector<8x8xbf16>
    %cst_51 = arith.constant dense<0.000000e+00> : vector<8x32xf32>
    %182 = tpu.matmul %181, %166, %cst_51 {dimension_numbers = #tpu.dot_dimension_numbers<[1], [0], [0], [1], [0, 0, 1, 1], [], []>} : vector<8x8xbf16>, vector<8x32xbf16>, vector<8x32xf32> -> vector<8x32xf32>
    %183 = vector.extract_strided_slice %134 {offsets = [0, 64], sizes = [8, 32], strides = [1, 1]} : vector<8x128xf32> to vector<8x32xf32>
    %184 = arith.truncf %183 : vector<8x32xf32> to vector<8x32xbf16>
    %185 = vector.extract_strided_slice %136 {offsets = [0, 64], sizes = [8, 32], strides = [1, 1]} : vector<8x128xf32> to vector<8x32xf32>
    %186 = arith.truncf %185 : vector<8x32xf32> to vector<8x32xbf16>
    %187 = vector.extract_strided_slice %138 {offsets = [0, 64], sizes = [8, 32], strides = [1, 1]} : vector<8x128xf32> to vector<8x32xf32>
    %188 = arith.truncf %187 : vector<8x32xf32> to vector<8x32xbf16>
    %cst_52 = arith.constant dense<0.000000e+00> : vector<8x8xf32>
    %189 = tpu.matmul %184, %186, %cst_52 {dimension_numbers = #tpu.dot_dimension_numbers<[1], [1], [0], [0], [0, 0, 1, 0], [], []>} : vector<8x32xbf16>, vector<8x32xbf16>, vector<8x8xf32> -> vector<8x8xf32>
    %cst_53 = arith.constant 0.176776692 : f32
    %190 = vector.broadcast %cst_53 : f32 to vector<8x8xf32>
    %191 = arith.mulf %189, %190 : vector<8x8xf32>
    %cst_54 = arith.constant -1.000000e+30 : f32
    %192 = vector.broadcast %cst_54 : f32 to vector<8x8xf32>
    %193 = arith.select %4, %191, %192 : vector<8x8xi1>, vector<8x8xf32>
    %cst_55 = arith.constant dense<0xFF800000> : vector<8xf32>
    %194 = vector.multi_reduction <maximumf>, %193, %cst_55 [1] : vector<8x8xf32> to vector<8xf32>
    %195 = vector.shape_cast %194 : vector<8xf32> to vector<8x1xf32>
    %196 = vector.broadcast %195 : vector<8x1xf32> to vector<8x8xf32>
    %197 = arith.subf %193, %196 : vector<8x8xf32>
    %198 = math.exp %197 : vector<8x8xf32>
    %cst_56 = arith.constant dense<0.000000e+00> : vector<8xf32>
    %199 = vector.multi_reduction <add>, %198, %cst_56 [1] : vector<8x8xf32> to vector<8xf32>
    %200 = vector.shape_cast %199 : vector<8xf32> to vector<8x1xf32>
    %201 = vector.broadcast %200 : vector<8x1xf32> to vector<8x8xf32>
    %202 = arith.divf %198, %201 : vector<8x8xf32>
    %203 = arith.truncf %202 : vector<8x8xf32> to vector<8x8xbf16>
    %cst_57 = arith.constant dense<0.000000e+00> : vector<8x32xf32>
    %204 = tpu.matmul %203, %188, %cst_57 {dimension_numbers = #tpu.dot_dimension_numbers<[1], [0], [0], [1], [0, 0, 1, 1], [], []>} : vector<8x8xbf16>, vector<8x32xbf16>, vector<8x32xf32> -> vector<8x32xf32>
    %205 = vector.extract_strided_slice %134 {offsets = [0, 96], sizes = [8, 32], strides = [1, 1]} : vector<8x128xf32> to vector<8x32xf32>
    %206 = arith.truncf %205 : vector<8x32xf32> to vector<8x32xbf16>
    %207 = vector.extract_strided_slice %136 {offsets = [0, 96], sizes = [8, 32], strides = [1, 1]} : vector<8x128xf32> to vector<8x32xf32>
    %208 = arith.truncf %207 : vector<8x32xf32> to vector<8x32xbf16>
    %209 = vector.extract_strided_slice %138 {offsets = [0, 96], sizes = [8, 32], strides = [1, 1]} : vector<8x128xf32> to vector<8x32xf32>
    %210 = arith.truncf %209 : vector<8x32xf32> to vector<8x32xbf16>
    %cst_58 = arith.constant dense<0.000000e+00> : vector<8x8xf32>
    %211 = tpu.matmul %206, %208, %cst_58 {dimension_numbers = #tpu.dot_dimension_numbers<[1], [1], [0], [0], [0, 0, 1, 0], [], []>} : vector<8x32xbf16>, vector<8x32xbf16>, vector<8x8xf32> -> vector<8x8xf32>
    %cst_59 = arith.constant 0.176776692 : f32
    %212 = vector.broadcast %cst_59 : f32 to vector<8x8xf32>
    %213 = arith.mulf %211, %212 : vector<8x8xf32>
    %cst_60 = arith.constant -1.000000e+30 : f32
    %214 = vector.broadcast %cst_60 : f32 to vector<8x8xf32>
    %215 = arith.select %4, %213, %214 : vector<8x8xi1>, vector<8x8xf32>
    %cst_61 = arith.constant dense<0xFF800000> : vector<8xf32>
    %216 = vector.multi_reduction <maximumf>, %215, %cst_61 [1] : vector<8x8xf32> to vector<8xf32>
    %217 = vector.shape_cast %216 : vector<8xf32> to vector<8x1xf32>
    %218 = vector.broadcast %217 : vector<8x1xf32> to vector<8x8xf32>
    %219 = arith.subf %215, %218 : vector<8x8xf32>
    %220 = math.exp %219 : vector<8x8xf32>
    %cst_62 = arith.constant dense<0.000000e+00> : vector<8xf32>
    %221 = vector.multi_reduction <add>, %220, %cst_62 [1] : vector<8x8xf32> to vector<8xf32>
    %222 = vector.shape_cast %221 : vector<8xf32> to vector<8x1xf32>
    %223 = vector.broadcast %222 : vector<8x1xf32> to vector<8x8xf32>
    %224 = arith.divf %220, %223 : vector<8x8xf32>
    %225 = arith.truncf %224 : vector<8x8xf32> to vector<8x8xbf16>
    %cst_63 = arith.constant dense<0.000000e+00> : vector<8x32xf32>
    %226 = tpu.matmul %225, %210, %cst_63 {dimension_numbers = #tpu.dot_dimension_numbers<[1], [0], [0], [1], [0, 0, 1, 1], [], []>} : vector<8x8xbf16>, vector<8x32xbf16>, vector<8x32xf32> -> vector<8x32xf32>
    %227 = tpu.concatenate %160, %182, %204, %226 in 1 : vector<8x32xf32>, vector<8x32xf32>, vector<8x32xf32>, vector<8x32xf32> -> vector<8x128xf32>
    %228 = tpu.concatenate %132, %227 in 0 : vector<8x128xf32>, vector<8x128xf32> -> vector<16x128xf32>
    %229 = arith.truncf %228 : vector<16x128xf32> to vector<16x128xbf16>
    %c0_64 = arith.constant 0 : index
    %c0_65 = arith.constant 0 : index
    %c0_66 = arith.constant 0 : index
    %230 = vector.load %arg5[%c0_64, %c0_65, %c0_66] : memref<2x128x128xbf16, #tpu.memory_space<vmem>>, vector<1x128x128xbf16>
    %231 = vector.shape_cast %230 : vector<1x128x128xbf16> to vector<128x128xbf16>
    %cst_67 = arith.constant dense<0.000000e+00> : vector<16x128xf32>
    %232 = tpu.matmul %229, %231, %cst_67 {dimension_numbers = #tpu.dot_dimension_numbers<[1], [0], [0], [1], [0, 0, 1, 1], [], []>} : vector<16x128xbf16>, vector<128x128xbf16>, vector<16x128xf32> -> vector<16x128xf32>
    %c0_68 = arith.constant 0 : index
    %c0_69 = arith.constant 0 : index
    %c0_70 = arith.constant 0 : index
    %233 = vector.load %arg6[%c0_68, %c0_69, %c0_70] : memref<2x1x128xf32, #tpu.memory_space<vmem>>, vector<1x1x128xf32>
    %234 = vector.shape_cast %233 : vector<1x1x128xf32> to vector<1x128xf32>
    %235 = vector.broadcast %234 : vector<1x128xf32> to vector<16x128xf32>
    %236 = arith.addf %232, %235 : vector<16x128xf32>
    %237 = arith.addf %1, %236 : vector<16x128xf32>
    %c0_71 = arith.constant 0 : index
    %c0_72 = arith.constant 0 : index
    %c0_73 = arith.constant 0 : index
    %238 = vector.load %arg7[%c0_71, %c0_72, %c0_73] : memref<2x1x128xf32, #tpu.memory_space<vmem>>, vector<1x1x128xf32>
    %239 = vector.shape_cast %238 : vector<1x1x128xf32> to vector<1x128xf32>
    %c0_74 = arith.constant 0 : index
    %c0_75 = arith.constant 0 : index
    %c0_76 = arith.constant 0 : index
    %240 = vector.load %arg8[%c0_74, %c0_75, %c0_76] : memref<2x1x128xf32, #tpu.memory_space<vmem>>, vector<1x1x128xf32>
    %241 = vector.shape_cast %240 : vector<1x1x128xf32> to vector<1x128xf32>
    %cst_77 = arith.constant dense<0.000000e+00> : vector<16xf32>
    %242 = vector.multi_reduction <add>, %237, %cst_77 [1] : vector<16x128xf32> to vector<16xf32>
    %243 = vector.shape_cast %242 : vector<16xf32> to vector<16x1xf32>
    %cst_78 = arith.constant 1.280000e+02 : f32
    %244 = vector.broadcast %cst_78 : f32 to vector<16x1xf32>
    %245 = arith.divf %243, %244 : vector<16x1xf32>
    %246 = vector.broadcast %245 : vector<16x1xf32> to vector<16x128xf32>
    %247 = arith.subf %237, %246 : vector<16x128xf32>
    %248 = vector.broadcast %245 : vector<16x1xf32> to vector<16x128xf32>
    %249 = arith.subf %237, %248 : vector<16x128xf32>
    %250 = arith.mulf %247, %249 : vector<16x128xf32>
    %cst_79 = arith.constant dense<0.000000e+00> : vector<16xf32>
    %251 = vector.multi_reduction <add>, %250, %cst_79 [1] : vector<16x128xf32> to vector<16xf32>
    %252 = vector.shape_cast %251 : vector<16xf32> to vector<16x1xf32>
    %cst_80 = arith.constant 1.280000e+02 : f32
    %253 = vector.broadcast %cst_80 : f32 to vector<16x1xf32>
    %254 = arith.divf %252, %253 : vector<16x1xf32>
    %255 = vector.broadcast %245 : vector<16x1xf32> to vector<16x128xf32>
    %256 = arith.subf %237, %255 : vector<16x128xf32>
    %cst_81 = arith.constant 9.99999974E-6 : f32
    %257 = vector.broadcast %cst_81 : f32 to vector<16x1xf32>
    %258 = arith.addf %254, %257 : vector<16x1xf32>
    %259 = math.rsqrt %258 : vector<16x1xf32>
    %260 = vector.broadcast %259 : vector<16x1xf32> to vector<16x128xf32>
    %261 = arith.mulf %256, %260 : vector<16x128xf32>
    %262 = vector.broadcast %239 : vector<1x128xf32> to vector<16x128xf32>
    %263 = arith.mulf %261, %262 : vector<16x128xf32>
    %264 = vector.broadcast %241 : vector<1x128xf32> to vector<16x128xf32>
    %265 = arith.addf %263, %264 : vector<16x128xf32>
    %266 = arith.truncf %265 : vector<16x128xf32> to vector<16x128xbf16>
    %c0_82 = arith.constant 0 : index
    %c0_83 = arith.constant 0 : index
    %c0_84 = arith.constant 0 : index
    %267 = vector.load %arg9[%c0_82, %c0_83, %c0_84] : memref<2x128x512xbf16, #tpu.memory_space<vmem>>, vector<1x128x512xbf16>
    %268 = vector.shape_cast %267 : vector<1x128x512xbf16> to vector<128x512xbf16>
    %cst_85 = arith.constant dense<0.000000e+00> : vector<16x512xf32>
    %269 = tpu.matmul %266, %268, %cst_85 {dimension_numbers = #tpu.dot_dimension_numbers<[1], [0], [0], [1], [0, 0, 1, 1], [], []>} : vector<16x128xbf16>, vector<128x512xbf16>, vector<16x512xf32> -> vector<16x512xf32>
    %c0_86 = arith.constant 0 : index
    %c0_87 = arith.constant 0 : index
    %c0_88 = arith.constant 0 : index
    %270 = vector.load %arg10[%c0_86, %c0_87, %c0_88] : memref<2x1x512xf32, #tpu.memory_space<vmem>>, vector<1x1x512xf32>
    %271 = vector.shape_cast %270 : vector<1x1x512xf32> to vector<1x512xf32>
    %272 = vector.broadcast %271 : vector<1x512xf32> to vector<16x512xf32>
    %273 = arith.addf %269, %272 : vector<16x512xf32>
    %cst_89 = arith.constant 0.000000e+00 : f32
    %274 = vector.broadcast %cst_89 : f32 to vector<16x512xf32>
    %275 = arith.maximumf %273, %274 : vector<16x512xf32>
    %276 = arith.truncf %275 : vector<16x512xf32> to vector<16x512xbf16>
    %c0_90 = arith.constant 0 : index
    %c0_91 = arith.constant 0 : index
    %c0_92 = arith.constant 0 : index
    %277 = vector.load %arg11[%c0_90, %c0_91, %c0_92] : memref<2x512x128xbf16, #tpu.memory_space<vmem>>, vector<1x512x128xbf16>
    %278 = vector.shape_cast %277 : vector<1x512x128xbf16> to vector<512x128xbf16>
    %cst_93 = arith.constant dense<0.000000e+00> : vector<16x128xf32>
    %279 = tpu.matmul %276, %278, %cst_93 {dimension_numbers = #tpu.dot_dimension_numbers<[1], [0], [0], [1], [0, 0, 1, 1], [], []>} : vector<16x512xbf16>, vector<512x128xbf16>, vector<16x128xf32> -> vector<16x128xf32>
    %c0_94 = arith.constant 0 : index
    %c0_95 = arith.constant 0 : index
    %c0_96 = arith.constant 0 : index
    %280 = vector.load %arg12[%c0_94, %c0_95, %c0_96] : memref<2x1x128xf32, #tpu.memory_space<vmem>>, vector<1x1x128xf32>
    %281 = vector.shape_cast %280 : vector<1x1x128xf32> to vector<1x128xf32>
    %282 = vector.broadcast %281 : vector<1x128xf32> to vector<16x128xf32>
    %283 = arith.addf %279, %282 : vector<16x128xf32>
    %284 = arith.addf %237, %283 : vector<16x128xf32>
    %c1 = arith.constant 1 : index
    %c0_97 = arith.constant 0 : index
    %c0_98 = arith.constant 0 : index
    %285 = vector.load %arg2[%c1, %c0_97, %c0_98] : memref<2x1x128xf32, #tpu.memory_space<vmem>>, vector<1x1x128xf32>
    %286 = vector.shape_cast %285 : vector<1x1x128xf32> to vector<1x128xf32>
    %c1_99 = arith.constant 1 : index
    %c0_100 = arith.constant 0 : index
    %c0_101 = arith.constant 0 : index
    %287 = vector.load %arg3[%c1_99, %c0_100, %c0_101] : memref<2x1x128xf32, #tpu.memory_space<vmem>>, vector<1x1x128xf32>
    %288 = vector.shape_cast %287 : vector<1x1x128xf32> to vector<1x128xf32>
    %cst_102 = arith.constant dense<0.000000e+00> : vector<16xf32>
    %289 = vector.multi_reduction <add>, %284, %cst_102 [1] : vector<16x128xf32> to vector<16xf32>
    %290 = vector.shape_cast %289 : vector<16xf32> to vector<16x1xf32>
    %cst_103 = arith.constant 1.280000e+02 : f32
    %291 = vector.broadcast %cst_103 : f32 to vector<16x1xf32>
    %292 = arith.divf %290, %291 : vector<16x1xf32>
    %293 = vector.broadcast %292 : vector<16x1xf32> to vector<16x128xf32>
    %294 = arith.subf %284, %293 : vector<16x128xf32>
    %295 = vector.broadcast %292 : vector<16x1xf32> to vector<16x128xf32>
    %296 = arith.subf %284, %295 : vector<16x128xf32>
    %297 = arith.mulf %294, %296 : vector<16x128xf32>
    %cst_104 = arith.constant dense<0.000000e+00> : vector<16xf32>
    %298 = vector.multi_reduction <add>, %297, %cst_104 [1] : vector<16x128xf32> to vector<16xf32>
    %299 = vector.shape_cast %298 : vector<16xf32> to vector<16x1xf32>
    %cst_105 = arith.constant 1.280000e+02 : f32
    %300 = vector.broadcast %cst_105 : f32 to vector<16x1xf32>
    %301 = arith.divf %299, %300 : vector<16x1xf32>
    %302 = vector.broadcast %292 : vector<16x1xf32> to vector<16x128xf32>
    %303 = arith.subf %284, %302 : vector<16x128xf32>
    %cst_106 = arith.constant 9.99999974E-6 : f32
    %304 = vector.broadcast %cst_106 : f32 to vector<16x1xf32>
    %305 = arith.addf %301, %304 : vector<16x1xf32>
    %306 = math.rsqrt %305 : vector<16x1xf32>
    %307 = vector.broadcast %306 : vector<16x1xf32> to vector<16x128xf32>
    %308 = arith.mulf %303, %307 : vector<16x128xf32>
    %309 = vector.broadcast %286 : vector<1x128xf32> to vector<16x128xf32>
    %310 = arith.mulf %308, %309 : vector<16x128xf32>
    %311 = vector.broadcast %288 : vector<1x128xf32> to vector<16x128xf32>
    %312 = arith.addf %310, %311 : vector<16x128xf32>
    %313 = arith.truncf %312 : vector<16x128xf32> to vector<16x128xbf16>
    %c1_107 = arith.constant 1 : index
    %c0_108 = arith.constant 0 : index
    %c0_109 = arith.constant 0 : index
    %314 = vector.load %arg4[%c1_107, %c0_108, %c0_109] : memref<2x128x384xbf16, #tpu.memory_space<vmem>>, vector<1x128x384xbf16>
    %315 = vector.shape_cast %314 : vector<1x128x384xbf16> to vector<128x384xbf16>
    %cst_110 = arith.constant dense<0.000000e+00> : vector<16x384xf32>
    %316 = tpu.matmul %313, %315, %cst_110 {dimension_numbers = #tpu.dot_dimension_numbers<[1], [0], [0], [1], [0, 0, 1, 1], [], []>} : vector<16x128xbf16>, vector<128x384xbf16>, vector<16x384xf32> -> vector<16x384xf32>
    %317 = vector.shape_cast %316 : vector<16x384xf32> to vector<2x8x384xf32>
    %318 = vector.extract_strided_slice %317 {offsets = [0, 0, 0], sizes = [1, 8, 128], strides = [1, 1, 1]} : vector<2x8x384xf32> to vector<1x8x128xf32>
    %319 = vector.shape_cast %318 : vector<1x8x128xf32> to vector<8x128xf32>
    %320 = vector.extract_strided_slice %317 {offsets = [0, 0, 128], sizes = [1, 8, 128], strides = [1, 1, 1]} : vector<2x8x384xf32> to vector<1x8x128xf32>
    %321 = vector.shape_cast %320 : vector<1x8x128xf32> to vector<8x128xf32>
    %322 = vector.extract_strided_slice %317 {offsets = [0, 0, 256], sizes = [1, 8, 128], strides = [1, 1, 1]} : vector<2x8x384xf32> to vector<1x8x128xf32>
    %323 = vector.shape_cast %322 : vector<1x8x128xf32> to vector<8x128xf32>
    %324 = vector.extract_strided_slice %319 {offsets = [0, 0], sizes = [8, 32], strides = [1, 1]} : vector<8x128xf32> to vector<8x32xf32>
    %325 = arith.truncf %324 : vector<8x32xf32> to vector<8x32xbf16>
    %326 = vector.extract_strided_slice %321 {offsets = [0, 0], sizes = [8, 32], strides = [1, 1]} : vector<8x128xf32> to vector<8x32xf32>
    %327 = arith.truncf %326 : vector<8x32xf32> to vector<8x32xbf16>
    %328 = vector.extract_strided_slice %323 {offsets = [0, 0], sizes = [8, 32], strides = [1, 1]} : vector<8x128xf32> to vector<8x32xf32>
    %329 = arith.truncf %328 : vector<8x32xf32> to vector<8x32xbf16>
    %cst_111 = arith.constant dense<0.000000e+00> : vector<8x8xf32>
    %330 = tpu.matmul %325, %327, %cst_111 {dimension_numbers = #tpu.dot_dimension_numbers<[1], [1], [0], [0], [0, 0, 1, 0], [], []>} : vector<8x32xbf16>, vector<8x32xbf16>, vector<8x8xf32> -> vector<8x8xf32>
    %cst_112 = arith.constant 0.176776692 : f32
    %331 = vector.broadcast %cst_112 : f32 to vector<8x8xf32>
    %332 = arith.mulf %330, %331 : vector<8x8xf32>
    %cst_113 = arith.constant -1.000000e+30 : f32
    %333 = vector.broadcast %cst_113 : f32 to vector<8x8xf32>
    %334 = arith.select %4, %332, %333 : vector<8x8xi1>, vector<8x8xf32>
    %cst_114 = arith.constant dense<0xFF800000> : vector<8xf32>
    %335 = vector.multi_reduction <maximumf>, %334, %cst_114 [1] : vector<8x8xf32> to vector<8xf32>
    %336 = vector.shape_cast %335 : vector<8xf32> to vector<8x1xf32>
    %337 = vector.broadcast %336 : vector<8x1xf32> to vector<8x8xf32>
    %338 = arith.subf %334, %337 : vector<8x8xf32>
    %339 = math.exp %338 : vector<8x8xf32>
    %cst_115 = arith.constant dense<0.000000e+00> : vector<8xf32>
    %340 = vector.multi_reduction <add>, %339, %cst_115 [1] : vector<8x8xf32> to vector<8xf32>
    %341 = vector.shape_cast %340 : vector<8xf32> to vector<8x1xf32>
    %342 = vector.broadcast %341 : vector<8x1xf32> to vector<8x8xf32>
    %343 = arith.divf %339, %342 : vector<8x8xf32>
    %344 = arith.truncf %343 : vector<8x8xf32> to vector<8x8xbf16>
    %cst_116 = arith.constant dense<0.000000e+00> : vector<8x32xf32>
    %345 = tpu.matmul %344, %329, %cst_116 {dimension_numbers = #tpu.dot_dimension_numbers<[1], [0], [0], [1], [0, 0, 1, 1], [], []>} : vector<8x8xbf16>, vector<8x32xbf16>, vector<8x32xf32> -> vector<8x32xf32>
    %346 = vector.extract_strided_slice %319 {offsets = [0, 32], sizes = [8, 32], strides = [1, 1]} : vector<8x128xf32> to vector<8x32xf32>
    %347 = arith.truncf %346 : vector<8x32xf32> to vector<8x32xbf16>
    %348 = vector.extract_strided_slice %321 {offsets = [0, 32], sizes = [8, 32], strides = [1, 1]} : vector<8x128xf32> to vector<8x32xf32>
    %349 = arith.truncf %348 : vector<8x32xf32> to vector<8x32xbf16>
    %350 = vector.extract_strided_slice %323 {offsets = [0, 32], sizes = [8, 32], strides = [1, 1]} : vector<8x128xf32> to vector<8x32xf32>
    %351 = arith.truncf %350 : vector<8x32xf32> to vector<8x32xbf16>
    %cst_117 = arith.constant dense<0.000000e+00> : vector<8x8xf32>
    %352 = tpu.matmul %347, %349, %cst_117 {dimension_numbers = #tpu.dot_dimension_numbers<[1], [1], [0], [0], [0, 0, 1, 0], [], []>} : vector<8x32xbf16>, vector<8x32xbf16>, vector<8x8xf32> -> vector<8x8xf32>
    %cst_118 = arith.constant 0.176776692 : f32
    %353 = vector.broadcast %cst_118 : f32 to vector<8x8xf32>
    %354 = arith.mulf %352, %353 : vector<8x8xf32>
    %cst_119 = arith.constant -1.000000e+30 : f32
    %355 = vector.broadcast %cst_119 : f32 to vector<8x8xf32>
    %356 = arith.select %4, %354, %355 : vector<8x8xi1>, vector<8x8xf32>
    %cst_120 = arith.constant dense<0xFF800000> : vector<8xf32>
    %357 = vector.multi_reduction <maximumf>, %356, %cst_120 [1] : vector<8x8xf32> to vector<8xf32>
    %358 = vector.shape_cast %357 : vector<8xf32> to vector<8x1xf32>
    %359 = vector.broadcast %358 : vector<8x1xf32> to vector<8x8xf32>
    %360 = arith.subf %356, %359 : vector<8x8xf32>
    %361 = math.exp %360 : vector<8x8xf32>
    %cst_121 = arith.constant dense<0.000000e+00> : vector<8xf32>
    %362 = vector.multi_reduction <add>, %361, %cst_121 [1] : vector<8x8xf32> to vector<8xf32>
    %363 = vector.shape_cast %362 : vector<8xf32> to vector<8x1xf32>
    %364 = vector.broadcast %363 : vector<8x1xf32> to vector<8x8xf32>
    %365 = arith.divf %361, %364 : vector<8x8xf32>
    %366 = arith.truncf %365 : vector<8x8xf32> to vector<8x8xbf16>
    %cst_122 = arith.constant dense<0.000000e+00> : vector<8x32xf32>
    %367 = tpu.matmul %366, %351, %cst_122 {dimension_numbers = #tpu.dot_dimension_numbers<[1], [0], [0], [1], [0, 0, 1, 1], [], []>} : vector<8x8xbf16>, vector<8x32xbf16>, vector<8x32xf32> -> vector<8x32xf32>
    %368 = vector.extract_strided_slice %319 {offsets = [0, 64], sizes = [8, 32], strides = [1, 1]} : vector<8x128xf32> to vector<8x32xf32>
    %369 = arith.truncf %368 : vector<8x32xf32> to vector<8x32xbf16>
    %370 = vector.extract_strided_slice %321 {offsets = [0, 64], sizes = [8, 32], strides = [1, 1]} : vector<8x128xf32> to vector<8x32xf32>
    %371 = arith.truncf %370 : vector<8x32xf32> to vector<8x32xbf16>
    %372 = vector.extract_strided_slice %323 {offsets = [0, 64], sizes = [8, 32], strides = [1, 1]} : vector<8x128xf32> to vector<8x32xf32>
    %373 = arith.truncf %372 : vector<8x32xf32> to vector<8x32xbf16>
    %cst_123 = arith.constant dense<0.000000e+00> : vector<8x8xf32>
    %374 = tpu.matmul %369, %371, %cst_123 {dimension_numbers = #tpu.dot_dimension_numbers<[1], [1], [0], [0], [0, 0, 1, 0], [], []>} : vector<8x32xbf16>, vector<8x32xbf16>, vector<8x8xf32> -> vector<8x8xf32>
    %cst_124 = arith.constant 0.176776692 : f32
    %375 = vector.broadcast %cst_124 : f32 to vector<8x8xf32>
    %376 = arith.mulf %374, %375 : vector<8x8xf32>
    %cst_125 = arith.constant -1.000000e+30 : f32
    %377 = vector.broadcast %cst_125 : f32 to vector<8x8xf32>
    %378 = arith.select %4, %376, %377 : vector<8x8xi1>, vector<8x8xf32>
    %cst_126 = arith.constant dense<0xFF800000> : vector<8xf32>
    %379 = vector.multi_reduction <maximumf>, %378, %cst_126 [1] : vector<8x8xf32> to vector<8xf32>
    %380 = vector.shape_cast %379 : vector<8xf32> to vector<8x1xf32>
    %381 = vector.broadcast %380 : vector<8x1xf32> to vector<8x8xf32>
    %382 = arith.subf %378, %381 : vector<8x8xf32>
    %383 = math.exp %382 : vector<8x8xf32>
    %cst_127 = arith.constant dense<0.000000e+00> : vector<8xf32>
    %384 = vector.multi_reduction <add>, %383, %cst_127 [1] : vector<8x8xf32> to vector<8xf32>
    %385 = vector.shape_cast %384 : vector<8xf32> to vector<8x1xf32>
    %386 = vector.broadcast %385 : vector<8x1xf32> to vector<8x8xf32>
    %387 = arith.divf %383, %386 : vector<8x8xf32>
    %388 = arith.truncf %387 : vector<8x8xf32> to vector<8x8xbf16>
    %cst_128 = arith.constant dense<0.000000e+00> : vector<8x32xf32>
    %389 = tpu.matmul %388, %373, %cst_128 {dimension_numbers = #tpu.dot_dimension_numbers<[1], [0], [0], [1], [0, 0, 1, 1], [], []>} : vector<8x8xbf16>, vector<8x32xbf16>, vector<8x32xf32> -> vector<8x32xf32>
    %390 = vector.extract_strided_slice %319 {offsets = [0, 96], sizes = [8, 32], strides = [1, 1]} : vector<8x128xf32> to vector<8x32xf32>
    %391 = arith.truncf %390 : vector<8x32xf32> to vector<8x32xbf16>
    %392 = vector.extract_strided_slice %321 {offsets = [0, 96], sizes = [8, 32], strides = [1, 1]} : vector<8x128xf32> to vector<8x32xf32>
    %393 = arith.truncf %392 : vector<8x32xf32> to vector<8x32xbf16>
    %394 = vector.extract_strided_slice %323 {offsets = [0, 96], sizes = [8, 32], strides = [1, 1]} : vector<8x128xf32> to vector<8x32xf32>
    %395 = arith.truncf %394 : vector<8x32xf32> to vector<8x32xbf16>
    %cst_129 = arith.constant dense<0.000000e+00> : vector<8x8xf32>
    %396 = tpu.matmul %391, %393, %cst_129 {dimension_numbers = #tpu.dot_dimension_numbers<[1], [1], [0], [0], [0, 0, 1, 0], [], []>} : vector<8x32xbf16>, vector<8x32xbf16>, vector<8x8xf32> -> vector<8x8xf32>
    %cst_130 = arith.constant 0.176776692 : f32
    %397 = vector.broadcast %cst_130 : f32 to vector<8x8xf32>
    %398 = arith.mulf %396, %397 : vector<8x8xf32>
    %cst_131 = arith.constant -1.000000e+30 : f32
    %399 = vector.broadcast %cst_131 : f32 to vector<8x8xf32>
    %400 = arith.select %4, %398, %399 : vector<8x8xi1>, vector<8x8xf32>
    %cst_132 = arith.constant dense<0xFF800000> : vector<8xf32>
    %401 = vector.multi_reduction <maximumf>, %400, %cst_132 [1] : vector<8x8xf32> to vector<8xf32>
    %402 = vector.shape_cast %401 : vector<8xf32> to vector<8x1xf32>
    %403 = vector.broadcast %402 : vector<8x1xf32> to vector<8x8xf32>
    %404 = arith.subf %400, %403 : vector<8x8xf32>
    %405 = math.exp %404 : vector<8x8xf32>
    %cst_133 = arith.constant dense<0.000000e+00> : vector<8xf32>
    %406 = vector.multi_reduction <add>, %405, %cst_133 [1] : vector<8x8xf32> to vector<8xf32>
    %407 = vector.shape_cast %406 : vector<8xf32> to vector<8x1xf32>
    %408 = vector.broadcast %407 : vector<8x1xf32> to vector<8x8xf32>
    %409 = arith.divf %405, %408 : vector<8x8xf32>
    %410 = arith.truncf %409 : vector<8x8xf32> to vector<8x8xbf16>
    %cst_134 = arith.constant dense<0.000000e+00> : vector<8x32xf32>
    %411 = tpu.matmul %410, %395, %cst_134 {dimension_numbers = #tpu.dot_dimension_numbers<[1], [0], [0], [1], [0, 0, 1, 1], [], []>} : vector<8x8xbf16>, vector<8x32xbf16>, vector<8x32xf32> -> vector<8x32xf32>
    %412 = tpu.concatenate %345, %367, %389, %411 in 1 : vector<8x32xf32>, vector<8x32xf32>, vector<8x32xf32>, vector<8x32xf32> -> vector<8x128xf32>
    %413 = vector.extract_strided_slice %317 {offsets = [1, 0, 0], sizes = [1, 8, 128], strides = [1, 1, 1]} : vector<2x8x384xf32> to vector<1x8x128xf32>
    %414 = vector.shape_cast %413 : vector<1x8x128xf32> to vector<8x128xf32>
    %415 = vector.extract_strided_slice %317 {offsets = [1, 0, 128], sizes = [1, 8, 128], strides = [1, 1, 1]} : vector<2x8x384xf32> to vector<1x8x128xf32>
    %416 = vector.shape_cast %415 : vector<1x8x128xf32> to vector<8x128xf32>
    %417 = vector.extract_strided_slice %317 {offsets = [1, 0, 256], sizes = [1, 8, 128], strides = [1, 1, 1]} : vector<2x8x384xf32> to vector<1x8x128xf32>
    %418 = vector.shape_cast %417 : vector<1x8x128xf32> to vector<8x128xf32>
    %419 = vector.extract_strided_slice %414 {offsets = [0, 0], sizes = [8, 32], strides = [1, 1]} : vector<8x128xf32> to vector<8x32xf32>
    %420 = arith.truncf %419 : vector<8x32xf32> to vector<8x32xbf16>
    %421 = vector.extract_strided_slice %416 {offsets = [0, 0], sizes = [8, 32], strides = [1, 1]} : vector<8x128xf32> to vector<8x32xf32>
    %422 = arith.truncf %421 : vector<8x32xf32> to vector<8x32xbf16>
    %423 = vector.extract_strided_slice %418 {offsets = [0, 0], sizes = [8, 32], strides = [1, 1]} : vector<8x128xf32> to vector<8x32xf32>
    %424 = arith.truncf %423 : vector<8x32xf32> to vector<8x32xbf16>
    %cst_135 = arith.constant dense<0.000000e+00> : vector<8x8xf32>
    %425 = tpu.matmul %420, %422, %cst_135 {dimension_numbers = #tpu.dot_dimension_numbers<[1], [1], [0], [0], [0, 0, 1, 0], [], []>} : vector<8x32xbf16>, vector<8x32xbf16>, vector<8x8xf32> -> vector<8x8xf32>
    %cst_136 = arith.constant 0.176776692 : f32
    %426 = vector.broadcast %cst_136 : f32 to vector<8x8xf32>
    %427 = arith.mulf %425, %426 : vector<8x8xf32>
    %cst_137 = arith.constant -1.000000e+30 : f32
    %428 = vector.broadcast %cst_137 : f32 to vector<8x8xf32>
    %429 = arith.select %4, %427, %428 : vector<8x8xi1>, vector<8x8xf32>
    %cst_138 = arith.constant dense<0xFF800000> : vector<8xf32>
    %430 = vector.multi_reduction <maximumf>, %429, %cst_138 [1] : vector<8x8xf32> to vector<8xf32>
    %431 = vector.shape_cast %430 : vector<8xf32> to vector<8x1xf32>
    %432 = vector.broadcast %431 : vector<8x1xf32> to vector<8x8xf32>
    %433 = arith.subf %429, %432 : vector<8x8xf32>
    %434 = math.exp %433 : vector<8x8xf32>
    %cst_139 = arith.constant dense<0.000000e+00> : vector<8xf32>
    %435 = vector.multi_reduction <add>, %434, %cst_139 [1] : vector<8x8xf32> to vector<8xf32>
    %436 = vector.shape_cast %435 : vector<8xf32> to vector<8x1xf32>
    %437 = vector.broadcast %436 : vector<8x1xf32> to vector<8x8xf32>
    %438 = arith.divf %434, %437 : vector<8x8xf32>
    %439 = arith.truncf %438 : vector<8x8xf32> to vector<8x8xbf16>
    %cst_140 = arith.constant dense<0.000000e+00> : vector<8x32xf32>
    %440 = tpu.matmul %439, %424, %cst_140 {dimension_numbers = #tpu.dot_dimension_numbers<[1], [0], [0], [1], [0, 0, 1, 1], [], []>} : vector<8x8xbf16>, vector<8x32xbf16>, vector<8x32xf32> -> vector<8x32xf32>
    %441 = vector.extract_strided_slice %414 {offsets = [0, 32], sizes = [8, 32], strides = [1, 1]} : vector<8x128xf32> to vector<8x32xf32>
    %442 = arith.truncf %441 : vector<8x32xf32> to vector<8x32xbf16>
    %443 = vector.extract_strided_slice %416 {offsets = [0, 32], sizes = [8, 32], strides = [1, 1]} : vector<8x128xf32> to vector<8x32xf32>
    %444 = arith.truncf %443 : vector<8x32xf32> to vector<8x32xbf16>
    %445 = vector.extract_strided_slice %418 {offsets = [0, 32], sizes = [8, 32], strides = [1, 1]} : vector<8x128xf32> to vector<8x32xf32>
    %446 = arith.truncf %445 : vector<8x32xf32> to vector<8x32xbf16>
    %cst_141 = arith.constant dense<0.000000e+00> : vector<8x8xf32>
    %447 = tpu.matmul %442, %444, %cst_141 {dimension_numbers = #tpu.dot_dimension_numbers<[1], [1], [0], [0], [0, 0, 1, 0], [], []>} : vector<8x32xbf16>, vector<8x32xbf16>, vector<8x8xf32> -> vector<8x8xf32>
    %cst_142 = arith.constant 0.176776692 : f32
    %448 = vector.broadcast %cst_142 : f32 to vector<8x8xf32>
    %449 = arith.mulf %447, %448 : vector<8x8xf32>
    %cst_143 = arith.constant -1.000000e+30 : f32
    %450 = vector.broadcast %cst_143 : f32 to vector<8x8xf32>
    %451 = arith.select %4, %449, %450 : vector<8x8xi1>, vector<8x8xf32>
    %cst_144 = arith.constant dense<0xFF800000> : vector<8xf32>
    %452 = vector.multi_reduction <maximumf>, %451, %cst_144 [1] : vector<8x8xf32> to vector<8xf32>
    %453 = vector.shape_cast %452 : vector<8xf32> to vector<8x1xf32>
    %454 = vector.broadcast %453 : vector<8x1xf32> to vector<8x8xf32>
    %455 = arith.subf %451, %454 : vector<8x8xf32>
    %456 = math.exp %455 : vector<8x8xf32>
    %cst_145 = arith.constant dense<0.000000e+00> : vector<8xf32>
    %457 = vector.multi_reduction <add>, %456, %cst_145 [1] : vector<8x8xf32> to vector<8xf32>
    %458 = vector.shape_cast %457 : vector<8xf32> to vector<8x1xf32>
    %459 = vector.broadcast %458 : vector<8x1xf32> to vector<8x8xf32>
    %460 = arith.divf %456, %459 : vector<8x8xf32>
    %461 = arith.truncf %460 : vector<8x8xf32> to vector<8x8xbf16>
    %cst_146 = arith.constant dense<0.000000e+00> : vector<8x32xf32>
    %462 = tpu.matmul %461, %446, %cst_146 {dimension_numbers = #tpu.dot_dimension_numbers<[1], [0], [0], [1], [0, 0, 1, 1], [], []>} : vector<8x8xbf16>, vector<8x32xbf16>, vector<8x32xf32> -> vector<8x32xf32>
    %463 = vector.extract_strided_slice %414 {offsets = [0, 64], sizes = [8, 32], strides = [1, 1]} : vector<8x128xf32> to vector<8x32xf32>
    %464 = arith.truncf %463 : vector<8x32xf32> to vector<8x32xbf16>
    %465 = vector.extract_strided_slice %416 {offsets = [0, 64], sizes = [8, 32], strides = [1, 1]} : vector<8x128xf32> to vector<8x32xf32>
    %466 = arith.truncf %465 : vector<8x32xf32> to vector<8x32xbf16>
    %467 = vector.extract_strided_slice %418 {offsets = [0, 64], sizes = [8, 32], strides = [1, 1]} : vector<8x128xf32> to vector<8x32xf32>
    %468 = arith.truncf %467 : vector<8x32xf32> to vector<8x32xbf16>
    %cst_147 = arith.constant dense<0.000000e+00> : vector<8x8xf32>
    %469 = tpu.matmul %464, %466, %cst_147 {dimension_numbers = #tpu.dot_dimension_numbers<[1], [1], [0], [0], [0, 0, 1, 0], [], []>} : vector<8x32xbf16>, vector<8x32xbf16>, vector<8x8xf32> -> vector<8x8xf32>
    %cst_148 = arith.constant 0.176776692 : f32
    %470 = vector.broadcast %cst_148 : f32 to vector<8x8xf32>
    %471 = arith.mulf %469, %470 : vector<8x8xf32>
    %cst_149 = arith.constant -1.000000e+30 : f32
    %472 = vector.broadcast %cst_149 : f32 to vector<8x8xf32>
    %473 = arith.select %4, %471, %472 : vector<8x8xi1>, vector<8x8xf32>
    %cst_150 = arith.constant dense<0xFF800000> : vector<8xf32>
    %474 = vector.multi_reduction <maximumf>, %473, %cst_150 [1] : vector<8x8xf32> to vector<8xf32>
    %475 = vector.shape_cast %474 : vector<8xf32> to vector<8x1xf32>
    %476 = vector.broadcast %475 : vector<8x1xf32> to vector<8x8xf32>
    %477 = arith.subf %473, %476 : vector<8x8xf32>
    %478 = math.exp %477 : vector<8x8xf32>
    %cst_151 = arith.constant dense<0.000000e+00> : vector<8xf32>
    %479 = vector.multi_reduction <add>, %478, %cst_151 [1] : vector<8x8xf32> to vector<8xf32>
    %480 = vector.shape_cast %479 : vector<8xf32> to vector<8x1xf32>
    %481 = vector.broadcast %480 : vector<8x1xf32> to vector<8x8xf32>
    %482 = arith.divf %478, %481 : vector<8x8xf32>
    %483 = arith.truncf %482 : vector<8x8xf32> to vector<8x8xbf16>
    %cst_152 = arith.constant dense<0.000000e+00> : vector<8x32xf32>
    %484 = tpu.matmul %483, %468, %cst_152 {dimension_numbers = #tpu.dot_dimension_numbers<[1], [0], [0], [1], [0, 0, 1, 1], [], []>} : vector<8x8xbf16>, vector<8x32xbf16>, vector<8x32xf32> -> vector<8x32xf32>
    %485 = vector.extract_strided_slice %414 {offsets = [0, 96], sizes = [8, 32], strides = [1, 1]} : vector<8x128xf32> to vector<8x32xf32>
    %486 = arith.truncf %485 : vector<8x32xf32> to vector<8x32xbf16>
    %487 = vector.extract_strided_slice %416 {offsets = [0, 96], sizes = [8, 32], strides = [1, 1]} : vector<8x128xf32> to vector<8x32xf32>
    %488 = arith.truncf %487 : vector<8x32xf32> to vector<8x32xbf16>
    %489 = vector.extract_strided_slice %418 {offsets = [0, 96], sizes = [8, 32], strides = [1, 1]} : vector<8x128xf32> to vector<8x32xf32>
    %490 = arith.truncf %489 : vector<8x32xf32> to vector<8x32xbf16>
    %cst_153 = arith.constant dense<0.000000e+00> : vector<8x8xf32>
    %491 = tpu.matmul %486, %488, %cst_153 {dimension_numbers = #tpu.dot_dimension_numbers<[1], [1], [0], [0], [0, 0, 1, 0], [], []>} : vector<8x32xbf16>, vector<8x32xbf16>, vector<8x8xf32> -> vector<8x8xf32>
    %cst_154 = arith.constant 0.176776692 : f32
    %492 = vector.broadcast %cst_154 : f32 to vector<8x8xf32>
    %493 = arith.mulf %491, %492 : vector<8x8xf32>
    %cst_155 = arith.constant -1.000000e+30 : f32
    %494 = vector.broadcast %cst_155 : f32 to vector<8x8xf32>
    %495 = arith.select %4, %493, %494 : vector<8x8xi1>, vector<8x8xf32>
    %cst_156 = arith.constant dense<0xFF800000> : vector<8xf32>
    %496 = vector.multi_reduction <maximumf>, %495, %cst_156 [1] : vector<8x8xf32> to vector<8xf32>
    %497 = vector.shape_cast %496 : vector<8xf32> to vector<8x1xf32>
    %498 = vector.broadcast %497 : vector<8x1xf32> to vector<8x8xf32>
    %499 = arith.subf %495, %498 : vector<8x8xf32>
    %500 = math.exp %499 : vector<8x8xf32>
    %cst_157 = arith.constant dense<0.000000e+00> : vector<8xf32>
    %501 = vector.multi_reduction <add>, %500, %cst_157 [1] : vector<8x8xf32> to vector<8xf32>
    %502 = vector.shape_cast %501 : vector<8xf32> to vector<8x1xf32>
    %503 = vector.broadcast %502 : vector<8x1xf32> to vector<8x8xf32>
    %504 = arith.divf %500, %503 : vector<8x8xf32>
    %505 = arith.truncf %504 : vector<8x8xf32> to vector<8x8xbf16>
    %cst_158 = arith.constant dense<0.000000e+00> : vector<8x32xf32>
    %506 = tpu.matmul %505, %490, %cst_158 {dimension_numbers = #tpu.dot_dimension_numbers<[1], [0], [0], [1], [0, 0, 1, 1], [], []>} : vector<8x8xbf16>, vector<8x32xbf16>, vector<8x32xf32> -> vector<8x32xf32>
    %507 = tpu.concatenate %440, %462, %484, %506 in 1 : vector<8x32xf32>, vector<8x32xf32>, vector<8x32xf32>, vector<8x32xf32> -> vector<8x128xf32>
    %508 = tpu.concatenate %412, %507 in 0 : vector<8x128xf32>, vector<8x128xf32> -> vector<16x128xf32>
    %509 = arith.truncf %508 : vector<16x128xf32> to vector<16x128xbf16>
    %c1_159 = arith.constant 1 : index
    %c0_160 = arith.constant 0 : index
    %c0_161 = arith.constant 0 : index
    %510 = vector.load %arg5[%c1_159, %c0_160, %c0_161] : memref<2x128x128xbf16, #tpu.memory_space<vmem>>, vector<1x128x128xbf16>
    %511 = vector.shape_cast %510 : vector<1x128x128xbf16> to vector<128x128xbf16>
    %cst_162 = arith.constant dense<0.000000e+00> : vector<16x128xf32>
    %512 = tpu.matmul %509, %511, %cst_162 {dimension_numbers = #tpu.dot_dimension_numbers<[1], [0], [0], [1], [0, 0, 1, 1], [], []>} : vector<16x128xbf16>, vector<128x128xbf16>, vector<16x128xf32> -> vector<16x128xf32>
    %c1_163 = arith.constant 1 : index
    %c0_164 = arith.constant 0 : index
    %c0_165 = arith.constant 0 : index
    %513 = vector.load %arg6[%c1_163, %c0_164, %c0_165] : memref<2x1x128xf32, #tpu.memory_space<vmem>>, vector<1x1x128xf32>
    %514 = vector.shape_cast %513 : vector<1x1x128xf32> to vector<1x128xf32>
    %515 = vector.broadcast %514 : vector<1x128xf32> to vector<16x128xf32>
    %516 = arith.addf %512, %515 : vector<16x128xf32>
    %517 = arith.addf %284, %516 : vector<16x128xf32>
    %c1_166 = arith.constant 1 : index
    %c0_167 = arith.constant 0 : index
    %c0_168 = arith.constant 0 : index
    %518 = vector.load %arg7[%c1_166, %c0_167, %c0_168] : memref<2x1x128xf32, #tpu.memory_space<vmem>>, vector<1x1x128xf32>
    %519 = vector.shape_cast %518 : vector<1x1x128xf32> to vector<1x128xf32>
    %c1_169 = arith.constant 1 : index
    %c0_170 = arith.constant 0 : index
    %c0_171 = arith.constant 0 : index
    %520 = vector.load %arg8[%c1_169, %c0_170, %c0_171] : memref<2x1x128xf32, #tpu.memory_space<vmem>>, vector<1x1x128xf32>
    %521 = vector.shape_cast %520 : vector<1x1x128xf32> to vector<1x128xf32>
    %cst_172 = arith.constant dense<0.000000e+00> : vector<16xf32>
    %522 = vector.multi_reduction <add>, %517, %cst_172 [1] : vector<16x128xf32> to vector<16xf32>
    %523 = vector.shape_cast %522 : vector<16xf32> to vector<16x1xf32>
    %cst_173 = arith.constant 1.280000e+02 : f32
    %524 = vector.broadcast %cst_173 : f32 to vector<16x1xf32>
    %525 = arith.divf %523, %524 : vector<16x1xf32>
    %526 = vector.broadcast %525 : vector<16x1xf32> to vector<16x128xf32>
    %527 = arith.subf %517, %526 : vector<16x128xf32>
    %528 = vector.broadcast %525 : vector<16x1xf32> to vector<16x128xf32>
    %529 = arith.subf %517, %528 : vector<16x128xf32>
    %530 = arith.mulf %527, %529 : vector<16x128xf32>
    %cst_174 = arith.constant dense<0.000000e+00> : vector<16xf32>
    %531 = vector.multi_reduction <add>, %530, %cst_174 [1] : vector<16x128xf32> to vector<16xf32>
    %532 = vector.shape_cast %531 : vector<16xf32> to vector<16x1xf32>
    %cst_175 = arith.constant 1.280000e+02 : f32
    %533 = vector.broadcast %cst_175 : f32 to vector<16x1xf32>
    %534 = arith.divf %532, %533 : vector<16x1xf32>
    %535 = vector.broadcast %525 : vector<16x1xf32> to vector<16x128xf32>
    %536 = arith.subf %517, %535 : vector<16x128xf32>
    %cst_176 = arith.constant 9.99999974E-6 : f32
    %537 = vector.broadcast %cst_176 : f32 to vector<16x1xf32>
    %538 = arith.addf %534, %537 : vector<16x1xf32>
    %539 = math.rsqrt %538 : vector<16x1xf32>
    %540 = vector.broadcast %539 : vector<16x1xf32> to vector<16x128xf32>
    %541 = arith.mulf %536, %540 : vector<16x128xf32>
    %542 = vector.broadcast %519 : vector<1x128xf32> to vector<16x128xf32>
    %543 = arith.mulf %541, %542 : vector<16x128xf32>
    %544 = vector.broadcast %521 : vector<1x128xf32> to vector<16x128xf32>
    %545 = arith.addf %543, %544 : vector<16x128xf32>
    %546 = arith.truncf %545 : vector<16x128xf32> to vector<16x128xbf16>
    %c1_177 = arith.constant 1 : index
    %c0_178 = arith.constant 0 : index
    %c0_179 = arith.constant 0 : index
    %547 = vector.load %arg9[%c1_177, %c0_178, %c0_179] : memref<2x128x512xbf16, #tpu.memory_space<vmem>>, vector<1x128x512xbf16>
    %548 = vector.shape_cast %547 : vector<1x128x512xbf16> to vector<128x512xbf16>
    %cst_180 = arith.constant dense<0.000000e+00> : vector<16x512xf32>
    %549 = tpu.matmul %546, %548, %cst_180 {dimension_numbers = #tpu.dot_dimension_numbers<[1], [0], [0], [1], [0, 0, 1, 1], [], []>} : vector<16x128xbf16>, vector<128x512xbf16>, vector<16x512xf32> -> vector<16x512xf32>
    %c1_181 = arith.constant 1 : index
    %c0_182 = arith.constant 0 : index
    %c0_183 = arith.constant 0 : index
    %550 = vector.load %arg10[%c1_181, %c0_182, %c0_183] : memref<2x1x512xf32, #tpu.memory_space<vmem>>, vector<1x1x512xf32>
    %551 = vector.shape_cast %550 : vector<1x1x512xf32> to vector<1x512xf32>
    %552 = vector.broadcast %551 : vector<1x512xf32> to vector<16x512xf32>
    %553 = arith.addf %549, %552 : vector<16x512xf32>
    %cst_184 = arith.constant 0.000000e+00 : f32
    %554 = vector.broadcast %cst_184 : f32 to vector<16x512xf32>
    %555 = arith.maximumf %553, %554 : vector<16x512xf32>
    %556 = arith.truncf %555 : vector<16x512xf32> to vector<16x512xbf16>
    %c1_185 = arith.constant 1 : index
    %c0_186 = arith.constant 0 : index
    %c0_187 = arith.constant 0 : index
    %557 = vector.load %arg11[%c1_185, %c0_186, %c0_187] : memref<2x512x128xbf16, #tpu.memory_space<vmem>>, vector<1x512x128xbf16>
    %558 = vector.shape_cast %557 : vector<1x512x128xbf16> to vector<512x128xbf16>
    %cst_188 = arith.constant dense<0.000000e+00> : vector<16x128xf32>
    %559 = tpu.matmul %556, %558, %cst_188 {dimension_numbers = #tpu.dot_dimension_numbers<[1], [0], [0], [1], [0, 0, 1, 1], [], []>} : vector<16x512xbf16>, vector<512x128xbf16>, vector<16x128xf32> -> vector<16x128xf32>
    %c1_189 = arith.constant 1 : index
    %c0_190 = arith.constant 0 : index
    %c0_191 = arith.constant 0 : index
    %560 = vector.load %arg12[%c1_189, %c0_190, %c0_191] : memref<2x1x128xf32, #tpu.memory_space<vmem>>, vector<1x1x128xf32>
    %561 = vector.shape_cast %560 : vector<1x1x128xf32> to vector<1x128xf32>
    %562 = vector.broadcast %561 : vector<1x128xf32> to vector<16x128xf32>
    %563 = arith.addf %559, %562 : vector<16x128xf32>
    %564 = arith.addf %517, %563 : vector<16x128xf32>
    %c0_192 = arith.constant 0 : index
    %c0_193 = arith.constant 0 : index
    %565 = vector.load %arg13[%c0_192, %c0_193] : memref<1x128xf32, #tpu.memory_space<vmem>>, vector<1x128xf32>
    %c0_194 = arith.constant 0 : index
    %c0_195 = arith.constant 0 : index
    %566 = vector.load %arg14[%c0_194, %c0_195] : memref<1x128xf32, #tpu.memory_space<vmem>>, vector<1x128xf32>
    %cst_196 = arith.constant dense<0.000000e+00> : vector<16xf32>
    %567 = vector.multi_reduction <add>, %564, %cst_196 [1] : vector<16x128xf32> to vector<16xf32>
    %568 = vector.shape_cast %567 : vector<16xf32> to vector<16x1xf32>
    %cst_197 = arith.constant 1.280000e+02 : f32
    %569 = vector.broadcast %cst_197 : f32 to vector<16x1xf32>
    %570 = arith.divf %568, %569 : vector<16x1xf32>
    %571 = vector.broadcast %570 : vector<16x1xf32> to vector<16x128xf32>
    %572 = arith.subf %564, %571 : vector<16x128xf32>
    %573 = vector.broadcast %570 : vector<16x1xf32> to vector<16x128xf32>
    %574 = arith.subf %564, %573 : vector<16x128xf32>
    %575 = arith.mulf %572, %574 : vector<16x128xf32>
    %cst_198 = arith.constant dense<0.000000e+00> : vector<16xf32>
    %576 = vector.multi_reduction <add>, %575, %cst_198 [1] : vector<16x128xf32> to vector<16xf32>
    %577 = vector.shape_cast %576 : vector<16xf32> to vector<16x1xf32>
    %cst_199 = arith.constant 1.280000e+02 : f32
    %578 = vector.broadcast %cst_199 : f32 to vector<16x1xf32>
    %579 = arith.divf %577, %578 : vector<16x1xf32>
    %580 = vector.broadcast %570 : vector<16x1xf32> to vector<16x128xf32>
    %581 = arith.subf %564, %580 : vector<16x128xf32>
    %cst_200 = arith.constant 9.99999974E-6 : f32
    %582 = vector.broadcast %cst_200 : f32 to vector<16x1xf32>
    %583 = arith.addf %579, %582 : vector<16x1xf32>
    %584 = math.rsqrt %583 : vector<16x1xf32>
    %585 = vector.broadcast %584 : vector<16x1xf32> to vector<16x128xf32>
    %586 = arith.mulf %581, %585 : vector<16x128xf32>
    %587 = vector.broadcast %565 : vector<1x128xf32> to vector<16x128xf32>
    %588 = arith.mulf %586, %587 : vector<16x128xf32>
    %589 = vector.broadcast %566 : vector<1x128xf32> to vector<16x128xf32>
    %590 = arith.addf %588, %589 : vector<16x128xf32>
    %591 = arith.truncf %590 : vector<16x128xf32> to vector<16x128xbf16>
    %c0_201 = arith.constant 0 : index
    %c0_202 = arith.constant 0 : index
    %592 = vector.load %arg15[%c0_201, %c0_202] : memref<128x256xbf16, #tpu.memory_space<vmem>>, vector<128x256xbf16>
    %cst_203 = arith.constant dense<0.000000e+00> : vector<16x256xf32>
    %593 = tpu.matmul %591, %592, %cst_203 {dimension_numbers = #tpu.dot_dimension_numbers<[1], [0], [0], [1], [0, 0, 1, 1], [], []>} : vector<16x128xbf16>, vector<128x256xbf16>, vector<16x256xf32> -> vector<16x256xf32>
    %c0_204 = arith.constant 0 : index
    %c0_205 = arith.constant 0 : index
    %594 = vector.load %arg16[%c0_204, %c0_205] : memref<1x256xf32, #tpu.memory_space<vmem>>, vector<1x256xf32>
    %595 = vector.broadcast %594 : vector<1x256xf32> to vector<16x256xf32>
    %596 = arith.addf %593, %595 : vector<16x256xf32>
    %597 = vector.shape_cast %596 : vector<16x256xf32> to vector<2x8x256xf32>
    %c0_206 = arith.constant 0 : index
    %c0_207 = arith.constant 0 : index
    %c0_208 = arith.constant 0 : index
    %598 = vector.load %arg17[%c0_206, %c0_207, %c0_208] : memref<2x8x256xf32, #tpu.memory_space<vmem>>, vector<2x8x256xf32>
    tpu.vector_store %arg17[%c0_206, %c0_207, %c0_208], %597 {strides = array<i32>} : memref<2x8x256xf32, #tpu.memory_space<vmem>>, vector<2x8x256xf32>,
    return
  }
  func.func @transform_0(%arg0: i32) -> (i32, i32, i32) {
    %c0_i32 = arith.constant 0 : i32
    %c0_i32_0 = arith.constant 0 : i32
    %c0_i32_1 = arith.constant 0 : i32
    %c0_i32_2 = arith.constant 0 : i32
    return %c0_i32, %c0_i32_0, %c0_i32_1 : i32, i32, i32
  }
  func.func @transform_1(%arg0: i32) -> (i32, i32, i32) {
    %c0_i32 = arith.constant 0 : i32
    %c0_i32_0 = arith.constant 0 : i32
    %c0_i32_1 = arith.constant 0 : i32
    %c0_i32_2 = arith.constant 0 : i32
    return %c0_i32, %c0_i32_0, %c0_i32_1 : i32, i32, i32
  }
  func.func @transform_2(%arg0: i32) -> (i32, i32, i32) {
    %c0_i32 = arith.constant 0 : i32
    %c0_i32_0 = arith.constant 0 : i32
    %c0_i32_1 = arith.constant 0 : i32
    %c0_i32_2 = arith.constant 0 : i32
    return %c0_i32, %c0_i32_0, %c0_i32_1 : i32, i32, i32
  }
  func.func @transform_3(%arg0: i32) -> (i32, i32, i32) {
    %c0_i32 = arith.constant 0 : i32
    %c0_i32_0 = arith.constant 0 : i32
    %c0_i32_1 = arith.constant 0 : i32
    %c0_i32_2 = arith.constant 0 : i32
    return %c0_i32, %c0_i32_0, %c0_i32_1 : i32, i32, i32
  }
  func.func @transform_4(%arg0: i32) -> (i32, i32, i32) {
    %c0_i32 = arith.constant 0 : i32
    %c0_i32_0 = arith.constant 0 : i32
    %c0_i32_1 = arith.constant 0 : i32
    %c0_i32_2 = arith.constant 0 : i32
    return %c0_i32, %c0_i32_0, %c0_i32_1 : i32, i32, i32
  }
  func.func @transform_5(%arg0: i32) -> (i32, i32, i32) {
    %c0_i32 = arith.constant 0 : i32
    %c0_i32_0 = arith.constant 0 : i32
    %c0_i32_1 = arith.constant 0 : i32
    %c0_i32_2 = arith.constant 0 : i32
    return %c0_i32, %c0_i32_0, %c0_i32_1 : i32, i32, i32
  }
  func.func @transform_6(%arg0: i32) -> (i32, i32, i32) {
    %c0_i32 = arith.constant 0 : i32
    %c0_i32_0 = arith.constant 0 : i32
    %c0_i32_1 = arith.constant 0 : i32
    %c0_i32_2 = arith.constant 0 : i32
    return %c0_i32, %c0_i32_0, %c0_i32_1 : i32, i32, i32
  }
  func.func @transform_7(%arg0: i32) -> (i32, i32, i32) {
    %c0_i32 = arith.constant 0 : i32
    %c0_i32_0 = arith.constant 0 : i32
    %c0_i32_1 = arith.constant 0 : i32
    %c0_i32_2 = arith.constant 0 : i32
    return %c0_i32, %c0_i32_0, %c0_i32_1 : i32, i32, i32
  }
  func.func @transform_8(%arg0: i32) -> (i32, i32, i32) {
    %c0_i32 = arith.constant 0 : i32
    %c0_i32_0 = arith.constant 0 : i32
    %c0_i32_1 = arith.constant 0 : i32
    %c0_i32_2 = arith.constant 0 : i32
    return %c0_i32, %c0_i32_0, %c0_i32_1 : i32, i32, i32
  }
  func.func @transform_9(%arg0: i32) -> (i32, i32, i32) {
    %c0_i32 = arith.constant 0 : i32
    %c0_i32_0 = arith.constant 0 : i32
    %c0_i32_1 = arith.constant 0 : i32
    %c0_i32_2 = arith.constant 0 : i32
    return %c0_i32, %c0_i32_0, %c0_i32_1 : i32, i32, i32
  }
  func.func @transform_10(%arg0: i32) -> (i32, i32, i32) {
    %c0_i32 = arith.constant 0 : i32
    %c0_i32_0 = arith.constant 0 : i32
    %c0_i32_1 = arith.constant 0 : i32
    %c0_i32_2 = arith.constant 0 : i32
    return %c0_i32, %c0_i32_0, %c0_i32_1 : i32, i32, i32
  }
  func.func @transform_11(%arg0: i32) -> (i32, i32, i32) {
    %c0_i32 = arith.constant 0 : i32
    %c0_i32_0 = arith.constant 0 : i32
    %c0_i32_1 = arith.constant 0 : i32
    %c0_i32_2 = arith.constant 0 : i32
    return %c0_i32, %c0_i32_0, %c0_i32_1 : i32, i32, i32
  }
  func.func @transform_12(%arg0: i32) -> (i32, i32) {
    %c0_i32 = arith.constant 0 : i32
    %c0_i32_0 = arith.constant 0 : i32
    %c0_i32_1 = arith.constant 0 : i32
    return %c0_i32, %c0_i32_0 : i32, i32
  }
  func.func @transform_13(%arg0: i32) -> (i32, i32) {
    %c0_i32 = arith.constant 0 : i32
    %c0_i32_0 = arith.constant 0 : i32
    %c0_i32_1 = arith.constant 0 : i32
    return %c0_i32, %c0_i32_0 : i32, i32
  }
  func.func @transform_14(%arg0: i32) -> (i32, i32) {
    %c0_i32 = arith.constant 0 : i32
    %c0_i32_0 = arith.constant 0 : i32
    %c0_i32_1 = arith.constant 0 : i32
    return %c0_i32, %c0_i32_0 : i32, i32
  }
  func.func @transform_15(%arg0: i32) -> (i32, i32) {
    %c0_i32 = arith.constant 0 : i32
    %c0_i32_0 = arith.constant 0 : i32
    %c0_i32_1 = arith.constant 0 : i32
    return %c0_i32, %c0_i32_0 : i32, i32
  }
  func.func @transform_16(%arg0: i32) -> (i32, i32, i32) {
    %c0_i32 = arith.constant 0 : i32
    %c0_i32_0 = arith.constant 0 : i32
    %c0_i32_1 = arith.constant 0 : i32
    %c0_i32_2 = arith.constant 0 : i32
    return %c0_i32, %c0_i32_0, %c0_i32_1 : i32, i32, i32
  }
}

</mosaic_0001>

<bundles_post_ra>
// kernel: event_metadata_lm_forward.1
= control target key start
LH: loop header
LB: loop body
LE: loop exit
PB: predicated region body
PF: predicated region fallthrough
CT: control target
= control target key end

     0   :  { %v5581_v3 = vmov 0.0   ;;  %v5582_v27 = vmov 0   ;;  %vm5583_vm0 = vmmov 0   ;;  %vm415_vm1 = vcmask 1043456   ;;  %s5584_s21 = smov 96   ;;  %s5585_s22 = smov 64   ;;  %s6883_s0 = inlined_call_operand.vmem [shape: f32[2,8,128], index: 0, kind: input, shape index: {}]   ;;  %s6884_s3 = inlined_call_operand.vmem [shape: bf16[2,128,384], index: 3, kind: input, shape index: {}]   ;;  %s6885_s1 = inlined_call_operand.vmem [shape: f32[2,1,128], index: 1, kind: input, shape index: {}]   ;;  %s6886_s2 = inlined_call_operand.vmem [shape: f32[2,1,128], index: 2, kind: input, shape index: {}]   ;;  %s6887_s4 = inlined_call_operand.vmem [shape: bf16[2,128,128], index: 4, kind: input, shape index: {}]   ;;  %s6888_s5 = inlined_call_operand.vmem [shape: f32[2,1,128], index: 5, kind: input, shape index: {}]   ;;  %s6889_s8 = inlined_call_operand.vmem [shape: bf16[2,128,512], index: 8, kind: input, shape index: {}]   ;;  %s6890_s10 = inlined_call_operand.vmem [shape: bf16[2,512,128], index: 10, kind: input, shape index: {}]   ;;  %s6891_s6 = inlined_call_operand.vmem [shape: f32[2,1,128], index: 6, kind: input, shape index: {}]   ;;  %s6892_s7 = inlined_call_operand.vmem [shape: f32[2,1,128], index: 7, kind: input, shape index: {}]   ;;  %s6893_s9 = inlined_call_operand.vmem [shape: f32[2,1,512], index: 9, kind: input, shape index: {}]   ;;  %s6894_s11 = inlined_call_operand.vmem [shape: f32[2,1,128], index: 11, kind: input, shape index: {}]   ;;  %s6895_s14 = inlined_call_operand.vmem [shape: bf16[128,256], index: 14, kind: input, shape index: {}]   ;;  %s6896_s12 = inlined_call_operand.vmem [shape: f32[1,128], index: 12, kind: input, shape index: {}]   ;;  %s6897_s13 = inlined_call_operand.vmem [shape: f32[1,128], index: 13, kind: input, shape index: {}]   ;;  %s6898_s15 = inlined_call_operand.vmem [shape: f32[1,256], index: 15, kind: input, shape index: {}]   ;;  %s6899_s16 = inlined_call_operand.vmem [shape: f32[2,8,256], index: 16, kind: output, shape index: {}]  }
   0x1   :  { %6901 = sst [smem:[#allocation2_spill]] %s6883_s0  ;;  %v5231_v2 = vld [vmem:[%s6884_s3 + $0xac] ss:$12 sps:$4 sm:$0xff]   ;;  %4923 = vmatprep.subr.bf16.mxu1 %v5581_v3  ;;  %v5233_v4 = vld [vmem:[%s6884_s3 + $0xa8] ss:$12 sps:$4 sm:$0xff]   ;;  %295 = vmatprep.mubr.bf16.mxu0 %v5582_v27  ;;  %vm350_vm2 = vcmask 261120  }
   0x2   :  { %s6902_s23 = sld [smem:[#allocation2_spill]]  ;;  %263 = vmatprep.subr.bf16.mxu0 %v5231_v2  ;;  %v5234_v5 = vld [vmem:[%s6884_s3 + $0xb0] ss:$12 sps:$4 sm:$0xff]   ;;  %v5235_v14 = vld [vmem:[%s6884_s3 + $0x94] ss:$12 sps:$4 sm:$0xff]   ;;  %4939 = vmatprep.mubr.msk.bf16.mxu1 %vm5583_vm0, %v5581_v3  ;;  %s5586_s24 = smov 32  }
   0x3   :  { %264 = vmatpush1.bf16.msra.mxu0 %v5233_v4  ;;  %4924 = vmatpush3.bf16.msra.mxu1 %v5234_v5  ;;  %v5237_v15 = vld [vmem:[%s6884_s3 + $0x90] ss:$12 sps:$4 sm:$0xff]   ;;  %v5238_v16 = vld [vmem:[%s6884_s3 + $0x98] ss:$12 sps:$4 sm:$0xff]   ;;  %v5242_v19 = vld [vmem:[%s6884_s3 + $0x80] ss:$12 sps:$4 sm:$0xff]  }
   0x4   :  { %4925 = vmatprep.subr.bf16.mxu1 %v5581_v3  ;;  %265 = vmatprep.subr.bf16.mxu0 %v5235_v14  ;;  %v5239_v17 = vld [vmem:[%s6884_s3 + $0x7c] ss:$12 sps:$4 sm:$0xff]   ;;  %v5241_v18 = vld [vmem:[%s6884_s3 + $0x78] ss:$12 sps:$4 sm:$0xff]   ;;  %v5245_v21 = vld [vmem:[%s6884_s3 + $0x60] ss:$12 sps:$4 sm:$0xff]  }
   0x5   :  { %v5243_v20 = vld [vmem:[%s6884_s3 + $0x64] ss:$12 sps:$4 sm:$0xff]   ;;  %v5246_v22 = vld [vmem:[%s6884_s3 + $0x68] ss:$12 sps:$4 sm:$0xff]   ;;  %v5247_v23 = vld [vmem:[%s6884_s3 + $0x4c] ss:$12 sps:$4 sm:$0xff]  }
   0x6   :  { %v5249_v24 = vld [vmem:[%s6884_s3 + $0x48] ss:$12 sps:$4 sm:$0xff]   ;;  %v5250_v25 = vld [vmem:[%s6884_s3 + $0x50] ss:$12 sps:$4 sm:$0xff]   ;;  %v5254_v29 = vld [vmem:[%s6884_s3 + $0x38] ss:$12 sps:$4 sm:$0xff]  }
   0x7   :  { %266 = vmatpush1.bf16.msra.mxu0 %v5237_v15  ;;  %4926 = vmatpush3.bf16.msra.mxu1 %v5238_v16  ;;  %v5251_v26 = vld [vmem:[%s6884_s3 + $0x34] ss:$12 sps:$4 sm:$0xff]   ;;  %v5253_v28 = vld [vmem:[%s6884_s3 + $0x30] ss:$12 sps:$4 sm:$0xff]   ;;  %v5257_v31 = vld [vmem:[%s6884_s3 + $0x18] ss:$12 sps:$4 sm:$0xff]  }
   0x8   :  { %v54_v0 = vld [vmem:[%s6902_s23] sm:$0xff]  ;;  %v55_v1 = vld [vmem:[%s6902_s23 + $0x8] sm:$0xff]  ;;  %4927 = vmatprep.subr.bf16.mxu1 %v5581_v3  ;;  %267 = vmatprep.subr.bf16.mxu0 %v5239_v17  ;;  %vm399_vm4 = vcmask 64512   ;;  %vm811_vm5 = vcmask 523264   ;;  %vm813_vm6 = vcmask 785408  }
   0x9   :  { %63 = vadd.xlane.f32.xlu0 %v54_v0  ;;  %v5255_v30 = vld [vmem:[%s6884_s3 + $0x1c] ss:$12 sps:$4 sm:$0xff]   ;;  %v5258_v32 = vld [vmem:[%s6884_s3 + $0x20] ss:$12 sps:$4 sm:$0xff]   ;;  %v5259_v33 = vld [vmem:[%s6884_s3 + $0x4] ss:$12 sps:$4 sm:$0xff]  }
   0xa   :  { %v5261_v34 = vld [vmem:[%s6884_s3] ss:$12 sps:$4 sm:$0xff]   ;;  %v5262_v35 = vld [vmem:[%s6884_s3 + $0x8] ss:$12 sps:$4 sm:$0xff]  }
   0xb   :  { %268 = vmatpush1.bf16.msra.mxu0 %v5241_v18  ;;  %4928 = vmatpush3.bf16.msra.mxu1 %v5242_v19  ;;  %v4330_v44 = vld [vmem:[%s6885_s1] ss:$0 sm:$0xff] }
   0xc   :  { %4929 = vmatprep.subr.bf16.mxu1 %v5581_v3  ;;  %269 = vmatprep.subr.bf16.mxu0 %v5243_v20  ;;  %v4331_v48 = vld [vmem:[%s6886_s2] ss:$0 sm:$0xff] }
   0xd   :  { %65 = vadd.xlane.f32.xlu0 %v55_v1 }
   0xf   :  { %270 = vmatpush1.bf16.msra.mxu0 %v5245_v21  ;;  %4930 = vmatpush3.bf16.msra.mxu1 %v5246_v22 }
  0x10   :  { %271 = vmatprep.subr.bf16.mxu0 %v5247_v23  ;;  %4931 = vmatprep.subr.bf16.mxu1 %v5581_v3 }
  0x13   :  { %272 = vmatpush1.bf16.msra.mxu0 %v5249_v24  ;;  %4932 = vmatpush3.bf16.msra.mxu1 %v5250_v25  ;;  %v56_v24 = vlaneseq }
  0x14   :  { %273 = vmatprep.subr.bf16.mxu0 %v5251_v26  ;;  %4933 = vmatprep.subr.bf16.mxu1 %v5581_v3 }
  0x15   :  { %v5842_v25 = vshrl.u32 %v56_v24, 7  ;;  %v59_v26 = vand.u32 127, %v56_v24 }
  0x17   :  { %274 = vmatpush1.bf16.msra.mxu0 %v5253_v28  ;;  %4934 = vmatpush3.bf16.msra.mxu1 %v5254_v29  ;;  %vm5845_vm3 = vcmp.le.s32.totalorder %v59_v26, %v5842_v25 }
  0x18   :  { %275 = vmatprep.subr.bf16.mxu0 %v5255_v30  ;;  %4935 = vmatprep.subr.bf16.mxu1 %v5581_v3 }
  0x1b   :  { %276 = vmatpush1.bf16.msra.mxu0 %v5257_v31  ;;  %4936 = vmatpush3.bf16.msra.mxu1 %v5258_v32 }
  0x1c   :  { %277 = vmatprep.subr.bf16.mxu0 %v5259_v33  ;;  %4937 = vmatprep.subr.bf16.mxu1 %v5581_v3 }
  0x1f   :  { %278 = vmatpush1.bf16.msra.mxu0 %v5261_v34  ;;  %4938 = vmatpush3.bf16.msra.mxu1 %v5262_v35 }
  0x20   :  { %4949 = vmatprep.subr.bf16.mxu1 %v5581_v3  ;;  %4943 = vmatprep.subr.bf16.mxu0 %v5581_v3 }
  0x92   :  { %v64_v6 = vpop.xlane.xlu0 %63 }
  0x93   :  { %v68_v7 = vmul.f32 0.0078125, %v64_v6 }
  0x95   :  { %v5689_v8 = vsub.f32 %v54_v0, %v68_v7 }
  0x96   :  { %v66_v9 = vpop.xlane.xlu0 %65 }
  0x97   :  { %v69_v10 = vmul.f32 0.0078125, %v66_v9  ;;  %v72_v11 = vmul.f32 %v5689_v8, %v5689_v8 }
  0x99   :  { %v5693_v12 = vsub.f32 %v55_v1, %v69_v10  ;;  %74 = vadd.xlane.f32.xlu1 %v72_v11 }
  0x9b   :  { %v73_v13 = vmul.f32 %v5693_v12, %v5693_v12 }
  0x9d   :  { %76 = vadd.xlane.f32.xlu1 %v73_v13 }
 0x122   :  { %v75_v36 = vpop.xlane.xlu1 %74 }
 0x123   :  { %v78_v37 = vmul.f32 0.0078125, %v75_v36 }
 0x125   :  { %v80_v38 = vadd.f32 1e-05, %v78_v37 }
 0x126   :  { %v77_v39 = vpop.xlane.xlu1 %76 }
 0x127   :  { %5495 = vrsqrt.f32 %v80_v38  ;;  %v79_v40 = vmul.f32 0.0078125, %v77_v39 }
 0x129   :  { %v81_v41 = vadd.f32 1e-05, %v79_v40 }
 0x12b   :  { %5497 = vrsqrt.f32 %v81_v41 }
 0x134   :  { %v5496_v42 = vpop.eup %5495 }
 0x135   :  { %v84_v43 = vmul.f32 %v5496_v42, %v5689_v8 }
 0x137   :  { %v92_v47 = vmul.f32 %v4330_v44, %v84_v43 }
 0x138   :  { %v5498_v45 = vpop.eup %5497 }
 0x139   :  { %v85_v46 = vmul.f32 %v5498_v45, %v5693_v12  ;;  %v100_v50 = vadd.f32 %v4331_v48, %v92_v47 }
 0x13b   :  { %v93_v49 = vmul.f32 %v4330_v44, %v85_v46 }
 0x13d   :  { %v101_v51 = vadd.f32 %v4331_v48, %v93_v49 }
 0x13f   :  { %v102_v52 = vpack.c.bf16 %v101_v51, %v100_v50 }
 0x141   :  { %296 = vmatmul.mubr.bf16.vlgmr.msra.gmra.mxu0 %v102_v52  ;;  %4940 = vmatmul.mubr.bf16.vlgmr.msra.gmra.mxu1 %v102_v52 }
 0x142   :  { %4945 = vmatprep.mubr.msk.bf16.mxu0 %vm5583_vm0, %v5581_v3  ;;  %4951 = vmatprep.mubr.msk.bf16.mxu1 %vm5583_vm0, %v5581_v3 }
 0x201   :  { %v297_v53 = vpop.f32.mrf.mxu0  ;;  %v340_v54 = vpop.f32.mrf.mxu1 }
 0x202   :  { %v347_v55 = vpack.c.bf16 %v297_v53, %v297_v53  ;;  %v5783_v56 = vpack.c.bf16 %v340_v54, %v340_v54 }
 0x203   :  { %v299_v57 = vpop.f32.mrf.mxu0  ;;  %v4941_v58 = vpop.f32.mrf.mxu1 }
 0x204   :  { %v348_v59 = vpack.c.bf16 %v299_v57, %v299_v57  ;;  %460 = vrot.lane.b32.xlu1 %v347_v55, %s5584_s21  ;;  %v417_v60 = vsel %vm415_vm1, %v5783_v56, 0 }
 0x205   :  { %v301_v61 = vpop.f32.mrf.mxu0  ;;  %v5788_v62 = vpop.f32.mrf.mxu1  ;;  %4950 = vmatpush3.bf16.msra.mxu1 %v417_v60 }
 0x206   :  { %463 = vrot.lane.b32.xlu0 %v348_v59, %s5584_s21  ;;  %v355_v63 = vsel %vm350_vm2, %v348_v59, 0  ;;  %4961 = vmatprep.subr.bf16.mxu1 %v5581_v3  ;;  %v815_v4 = vpack.c.bf16 %v301_v61, %v301_v61 }
 0x207   :  { %v4942_v0 = vpop.f32.mrf.mxu1  ;;  %4944 = vmatpush3.bf16.xpose.msra.mxu0 %v355_v63  ;;  %v303_v1 = vpop.f32.mrf.mxu0 }
 0x208   :  { %576 = vrot.lane.b32.xlu1 %v348_v59, %s5585_s22  ;;  %4955 = vmatprep.subr.bf16.mxu0 %v5581_v3  ;;  %v816_v2 = vpack.c.bf16 %v303_v1, %v303_v1 }
 0x20a   :  { %688 = vrot.lane.b32.xlu0 %v348_v59, %s5586_s24  ;;  %v822_v14 = vsel %vm350_vm2, %v816_v2, 0 }
 0x20c   :  { %574 = vrot.lane.b32.xlu1 %v347_v55, %s5585_s22 }
 0x20e   :  { %4946 = vmatmul.mubr.msk.bf16.vlgmr.msra.gmra.mxu0 %vm350_vm2, %v347_v55  ;;  %928 = vrot.lane.b32.xlu0 %v816_v2, %s5584_s21 }
 0x20f   :  { %4957 = vmatprep.mubr.msk.bf16.mxu0 %vm5583_vm0, %v5581_v3 }
 0x210   :  { %686 = vrot.lane.b32.xlu1 %v347_v55, %s5586_s24 }
 0x212   :  { %1041 = vrot.lane.b32.xlu0 %v816_v2, %s5585_s22 }
 0x214   :  { %925 = vrot.lane.b32.xlu1 %v815_v4, %s5584_s21 }
 0x216   :  { %1153 = vrot.lane.b32.xlu0 %v816_v2, %s5586_s24 }
 0x218   :  { %1039 = vrot.lane.b32.xlu1 %v815_v4, %s5585_s22 }
 0x21c   :  { %1151 = vrot.lane.b32.xlu1 %v815_v4, %s5586_s24 }
 0x276   :  { %v461_v5 = vpop.permute.xlu1 %460 }
 0x278   :  { %v464_v6 = vpop.permute.xlu0 %463 }
 0x279   :  { %v469_v7 = vsel %vm350_vm2, %v464_v6, 0 }
 0x27a   :  { %4956 = vmatpush3.bf16.xpose.msra.mxu0 %v469_v7  ;;  %v577_v8 = vpop.permute.xlu1 %576 }
 0x27b   :  { %4967 = vmatprep.subr.bf16.mxu0 %v5581_v3  ;;  %v582_v9 = vsel %vm350_vm2, %v577_v8, 0 }
 0x27c   :  { %v689_v10 = vpop.permute.xlu0 %688 }
 0x27d   :  { %v694_v12 = vsel %vm350_vm2, %v689_v10, 0 }
 0x27e   :  { %v575_v11 = vpop.permute.xlu1 %574 }
 0x280   :  { %v929_v15 = vpop.permute.xlu0 %928 }
 0x281   :  { %4958 = vmatmul.mubr.msk.bf16.vlgmr.msra.gmra.mxu0 %vm350_vm2, %v461_v5  ;;  %v934_v16 = vsel %vm350_vm2, %v929_v15, 0 }
 0x282   :  { %4968 = vmatpush3.bf16.xpose.msra.mxu0 %v582_v9  ;;  %4969 = vmatprep.mubr.msk.bf16.mxu0 %vm5583_vm0, %v5581_v3  ;;  %v687_v13 = vpop.permute.xlu1 %686 }
 0x283   :  { %4979 = vmatprep.subr.bf16.mxu0 %v5581_v3 }
 0x284   :  { %v1042_v17 = vpop.permute.xlu0 %1041 }
 0x285   :  { %v1047_v19 = vsel %vm350_vm2, %v1042_v17, 0 }
 0x286   :  { %v926_v18 = vpop.permute.xlu1 %925 }
 0x288   :  { %v1154_v20 = vpop.permute.xlu0 %1153 }
 0x289   :  { %4970 = vmatmul.mubr.msk.bf16.vlgmr.msra.gmra.mxu0 %vm350_vm2, %v575_v11  ;;  %v1159_v22 = vsel %vm350_vm2, %v1154_v20, 0 }
 0x28a   :  { %4980 = vmatpush3.bf16.xpose.msra.mxu0 %v694_v12  ;;  %4981 = vmatprep.mubr.msk.bf16.mxu0 %vm5583_vm0, %v5581_v3  ;;  %v1040_v21 = vpop.permute.xlu1 %1039 }
 0x28b   :  { %4991 = vmatprep.subr.bf16.mxu0 %v5581_v3 }
 0x28e   :  { %v1152_v23 = vpop.permute.xlu1 %1151 }
 0x291   :  { %4982 = vmatmul.mubr.msk.bf16.vlgmr.msra.gmra.mxu0 %vm350_vm2, %v687_v13 }
 0x292   :  { %4992 = vmatpush3.bf16.xpose.msra.mxu0 %v822_v14  ;;  %4993 = vmatprep.mubr.msk.bf16.mxu0 %vm5583_vm0, %v5581_v3 }
 0x293   :  { %5003 = vmatprep.subr.bf16.mxu0 %v5581_v3 }
 0x299   :  { %4994 = vmatmul.mubr.msk.bf16.vlgmr.msra.gmra.mxu0 %vm350_vm2, %v815_v4 }
 0x29a   :  { %5004 = vmatpush3.bf16.xpose.msra.mxu0 %v934_v16  ;;  %5005 = vmatprep.mubr.msk.bf16.mxu0 %vm5583_vm0, %v5581_v3 }
 0x29b   :  { %5015 = vmatprep.subr.bf16.mxu0 %v5581_v3 }
 0x2a1   :  { %5006 = vmatmul.mubr.msk.bf16.vlgmr.msra.gmra.mxu0 %vm350_vm2, %v926_v18 }
 0x2a2   :  { %5016 = vmatpush3.bf16.xpose.msra.mxu0 %v1047_v19  ;;  %5017 = vmatprep.mubr.msk.bf16.mxu0 %vm5583_vm0, %v5581_v3 }
 0x2a3   :  { %5027 = vmatprep.subr.bf16.mxu0 %v5581_v3 }
 0x2a9   :  { %5018 = vmatmul.mubr.msk.bf16.vlgmr.msra.gmra.mxu0 %vm350_vm2, %v1040_v21 }
 0x2aa   :  { %5028 = vmatpush3.bf16.xpose.msra.mxu0 %v1159_v22  ;;  %5029 = vmatprep.mubr.msk.bf16.mxu0 %vm5583_vm0, %v5581_v3 }
 0x2ab   :  { %5039 = vmatprep.subr.bf16.mxu0 %v5581_v3 }
 0x2b1   :  { %5030 = vmatmul.mubr.msk.bf16.vlgmr.msra.gmra.mxu0 %vm350_vm2, %v1152_v23 }
 0x2b2   :  { %5055 = vmatprep.mubr.msk.bf16.mxu0 %vm5583_vm0, %v5581_v3 }
 0x2ce   :  { %v391_v28 = vpop.f32.mrf.mxu0 }
 0x2cf   :  { %v397_v30 = vmul.f32 0.17677669, %v391_v28 }
 0x2d0   :  { %v4947_v31 = vpop.f32.mrf.mxu0 }
 0x2d1   :  { %v398_v32 = vsel %vm5845_vm3, %v397_v30, -1e+30 }
 0x2d2   :  { %v394_v33 = vpop.f32.mrf.mxu0  ;;  %v400_v34 = vsel %vm399_vm4, %v398_v32, -inf }
 0x2d3   :  { %401 = vmax.xlane.f32.xlu0 %v400_v34 }
 0x2d4   :  { %v4948_v35 = vpop.f32.mrf.mxu0 }
 0x341   :  { %v505_v36 = vpop.f32.mrf.mxu0 }
 0x342   :  { %v511_v37 = vmul.f32 0.17677669, %v505_v36 }
 0x343   :  { %v4959_v38 = vpop.f32.mrf.mxu0 }
 0x344   :  { %v5854_v39 = vsel %vm5845_vm3, %v511_v37, -1e+30 }
 0x345   :  { %v508_v40 = vpop.f32.mrf.mxu0  ;;  %v513_v41 = vsel %vm399_vm4, %v5854_v39, -inf }
 0x346   :  { %514 = vmax.xlane.f32.xlu1 %v513_v41 }
 0x347   :  { %v4960_v42 = vpop.f32.mrf.mxu0 }
 0x349   :  { %v618_v43 = vpop.f32.mrf.mxu0 }
 0x34a   :  { %v624_v44 = vmul.f32 0.17677669, %v618_v43 }
 0x34b   :  { %v4971_v45 = vpop.f32.mrf.mxu0 }
 0x34c   :  { %v625_v46 = vsel %vm5845_vm3, %v624_v44, -1e+30 }
 0x34d   :  { %v621_v47 = vpop.f32.mrf.mxu0  ;;  %v626_v48 = vsel %vm399_vm4, %v625_v46, -inf }
 0x34e   :  { %627 = vmax.xlane.f32.xlu0 %v626_v48 }
 0x34f   :  { %v4972_v49 = vpop.f32.mrf.mxu0 }
 0x351   :  { %v730_v50 = vpop.f32.mrf.mxu0 }
 0x352   :  { %v736_v51 = vmul.f32 0.17677669, %v730_v50 }
 0x353   :  { %v4983_v52 = vpop.f32.mrf.mxu0 }
 0x354   :  { %v737_v53 = vsel %vm5845_vm3, %v736_v51, -1e+30 }
 0x355   :  { %v733_v54 = vpop.f32.mrf.mxu0  ;;  %v738_v55 = vsel %vm399_vm4, %v737_v53, -inf }
 0x356   :  { %739 = vmax.xlane.f32.xlu0 %v738_v55  ;;  %v5903_v54 = vpack.c.bf16 %v5788_v62, %v5788_v62 }
 0x357   :  { %v4984_v57 = vpop.f32.mrf.mxu0 }
 0x359   :  { %v858_v58 = vpop.f32.mrf.mxu0 }
 0x35a   :  { %v864_v59 = vmul.f32 0.17677669, %v858_v58 }
 0x35b   :  { %v4995_v60 = vpop.f32.mrf.mxu0 }
 0x35c   :  { %v402_v61 = vpop.xlane.xlu0 %401  ;;  %v865_v63 = vsel %vm5845_vm3, %v864_v59, -1e+30 }
 0x35d   :  { %v403_v0 = vsub.f32 %v398_v32, %v402_v61  ;;  %v861_v1 = vpop.f32.mrf.mxu0  ;;  %v866_v2 = vsel %vm399_vm4, %v865_v63, -inf }
 0x35e   :  { %867 = vmax.xlane.f32.xlu0 %v866_v2 }
 0x35f   :  { %v404_v4 = vmul.f32 1.442695, %v403_v0  ;;  %v4996_v5 = vpop.f32.mrf.mxu0 }
 0x361   :  { %5499 = vpow2.f32 %v404_v4  ;;  %v970_v6 = vpop.f32.mrf.mxu0 }
 0x362   :  { %v976_v7 = vmul.f32 0.17677669, %v970_v6 }
 0x363   :  { %v5007_v8 = vpop.f32.mrf.mxu0 }
 0x364   :  { %v5869_v9 = vsel %vm5845_vm3, %v976_v7, -1e+30 }
 0x365   :  { %v973_v10 = vpop.f32.mrf.mxu0  ;;  %v978_v11 = vsel %vm399_vm4, %v5869_v9, -inf }
 0x366   :  { %979 = vmax.xlane.f32.xlu1 %v978_v11 }
 0x367   :  { %v5008_v12 = vpop.f32.mrf.mxu0 }
 0x369   :  { %v1083_v13 = vpop.f32.mrf.mxu0 }
 0x36a   :  { %v1089_v14 = vmul.f32 0.17677669, %v1083_v13 }
 0x36b   :  { %v5019_v15 = vpop.f32.mrf.mxu0 }
 0x36c   :  { %v5875_v16 = vsel %vm5845_vm3, %v1089_v14, -1e+30 }
 0x36d   :  { %v1086_v17 = vpop.f32.mrf.mxu0  ;;  %v1091_v18 = vsel %vm399_vm4, %v5875_v16, -inf }
 0x36e   :  { %v5500_v19 = vpop.eup %5499  ;;  %1092 = vmax.xlane.f32.xlu0 %v1091_v18 }
 0x36f   :  { %v5020_v20 = vpop.f32.mrf.mxu0  ;;  %v406_v22 = vsel %vm399_vm4, %v5500_v19, 0.0 }
 0x371   :  { %v1195_v21 = vpop.f32.mrf.mxu0 }
 0x372   :  { %v1201_v23 = vmul.f32 0.17677669, %v1195_v21  ;;  %407 = vadd.xlane.f32.xlu0 %v406_v22 }
 0x373   :  { %v5031_v24 = vpop.f32.mrf.mxu0 }
 0x374   :  { %v1202_v26 = vsel %vm5845_vm3, %v1201_v23, -1e+30 }
 0x375   :  { %v1198_v28 = vpop.f32.mrf.mxu0  ;;  %v1203_v30 = vsel %vm399_vm4, %v1202_v26, -inf }
 0x376   :  { %1204 = vmax.xlane.f32.xlu1 %v1203_v30 }
 0x377   :  { %v5032_v31 = vpop.f32.mrf.mxu0 }
 0x378   :  { %v882_v31 = vsel %vm415_vm1, %v5903_v54, 0 }
 0x387   :  { %526 = vrot.lane.b32.xlu1 %v5783_v56, %s5584_s21 }
 0x388   :  { %638 = vrot.lane.b32.xlu0 %v5783_v56, %s5585_s22 }
 0x3cf   :  { %v515_v32 = vpop.xlane.xlu1 %514 }
 0x3d0   :  { %v516_v33 = vsub.f32 %v5854_v39, %v515_v32 }
 0x3d2   :  { %v517_v34 = vmul.f32 1.442695, %v516_v33 }
 0x3d4   :  { %5501 = vpow2.f32 %v517_v34 }
 0x3d7   :  { %v628_v35 = vpop.xlane.xlu0 %627 }
 0x3d8   :  { %v629_v36 = vsub.f32 %v625_v46, %v628_v35 }
 0x3da   :  { %v630_v37 = vmul.f32 1.442695, %v629_v36 }
 0x3dc   :  { %5503 = vpow2.f32 %v630_v37 }
 0x3df   :  { %v740_v38 = vpop.xlane.xlu0 %739 }
 0x3e0   :  { %v741_v40 = vsub.f32 %v737_v53, %v740_v38 }
 0x3e1   :  { %v5502_v41 = vpop.eup %5501 }
 0x3e2   :  { %v742_v42 = vmul.f32 1.442695, %v741_v40  ;;  %v519_v43 = vsel %vm399_vm4, %v5502_v41, 0.0 }
 0x3e3   :  { %520 = vadd.xlane.f32.xlu1 %v519_v43 }
 0x3e4   :  { %5505 = vpow2.f32 %v742_v42 }
 0x3e7   :  { %v868_v44 = vpop.xlane.xlu0 %867 }
 0x3e8   :  { %v869_v45 = vsub.f32 %v865_v63, %v868_v44 }
 0x3e9   :  { %v5889_v47 = vpop.eup %5503 }
 0x3ea   :  { %v870_v48 = vmul.f32 1.442695, %v869_v45  ;;  %v632_v39 = vsel %vm399_vm4, %v5889_v47, 0.0 }
 0x3eb   :  { %633 = vadd.xlane.f32.xlu0 %v632_v39 }
 0x3ec   :  { %5507 = vpow2.f32 %v870_v48 }
 0x3ef   :  { %v980_v55 = vpop.xlane.xlu1 %979 }
 0x3f0   :  { %v981_v1 = vsub.f32 %v5869_v9, %v980_v55 }
 0x3f1   :  { %v5893_v46 = vpop.eup %5505 }
 0x3f2   :  { %v744_v49 = vsel %vm399_vm4, %v5893_v46, 0.0  ;;  %v982_v2 = vmul.f32 1.442695, %v981_v1 }
 0x3f3   :  { %745 = vadd.xlane.f32.xlu1 %v744_v49 }
 0x3f7   :  { %v1093_v50 = vpop.xlane.xlu0 %1092 }
 0x3f8   :  { %v1094_v63 = vsub.f32 %v5875_v16, %v1093_v50 }
 0x3f9   :  { %v5897_v51 = vpop.eup %5507 }
 0x3fa   :  { %v872_v52 = vsel %vm399_vm4, %v5897_v51, 0.0  ;;  %v1095_v62 = vmul.f32 1.442695, %v1094_v63 }
 0x3fb   :  { %873 = vadd.xlane.f32.xlu0 %v872_v52  ;;  %v408_v53 = vpop.xlane.xlu0 %407 }
 0x3fc   :  { %5509 = vrcp.f32 %v408_v53 }
 0x3fd   :  { %5511 = vpow2.f32 %v1095_v62 }
 0x3fe   :  { %5513 = vpow2.f32 %v982_v2 }
 0x3ff   :  { %v1205_v57 = vpop.xlane.xlu1 %1204  ;;  %v639_v12 = vpop.permute.xlu0 %638 }
 0x400   :  { %v1206_v4 = vsub.f32 %v1202_v26, %v1205_v57  ;;  %v644_v18 = vsel %vm415_vm1, %v639_v12, 0 }
 0x402   :  { %v1207_v5 = vmul.f32 1.442695, %v1206_v4 }
 0x403   :  { %v527_v60 = vpop.permute.xlu1 %526 }
 0x404   :  { %991 = vrot.lane.b32.xlu1 %v5903_v54, %s5584_s21  ;;  %v532_v0 = vsel %vm415_vm1, %v527_v60, 0  ;;  %5515 = vpow2.f32 %v1207_v5  ;;  %v5265_v60 = vld [vmem:[%s6887_s4 + $0x28] sm:$0xff]  }
 0x409   :  { %v5510_v58 = vpop.eup %5509 }
 0x40a   :  { %v410_v59 = vmul.f32 %v5510_v58, %v5500_v19  ;;  %v5916_v6 = vpop.eup %5511  ;;  %v5263_v58 = vld [vmem:[%s6887_s4 + $0x38] sm:$0xff]  }
 0x40b   :  { %v1097_v7 = vsel %vm399_vm4, %v5916_v6, 0.0  ;;  %v5514_v8 = vpop.eup %5513  ;;  %5040 = vmatpush3.bf16.msra.mxu0 %v5263_v58 }
 0x40c   :  { %v411_v61 = vpack.c.bf16 %v410_v59, %v410_v59  ;;  %v5264_v59 = vld [vmem:[%s6887_s4 + $0x30] sm:$0xff]   ;;  %5041 = vmatprep.subr.bf16.mxu0 %v5581_v3 }
 0x40e   :  { %4952 = vmatmul.mubr.msk.bf16.vlgmr.msra.gmra.mxu1 %vm399_vm4, %v411_v61 }
 0x40f   :  { %4962 = vmatpush3.bf16.msra.mxu1 %v532_v0  ;;  %4963 = vmatprep.mubr.msk.bf16.mxu1 %vm5583_vm0, %v5581_v3 }
 0x410   :  { %4973 = vmatprep.subr.bf16.mxu1 %v5581_v3  ;;  %5042 = vmatpush3.bf16.msra.mxu0 %v5264_v59 }
 0x411   :  { %750 = vrot.lane.b32.xlu0 %v5783_v56, %s5586_s24  ;;  %v984_v56 = vsel %vm399_vm4, %v5514_v8, 0.0  ;;  %v5921_v10 = vpop.eup %5515  ;;  %5043 = vmatprep.subr.bf16.mxu0 %v5581_v3 }
 0x412   :  { %v1209_v9 = vsel %vm399_vm4, %v5921_v10, 0.0 }
 0x414   :  { %5044 = vmatpush3.bf16.msra.mxu0 %v5265_v60 }
 0x415   :  { %5045 = vmatprep.subr.bf16.mxu0 %v5581_v3 }
 0x428   :  { %1098 = vadd.xlane.f32.xlu1 %v1097_v7 }
 0x430   :  { %985 = vadd.xlane.f32.xlu0 %v984_v56 }
 0x434   :  { %1210 = vadd.xlane.f32.xlu0 %v1209_v9 }
 0x439   :  { %1215 = vrot.lane.b32.xlu1 %v5903_v54, %s5586_s24 }
 0x44a   :  { %1103 = vrot.lane.b32.xlu0 %v5903_v54, %s5585_s22 }
 0x46c   :  { %v521_v11 = vpop.xlane.xlu1 %520 }
 0x46d   :  { %5517 = vrcp.f32 %v521_v11 }
 0x474   :  { %v634_v13 = vpop.xlane.xlu0 %633 }
 0x475   :  { %5519 = vrcp.f32 %v634_v13  ;;  %v5266_v13 = vld [vmem:[%s6887_s4 + $0x20] sm:$0xff]  }
 0x476   :  { %5046 = vmatpush3.bf16.msra.mxu0 %v5266_v13  ;;  %v5282_v13 = vld [vmem:[%s6889_s8 + $0xcc] ss:$16 sps:$4 sm:$0xff]  }
 0x477   :  { %5047 = vmatprep.subr.bf16.mxu0 %v5581_v3 }
 0x47a   :  { %v5518_v14 = vpop.eup %5517 }
 0x47b   :  { %v523_v15 = vmul.f32 %v5518_v14, %v5502_v41  ;;  %v5267_v14 = vld [vmem:[%s6887_s4 + $0x18] sm:$0xff]  }
 0x47c   :  { %v746_v16 = vpop.xlane.xlu1 %745  ;;  %5048 = vmatpush3.bf16.msra.mxu0 %v5267_v14  ;;  %v5277_v14 = vld [vmem:[%s6889_s8 + $0xc0] ss:$16 sps:$4 sm:$0xff]  }
 0x47d   :  { %5521 = vrcp.f32 %v746_v16  ;;  %v524_v17 = vpack.c.bf16 %v523_v15, %v523_v15  ;;  %5049 = vmatprep.subr.bf16.mxu0 %v5581_v3  ;;  %v5268_v16 = vld [vmem:[%s6887_s4 + $0x10] sm:$0xff]  }
 0x47f   :  { %4964 = vmatmul.mubr.msk.bf16.vlgmr.msra.gmra.mxu1 %vm399_vm4, %v524_v17 }
 0x480   :  { %4974 = vmatpush3.bf16.msra.mxu1 %v644_v18  ;;  %4975 = vmatprep.mubr.msk.bf16.mxu1 %vm5583_vm0, %v5581_v3  ;;  %v992_v34 = vpop.permute.xlu1 %991 }
 0x481   :  { %4985 = vmatprep.subr.bf16.mxu1 %v5581_v3  ;;  %v997_v36 = vsel %vm415_vm1, %v992_v34, 0  ;;  %5050 = vmatpush3.bf16.msra.mxu0 %v5268_v16  ;;  %v5285_v16 = vld [vmem:[%s6889_s8 + $0xa4] ss:$16 sps:$4 sm:$0xff]  }
 0x482   :  { %v5520_v19 = vpop.eup %5519  ;;  %5051 = vmatprep.subr.bf16.mxu0 %v5581_v3 }
 0x483   :  { %v636_v20 = vmul.f32 %v5520_v19, %v5889_v47  ;;  %v5269_v19 = vld [vmem:[%s6887_s4 + $0x8] sm:$0xff]  }
 0x484   :  { %v874_v21 = vpop.xlane.xlu0 %873 }
 0x485   :  { %5523 = vrcp.f32 %v874_v21  ;;  %v637_v22 = vpack.c.bf16 %v636_v20, %v636_v20  ;;  %5052 = vmatpush3.bf16.msra.mxu0 %v5269_v19  ;;  %v5286_v19 = vld [vmem:[%s6889_s8 + $0xa8] ss:$16 sps:$4 sm:$0xff]  }
 0x486   :  { %5053 = vmatprep.subr.bf16.mxu0 %v5581_v3 }
 0x487   :  { %4976 = vmatmul.mubr.msk.bf16.vlgmr.msra.gmra.mxu1 %vm399_vm4, %v637_v22 }
 0x488   :  { %v751_v23 = vpop.permute.xlu0 %750  ;;  %4987 = vmatprep.mubr.msk.bf16.mxu1 %vm5583_vm0, %v5581_v3 }
 0x489   :  { %v756_v24 = vsel %vm415_vm1, %v751_v23, 0  ;;  %v5270_v23 = vld [vmem:[%s6887_s4] sm:$0xff]  }
 0x48a   :  { %v5522_v26 = vpop.eup %5521  ;;  %4986 = vmatpush3.bf16.msra.mxu1 %v756_v24  ;;  %5054 = vmatpush3.bf16.msra.mxu0 %v5270_v23  ;;  %v5294_v23 = vld [vmem:[%s6889_s8 + $0x8c] ss:$16 sps:$4 sm:$0xff]  }
 0x48b   :  { %4997 = vmatprep.subr.bf16.mxu1 %v5581_v3  ;;  %v748_v28 = vmul.f32 %v5522_v26, %v5893_v46 }
 0x48d   :  { %v749_v30 = vpack.c.bf16 %v748_v28, %v748_v28 }
 0x48f   :  { %4988 = vmatmul.mubr.msk.bf16.vlgmr.msra.gmra.mxu1 %vm399_vm4, %v749_v30 }
 0x490   :  { %4998 = vmatpush3.bf16.msra.mxu1 %v882_v31  ;;  %4999 = vmatprep.mubr.msk.bf16.mxu1 %vm5583_vm0, %v5581_v3 }
 0x491   :  { %5009 = vmatprep.subr.bf16.mxu1 %v5581_v3 }
 0x492   :  { %v5524_v32 = vpop.eup %5523 }
 0x493   :  { %v876_v33 = vmul.f32 %v5524_v32, %v5897_v51 }
 0x495   :  { %v877_v35 = vpack.c.bf16 %v876_v33, %v876_v33 }
 0x497   :  { %5000 = vmatmul.mubr.msk.bf16.vlgmr.msra.gmra.mxu1 %vm399_vm4, %v877_v35 }
 0x498   :  { %5010 = vmatpush3.bf16.msra.mxu1 %v997_v36  ;;  %5011 = vmatprep.mubr.msk.bf16.mxu1 %vm5583_vm0, %v5581_v3 }
 0x499   :  { %5021 = vmatprep.subr.bf16.mxu1 %v5581_v3 }
 0x4b1   :  { %v1099_v38 = vpop.xlane.xlu1 %1098 }
 0x4b5   :  { %v1216_v46 = vpop.permute.xlu1 %1215 }
 0x4b6   :  { %v1221_v53 = vsel %vm415_vm1, %v1216_v46, 0 }
 0x4b9   :  { %v986_v37 = vpop.xlane.xlu0 %985 }
 0x4ba   :  { %5525 = vrcp.f32 %v986_v37 }
 0x4bb   :  { %5527 = vrcp.f32 %v1099_v38 }
 0x4bd   :  { %v1211_v40 = vpop.xlane.xlu0 %1210 }
 0x4be   :  { %5529 = vrcp.f32 %v1211_v40 }
 0x4c1   :  { %v1104_v43 = vpop.permute.xlu0 %1103 }
 0x4c2   :  { %v1109_v47 = vsel %vm415_vm1, %v1104_v43, 0 }
 0x4c7   :  { %v5526_v41 = vpop.eup %5525 }
 0x4c8   :  { %v988_v42 = vmul.f32 %v5526_v41, %v5514_v8  ;;  %v5528_v45 = vpop.eup %5527 }
 0x4c9   :  { %v1101_v48 = vmul.f32 %v5528_v45, %v5916_v6 }
 0x4ca   :  { %v989_v44 = vpack.c.bf16 %v988_v42, %v988_v42 }
 0x4cb   :  { %v1102_v50 = vpack.c.bf16 %v1101_v48, %v1101_v48  ;;  %v5530_v51 = vpop.eup %5529 }
 0x4cc   :  { %5012 = vmatmul.mubr.msk.bf16.vlgmr.msra.gmra.mxu1 %vm399_vm4, %v989_v44  ;;  %v1213_v55 = vmul.f32 %v5530_v51, %v5921_v10 }
 0x4cd   :  { %5022 = vmatpush3.bf16.msra.mxu1 %v1109_v47  ;;  %5023 = vmatprep.mubr.msk.bf16.mxu1 %vm5583_vm0, %v5581_v3 }
 0x4ce   :  { %5033 = vmatprep.subr.bf16.mxu1 %v5581_v3  ;;  %v5959_v39 = vpop.f32.mrf.mxu1  ;;  %v1214_v57 = vpack.c.bf16 %v1213_v55, %v1213_v55 }
 0x4d0   :  { %v4953_v49 = vpop.f32.mrf.mxu1 }
 0x4d2   :  { %v456_v52 = vpop.f32.mrf.mxu1 }
 0x4d4   :  { %5024 = vmatmul.mubr.msk.bf16.vlgmr.msra.gmra.mxu1 %vm399_vm4, %v1102_v50  ;;  %v4954_v54 = vpop.f32.mrf.mxu1 }
 0x4d5   :  { %5034 = vmatpush3.bf16.msra.mxu1 %v1221_v53  ;;  %5035 = vmatprep.mubr.msk.bf16.mxu1 %vm5583_vm0, %v5581_v3  ;;  %v4372_v53 = vld [vmem:[%s6888_s5] ss:$0 sm:$0xff] }
 0x4dc   :  { %5036 = vmatmul.mubr.msk.bf16.vlgmr.msra.gmra.mxu1 %vm399_vm4, %v1214_v57  ;;  %v5579_v57 = vld [vmem:[%s6902_s23] sm:$0xff] }
 0x4dd   :  { %1680 = vmatprep.mubr.bf16.mxu1 %v5582_v27 }
 0x53f   :  { %v568_v61 = vpop.f32.mrf.mxu1 }
 0x541   :  { %v4965_v63 = vpop.f32.mrf.mxu1 }
 0x542   :  { %v5580_v63 = vld [vmem:[%s6902_s23 + $0x8] sm:$0xff] }
 0x543   :  { %v571_v0 = vpop.f32.mrf.mxu1 }
 0x545   :  { %v4966_v62 = vpop.f32.mrf.mxu1 }
 0x546   :  { %v5271_v62 = vld [vmem:[%s6889_s8 + $0xe0] ss:$16 sps:$4 sm:$0xff]  }
 0x547   :  { %v680_v1 = vpop.f32.mrf.mxu1 }
 0x549   :  { %v4977_v2 = vpop.f32.mrf.mxu1 }
 0x54a   :  { %v5274_v2 = vld [vmem:[%s6889_s8 + $0xe8] ss:$16 sps:$4 sm:$0xff]  }
 0x54b   :  { %v683_v4 = vpop.f32.mrf.mxu1 }
 0x54c   :  { %v5276_v4 = vld [vmem:[%s6889_s8 + $0xec] ss:$16 sps:$4 sm:$0xff]  }
 0x54d   :  { %v4978_v5 = vpop.f32.mrf.mxu1  ;;  %1691 = vmatprep.subr.bf16.mxu0 %v5276_v4  ;;  %v5323_v4 = vld [vmem:[%s6890_s10 + $0x70] sm:$0xff]  }
 0x54f   :  { %v792_v6 = vpop.f32.mrf.mxu1 }
 0x551   :  { %v4989_v7 = vpop.f32.mrf.mxu1 }
 0x553   :  { %v795_v8 = vpop.f32.mrf.mxu1 }
 0x555   :  { %v4990_v56 = vpop.f32.mrf.mxu1 }
 0x557   :  { %v918_v10 = vpop.f32.mrf.mxu1 }
 0x559   :  { %v5001_v9 = vpop.f32.mrf.mxu1 }
 0x55b   :  { %v921_v11 = vpop.f32.mrf.mxu1 }
 0x55d   :  { %v5002_v12 = vpop.f32.mrf.mxu1 }
 0x55e   :  { %v5279_v12 = vld [vmem:[%s6889_s8 + $0xc4] ss:$16 sps:$4 sm:$0xff]  }
 0x58c   :  { %v1033_v15 = vpop.f32.mrf.mxu1 }
 0x58d   :  { %v5201_v17 = vpack.i.bf16 %v1033_v15, %v568_v61  ;;  %v5280_v15 = vld [vmem:[%s6889_s8 + $0xc8] ss:$16 sps:$4 sm:$0xff]  }
 0x58e   :  { %v5013_v18 = vpop.f32.mrf.mxu1 }
 0x58f   :  { %5202 = vrot.lane.b32.xlu1 %v5201_v17, %s5586_s24  ;;  %v5288_v17 = vld [vmem:[%s6889_s8 + $0xac] ss:$16 sps:$4 sm:$0xff]   ;;  %v5283_v18 = vld [vmem:[%s6889_s8 + $0xa0] ss:$16 sps:$4 sm:$0xff]  }
 0x590   :  { %v1036_v20 = vpop.f32.mrf.mxu1 }
 0x591   :  { %v5291_v20 = vld [vmem:[%s6889_s8 + $0x84] ss:$16 sps:$4 sm:$0xff]  }
 0x592   :  { %v5014_v21 = vpop.f32.mrf.mxu1 }
 0x593   :  { %v5289_v21 = vld [vmem:[%s6889_s8 + $0x80] ss:$16 sps:$4 sm:$0xff]  }
 0x594   :  { %v1145_v22 = vpop.f32.mrf.mxu1 }
 0x595   :  { %v5206_v24 = vpack.i.bf16 %v1145_v22, %v680_v1  ;;  %v5273_v1 = vld [vmem:[%s6889_s8 + $0xe4] ss:$16 sps:$4 sm:$0xff]   ;;  %v5292_v22 = vld [vmem:[%s6889_s8 + $0x88] ss:$16 sps:$4 sm:$0xff]  }
 0x596   :  { %v5025_v26 = vpop.f32.mrf.mxu1  ;;  %1648 = vmatprep.subr.bf16.mxu1 %v5273_v1  ;;  %v5322_v1 = vld [vmem:[%s6890_s10 + $0xb8] sm:$0xff]  }
 0x597   :  { %5207 = vrot.lane.b32.xlu1 %v5206_v24, %s5585_s22  ;;  %1649 = vmatpush1.bf16.msra.mxu1 %v5271_v62  ;;  %v5297_v24 = vld [vmem:[%s6889_s8 + $0x64] ss:$16 sps:$4 sm:$0xff]   ;;  %v5300_v26 = vld [vmem:[%s6889_s8 + $0x6c] ss:$16 sps:$4 sm:$0xff]  }
 0x598   :  { %v1148_v28 = vpop.f32.mrf.mxu1  ;;  %1650 = vmatprep.subr.bf16.mxu1 %v5279_v12  ;;  %v5321_v62 = vld [vmem:[%s6890_s10 + $0x38] sm:$0xff]   ;;  %v5332_v12 = vld [vmem:[%s6890_s10 + $0xe0] sm:$0xff]  }
 0x599   :  { %v5295_v28 = vld [vmem:[%s6889_s8 + $0x60] ss:$16 sps:$4 sm:$0xff]  }
 0x59a   :  { %v5026_v30 = vpop.f32.mrf.mxu1 }
 0x59b   :  { %1651 = vmatpush1.bf16.msra.mxu1 %v5277_v14  ;;  %v5298_v30 = vld [vmem:[%s6889_s8 + $0x68] ss:$16 sps:$4 sm:$0xff]   ;;  %v5334_v14 = vld [vmem:[%s6890_s10 + $0xa0] sm:$0xff]  }
 0x59c   :  { %v1257_v31 = vpop.f32.mrf.mxu1  ;;  %1652 = vmatprep.subr.bf16.mxu1 %v5285_v16  ;;  %v5336_v16 = vld [vmem:[%s6890_s10 + $0xd8] sm:$0xff]  }
 0x59d   :  { %v5211_v32 = vpack.i.bf16 %v1257_v31, %v792_v6  ;;  %v5303_v31 = vld [vmem:[%s6889_s8 + $0x44] ss:$16 sps:$4 sm:$0xff]  }
 0x59e   :  { %v5037_v33 = vpop.f32.mrf.mxu1 }
 0x59f   :  { %5212 = vrot.lane.b32.xlu1 %v5211_v32, %s5584_s21  ;;  %1653 = vmatpush1.bf16.msra.mxu1 %v5283_v18  ;;  %v5306_v32 = vld [vmem:[%s6889_s8 + $0x4c] ss:$16 sps:$4 sm:$0xff]   ;;  %v5301_v33 = vld [vmem:[%s6889_s8 + $0x40] ss:$16 sps:$4 sm:$0xff]  }
 0x5a0   :  { %v1260_v34 = vpop.f32.mrf.mxu1  ;;  %1654 = vmatprep.subr.bf16.mxu1 %v5291_v20  ;;  %v5338_v18 = vld [vmem:[%s6890_s10 + $0x98] sm:$0xff]   ;;  %v5340_v20 = vld [vmem:[%s6890_s10 + $0xd0] sm:$0xff]  }
 0x5a1   :  { %v5304_v34 = vld [vmem:[%s6889_s8 + $0x48] ss:$16 sps:$4 sm:$0xff]  }
 0x5a2   :  { %v5038_v35 = vpop.f32.mrf.mxu1 }
 0x5a3   :  { %1655 = vmatpush1.bf16.msra.mxu1 %v5289_v21  ;;  %v5309_v35 = vld [vmem:[%s6889_s8 + $0x24] ss:$16 sps:$4 sm:$0xff]  }
 0x5a4   :  { %1656 = vmatprep.subr.bf16.mxu1 %v5297_v24  ;;  %v5341_v21 = vld [vmem:[%s6890_s10 + $0x10] sm:$0xff]   ;;  %v5344_v24 = vld [vmem:[%s6890_s10 + $0xc8] sm:$0xff]  }
 0x5a7   :  { %1657 = vmatpush1.bf16.msra.mxu1 %v5295_v28  ;;  %v5346_v28 = vld [vmem:[%s6890_s10 + $0x88] sm:$0xff]  }
 0x5a8   :  { %1658 = vmatprep.subr.bf16.mxu1 %v5303_v31  ;;  %v5348_v31 = vld [vmem:[%s6890_s10 + $0xc0] sm:$0xff]  }
 0x5ab   :  { %1659 = vmatpush1.bf16.msra.mxu1 %v5301_v33  ;;  %v5350_v33 = vld [vmem:[%s6890_s10 + $0x80] sm:$0xff]  }
 0x5ac   :  { %1660 = vmatprep.subr.bf16.mxu1 %v5309_v35  ;;  %v1482_v35 = vsub.s32 3, %v5842_v25 }
 0x601   :  { %v5203_v36 = vpop.permute.xlu1 %5202 }
 0x602   :  { %v5205_v38 = vunpack.i.h.bf16 %v5203_v36  ;;  %v5204_v40 = vunpack.i.l.bf16 %v5203_v36  ;;  %v5312_v36 = vld [vmem:[%s6889_s8 + $0x2c] ss:$16 sps:$4 sm:$0xff]  }
 0x604   :  { %v1275_v44 = vsel %vm350_vm2, %v918_v10, %v5205_v38  ;;  %v810_v45 = vsel %vm350_vm2, %v5959_v39, %v5204_v40  ;;  %v5310_v38 = vld [vmem:[%s6889_s8 + $0x28] ss:$16 sps:$4 sm:$0xff]   ;;  %v5315_v40 = vld [vmem:[%s6889_s8 + $0x4] ss:$16 sps:$4 sm:$0xff]  }
 0x609   :  { %v5208_v37 = vpop.permute.xlu1 %5207 }
 0x60a   :  { %v5210_v41 = vunpack.i.h.bf16 %v5208_v37  ;;  %v5209_v42 = vunpack.i.l.bf16 %v5208_v37  ;;  %v5307_v37 = vld [vmem:[%s6889_s8 + $0x20] ss:$16 sps:$4 sm:$0xff]  }
 0x60b   :  { %1661 = vmatpush1.bf16.msra.mxu1 %v5307_v37  ;;  %v1478_v37 = vsub.s32 2, %v5842_v25 }
 0x60c   :  { %v812_v46 = vsel %vm811_vm5, %v810_v45, %v5209_v42  ;;  %v1276_v49 = vsel %vm811_vm5, %v1275_v44, %v5210_v41  ;;  %v5318_v41 = vld [vmem:[%s6889_s8 + $0xc] ss:$16 sps:$4 sm:$0xff]   ;;  %v5313_v42 = vld [vmem:[%s6889_s8] ss:$16 sps:$4 sm:$0xff]   ;;  %1662 = vmatprep.subr.bf16.mxu1 %v5315_v40 }
 0x60d   :  { %v5319_v44 = vld [vmem:[%s6890_s10 + $0x78] sm:$0xff]  }
 0x60e   :  { %v5320_v45 = vld [vmem:[%s6890_s10 + $0xf8] sm:$0xff]  }
 0x60f   :  { %1663 = vmatpush1.bf16.msra.mxu1 %v5313_v42 }
 0x610   :  { %4785 = vmatprep.subr.bf16.mxu1 %v5319_v44 }
 0x611   :  { %v5213_v43 = vpop.permute.xlu1 %5212 }
 0x612   :  { %v5215_v47 = vunpack.i.h.bf16 %v5213_v43  ;;  %v5214_v48 = vunpack.i.l.bf16 %v5213_v43  ;;  %v5316_v43 = vld [vmem:[%s6889_s8 + $0x8] ss:$16 sps:$4 sm:$0xff]  }
 0x614   :  { %v814_v50 = vsel %vm813_vm6, %v812_v46, %v5214_v48  ;;  %v1277_v51 = vsel %vm813_vm6, %v1276_v49, %v5215_v47 }
 0x615   :  { %v1278_v52 = vpack.c.bf16 %v1277_v51, %v814_v50 }
 0x617   :  { %5056 = vmatmul.mubr.bf16.vlgmr.msra.gmra.mxu0 %v1278_v52 }
 0x618   :  { %1723 = vmatprep.mubr.bf16.mxu0 %v5582_v27  ;;  %1692 = vmatpush1.bf16.msra.mxu0 %v5274_v2 }
 0x619   :  { %1693 = vmatprep.subr.bf16.mxu0 %v5282_v13  ;;  %v5333_v13 = vld [vmem:[%s6890_s10 + $0x20] sm:$0xff]  }
 0x61c   :  { %1694 = vmatpush1.bf16.msra.mxu0 %v5280_v15  ;;  %v5335_v15 = vld [vmem:[%s6890_s10 + $0x58] sm:$0xff]  }
 0x61d   :  { %1695 = vmatprep.subr.bf16.mxu0 %v5288_v17  ;;  %v5337_v17 = vld [vmem:[%s6890_s10 + $0x18] sm:$0xff]  }
 0x620   :  { %1696 = vmatpush1.bf16.msra.mxu0 %v5286_v19  ;;  %v5339_v19 = vld [vmem:[%s6890_s10 + $0x50] sm:$0xff]  }
 0x621   :  { %1697 = vmatprep.subr.bf16.mxu0 %v5294_v23  ;;  %v5343_v23 = vld [vmem:[%s6890_s10 + $0x48] sm:$0xff]  }
 0x624   :  { %1698 = vmatpush1.bf16.msra.mxu0 %v5292_v22  ;;  %v5342_v22 = vld [vmem:[%s6890_s10 + $0x90] sm:$0xff]  }
 0x625   :  { %1699 = vmatprep.subr.bf16.mxu0 %v5300_v26  ;;  %v5345_v26 = vld [vmem:[%s6890_s10 + $0x8] sm:$0xff]  }
 0x628   :  { %1700 = vmatpush1.bf16.msra.mxu0 %v5298_v30  ;;  %v5347_v30 = vld [vmem:[%s6890_s10 + $0x40] sm:$0xff]  }
 0x629   :  { %1701 = vmatprep.subr.bf16.mxu0 %v5306_v32  ;;  %v5349_v32 = vld [vmem:[%s6890_s10] sm:$0xff]  }
 0x62c   :  { %1702 = vmatpush1.bf16.msra.mxu0 %v5304_v34  ;;  %v6237_v34 = vsub.s32 1, %v5842_v25 }
 0x62d   :  { %1703 = vmatprep.subr.bf16.mxu0 %v5312_v36  ;;  %v6241_v36 = vsub.s32 0, %v5842_v25 }
 0x630   :  { %1704 = vmatpush1.bf16.msra.mxu0 %v5310_v38  ;;  %v1466_v38 = vld [vmem:[%s6893_s9] sm:$0xf] }
 0x631   :  { %1705 = vmatprep.subr.bf16.mxu0 %v5318_v41  ;;  %v1475_v42 = vrot.slane %v1466_v38, %v6237_v34  ;;  %v1471_v44 = vrot.slane %v1466_v38, %v6241_v36 }
 0x634   :  { %1706 = vmatpush1.bf16.msra.mxu0 %v5316_v43  ;;  %v1483_v43 = vrot.slane %v1466_v38, %v1482_v35 }
 0x635   :  { %4807 = vmatprep.subr.bf16.mxu0 %v5320_v45  ;;  %v1479_v45 = vrot.slane %v1466_v38, %v1478_v37 }
 0x6d7   :  { %v1384_v54 = vpop.f32.mrf.mxu0 }
 0x6d8   :  { %v1385_v39 = vadd.f32 %v4372_v53, %v1384_v54  ;;  %v4381_v54 = vld [vmem:[%s6891_s6] ss:$0 sm:$0xff] }
 0x6d9   :  { %v5057_v55 = vpop.f32.mrf.mxu0 }
 0x6da   :  { %v6016_v58 = vadd.f32 %v5579_v57, %v1385_v39 }
 0x6db   :  { %v1387_v59 = vpop.f32.mrf.mxu0 }
 0x6dc   :  { %v1388_v60 = vadd.f32 %v4372_v53, %v1387_v59  ;;  %1395 = vadd.xlane.f32.xlu1 %v6016_v58  ;;  %v4382_v59 = vld [vmem:[%s6892_s7] ss:$0 sm:$0xff] }
 0x6dd   :  { %v5058_v61 = vpop.f32.mrf.mxu0 }
 0x6de   :  { %v6022_v0 = vadd.f32 %v5580_v63, %v1388_v60 }
 0x6e0   :  { %1397 = vadd.xlane.f32.xlu0 %v6022_v0 }
 0x765   :  { %v1396_v5 = vpop.xlane.xlu1 %1395 }
 0x766   :  { %v1399_v6 = vmul.f32 0.0078125, %v1396_v5  ;;  %v5324_v5 = vld [vmem:[%s6890_s10 + $0xf0] sm:$0xff]  }
 0x768   :  { %v6038_v7 = vsub.f32 %v6016_v58, %v1399_v6  ;;  %v5325_v6 = vld [vmem:[%s6890_s10 + $0x30] sm:$0xff]  }
 0x769   :  { %v1398_v8 = vpop.xlane.xlu0 %1397 }
 0x76a   :  { %v1400_v56 = vmul.f32 0.0078125, %v1398_v8  ;;  %v1403_v10 = vmul.f32 %v6038_v7, %v6038_v7  ;;  %v5327_v8 = vld [vmem:[%s6890_s10 + $0x68] sm:$0xff]  }
 0x76c   :  { %v6043_v9 = vsub.f32 %v6022_v0, %v1400_v56  ;;  %1405 = vadd.xlane.f32.xlu0 %v1403_v10  ;;  %v5328_v56 = vld [vmem:[%s6890_s10 + $0xe8] sm:$0xff]  }
 0x76d   :  { %v5329_v10 = vld [vmem:[%s6890_s10 + $0x28] sm:$0xff]  }
 0x76e   :  { %v1404_v11 = vmul.f32 %v6043_v9, %v6043_v9 }
 0x770   :  { %1407 = vadd.xlane.f32.xlu0 %v1404_v11  ;;  %v5331_v11 = vld [vmem:[%s6890_s10 + $0x60] sm:$0xff]  }
 0x7f5   :  { %v1406_v47 = vpop.xlane.xlu0 %1405 }
 0x7f6   :  { %v1409_v48 = vmul.f32 0.0078125, %v1406_v47 }
 0x7f8   :  { %v1411_v46 = vadd.f32 1e-05, %v1409_v48 }
 0x7f9   :  { %v1408_v49 = vpop.xlane.xlu0 %1407 }
 0x7fa   :  { %5531 = vrsqrt.f32 %v1411_v46  ;;  %v1410_v50 = vmul.f32 0.0078125, %v1408_v49 }
 0x7fc   :  { %v1412_v51 = vadd.f32 1e-05, %v1410_v50 }
 0x7fe   :  { %5533 = vrsqrt.f32 %v1412_v51 }
 0x807   :  { %v5532_v52 = vpop.eup %5531 }
 0x808   :  { %v1415_v53 = vmul.f32 %v5532_v52, %v6038_v7  ;;  %v5326_v7 = vld [vmem:[%s6890_s10 + $0xb0] sm:$0xff]  }
 0x80a   :  { %v1423_v57 = vmul.f32 %v4381_v54, %v1415_v53 }
 0x80b   :  { %v5534_v39 = vpop.eup %5533 }
 0x80c   :  { %v1416_v55 = vmul.f32 %v5534_v39, %v6043_v9  ;;  %v1431_v61 = vadd.f32 %v4382_v59, %v1423_v57  ;;  %v5330_v9 = vld [vmem:[%s6890_s10 + $0xa8] sm:$0xff]  }
 0x80e   :  { %v1424_v60 = vmul.f32 %v4381_v54, %v1416_v55 }
 0x810   :  { %v1432_v63 = vadd.f32 %v4382_v59, %v1424_v60 }
 0x812   :  { %v1433_v2 = vpack.c.bf16 %v1432_v63, %v1431_v61 }
 0x814   :  { %1681 = vmatmul.mubr.bf16.vlgmr.msra.gmra.mxu1 %v1433_v2  ;;  %1724 = vmatmul.mubr.bf16.vlgmr.msra.gmra.mxu0 %v1433_v2 }
 0x815   :  { %4786 = vmatpush3.bf16.msra.mxu1 %v5321_v62  ;;  %4808 = vmatpush3.bf16.msra.mxu0 %v5322_v1 }
 0x816   :  { %4787 = vmatprep.subr.bf16.mxu1 %v5323_v4  ;;  %4809 = vmatprep.subr.bf16.mxu0 %v5324_v5 }
 0x819   :  { %4788 = vmatpush3.bf16.msra.mxu1 %v5325_v6  ;;  %4810 = vmatpush3.bf16.msra.mxu0 %v5326_v7 }
 0x81a   :  { %4789 = vmatprep.subr.bf16.mxu1 %v5327_v8  ;;  %4811 = vmatprep.subr.bf16.mxu0 %v5328_v56 }
 0x81d   :  { %4790 = vmatpush3.bf16.msra.mxu1 %v5329_v10  ;;  %4812 = vmatpush3.bf16.msra.mxu0 %v5330_v9 }
 0x81e   :  { %4791 = vmatprep.subr.bf16.mxu1 %v5331_v11  ;;  %4813 = vmatprep.subr.bf16.mxu0 %v5332_v12  ;;  %v4415_v12 = vld [vmem:[%s6894_s11] ss:$0 sm:$0xff] }
 0x821   :  { %4792 = vmatpush3.bf16.msra.mxu1 %v5333_v13  ;;  %4814 = vmatpush3.bf16.msra.mxu0 %v5334_v14 }
 0x822   :  { %4793 = vmatprep.subr.bf16.mxu1 %v5335_v15  ;;  %4815 = vmatprep.subr.bf16.mxu0 %v5336_v16 }
 0x825   :  { %4794 = vmatpush3.bf16.msra.mxu1 %v5337_v17  ;;  %4816 = vmatpush3.bf16.msra.mxu0 %v5338_v18 }
 0x826   :  { %4795 = vmatprep.subr.bf16.mxu1 %v5339_v19  ;;  %4817 = vmatprep.subr.bf16.mxu0 %v5340_v20 }
 0x829   :  { %4796 = vmatpush3.bf16.msra.mxu1 %v5341_v21  ;;  %4818 = vmatpush3.bf16.msra.mxu0 %v5342_v22 }
 0x82a   :  { %4797 = vmatprep.subr.bf16.mxu1 %v5343_v23  ;;  %4819 = vmatprep.subr.bf16.mxu0 %v5344_v24 }
 0x82d   :  { %4798 = vmatpush3.bf16.msra.mxu1 %v5345_v26  ;;  %4820 = vmatpush3.bf16.msra.mxu0 %v5346_v28 }
 0x82e   :  { %4799 = vmatprep.subr.bf16.mxu1 %v5347_v30  ;;  %4821 = vmatprep.subr.bf16.mxu0 %v5348_v31 }
 0x831   :  { %4800 = vmatpush3.bf16.msra.mxu1 %v5349_v32  ;;  %4822 = vmatpush3.bf16.msra.mxu0 %v5350_v33  ;;  %v5351_v32 = vld [vmem:[%s6884_s3 + $0x168] ss:$12 sps:$4 sm:$0xff]   ;;  %v5353_v33 = vld [vmem:[%s6884_s3 + $0x16c] ss:$12 sps:$4 sm:$0xff]  }
 0x832   :  { %5059 = vmatprep.subr.bf16.mxu0 %v5581_v3  ;;  %2297 = vmatprep.subr.bf16.mxu1 %v5353_v33 }
 0x8d4   :  { %v1682_v40 = vpop.f32.mrf.mxu1  ;;  %v1725_v41 = vpop.f32.mrf.mxu0 }
 0x8d5   :  { %v1683_v54 = vadd.f32 %v1682_v40, %v1471_v44  ;;  %v1726_v39 = vadd.f32 %v1725_v41, %v1479_v45 }
 0x8d6   :  { %v1684_v47 = vpop.f32.mrf.mxu1  ;;  %v1727_v48 = vpop.f32.mrf.mxu0 }
 0x8d7   :  { %v1685_v50 = vadd.f32 %v1684_v47, %v1475_v42  ;;  %v1728_v51 = vadd.f32 %v1727_v48, %v1483_v43  ;;  %v1734_v5 = vmax.f32 %v1683_v54, 0.0  ;;  %v1736_v6 = vmax.f32 %v1726_v39, 0.0  ;;  %v5357_v47 = vld [vmem:[%s6884_s3 + $0x154] ss:$12 sps:$4 sm:$0xff]   ;;  %v5355_v48 = vld [vmem:[%s6884_s3 + $0x150] ss:$12 sps:$4 sm:$0xff]  }
 0x8d8   :  { %v1686_v46 = vpop.f32.mrf.mxu1  ;;  %v1729_v49 = vpop.f32.mrf.mxu0  ;;  %v5366_v54 = vld [vmem:[%s6884_s3 + $0x128] ss:$12 sps:$4 sm:$0xff]   ;;  %v5369_v39 = vld [vmem:[%s6884_s3 + $0x10c] ss:$12 sps:$4 sm:$0xff]  }
 0x8d9   :  { %v1687_v52 = vadd.f32 %v1686_v46, %v1471_v44  ;;  %v1730_v53 = vadd.f32 %v1729_v49, %v1479_v45  ;;  %v1735_v62 = vmax.f32 %v1685_v50, 0.0  ;;  %v1737_v1 = vmax.f32 %v1728_v51, 0.0  ;;  %v5358_v46 = vld [vmem:[%s6884_s3 + $0x158] ss:$12 sps:$4 sm:$0xff]   ;;  %v5361_v49 = vld [vmem:[%s6884_s3 + $0x13c] ss:$12 sps:$4 sm:$0xff]  }
 0x8da   :  { %v1688_v55 = vpop.f32.mrf.mxu1  ;;  %v1731_v57 = vpop.f32.mrf.mxu0  ;;  %v5359_v50 = vld [vmem:[%s6884_s3 + $0x138] ss:$12 sps:$4 sm:$0xff]   ;;  %v5362_v51 = vld [vmem:[%s6884_s3 + $0x140] ss:$12 sps:$4 sm:$0xff]  }
 0x8db   :  { %v1689_v59 = vadd.f32 %v1688_v55, %v1475_v42  ;;  %v1732_v60 = vadd.f32 %v1731_v57, %v1483_v43  ;;  %v1738_v61 = vmax.f32 %v1687_v52, 0.0  ;;  %v1740_v63 = vmax.f32 %v1730_v53, 0.0  ;;  %v5365_v52 = vld [vmem:[%s6884_s3 + $0x124] ss:$12 sps:$4 sm:$0xff]   ;;  %v5363_v53 = vld [vmem:[%s6884_s3 + $0x120] ss:$12 sps:$4 sm:$0xff]  }
 0x8dc   :  { %v5367_v55 = vld [vmem:[%s6884_s3 + $0x108] ss:$12 sps:$4 sm:$0xff]   ;;  %v5370_v57 = vld [vmem:[%s6884_s3 + $0x110] ss:$12 sps:$4 sm:$0xff]  }
 0x8dd   :  { %v1739_v2 = vmax.f32 %v1689_v59, 0.0  ;;  %v1741_v4 = vmax.f32 %v1732_v60, 0.0  ;;  %v1742_v56 = vpack.c.bf16 %v1738_v61, %v1734_v5  ;;  %v1744_v10 = vpack.c.bf16 %v1740_v63, %v1736_v6  ;;  %v5373_v59 = vld [vmem:[%s6884_s3 + $0xf4] ss:$12 sps:$4 sm:$0xff]   ;;  %v5371_v60 = vld [vmem:[%s6884_s3 + $0xf0] ss:$12 sps:$4 sm:$0xff]  }
 0x8de   :  { %v5374_v61 = vld [vmem:[%s6884_s3 + $0xf8] ss:$12 sps:$4 sm:$0xff]   ;;  %v5377_v63 = vld [vmem:[%s6884_s3 + $0xdc] ss:$12 sps:$4 sm:$0xff]  }
 0x8df   :  { %v1743_v7 = vpack.c.bf16 %v1739_v2, %v1735_v62  ;;  %v1745_v8 = vpack.c.bf16 %v1741_v4, %v1737_v1  ;;  %v5375_v62 = vld [vmem:[%s6884_s3 + $0xd8] ss:$12 sps:$4 sm:$0xff]   ;;  %v5378_v1 = vld [vmem:[%s6884_s3 + $0xe0] ss:$12 sps:$4 sm:$0xff]   ;;  %v5382_v5 = vld [vmem:[%s6884_s3 + $0xc8] ss:$12 sps:$4 sm:$0xff]  }
 0x8e0   :  { %v5381_v2 = vld [vmem:[%s6884_s3 + $0xc4] ss:$12 sps:$4 sm:$0xff]   ;;  %v5379_v4 = vld [vmem:[%s6884_s3 + $0xc0] ss:$12 sps:$4 sm:$0xff]  }
 0x8e1   :  { %2041 = vmatprep.mubr.bf16.mxu1 %v1743_v7  ;;  %2082 = vmatprep.mubr.bf16.mxu0 %v1745_v8 }
 0x8e2   :  { %2042 = vmatmul.mubr.bf16.vlgmr.msra.gmra.mxu1 %v1742_v56  ;;  %2083 = vmatmul.mubr.bf16.vlgmr.msra.gmra.mxu0 %v1744_v10 }
 0x8e3   :  { %2329 = vmatprep.mubr.bf16.mxu1 %v5582_v27  ;;  %5075 = vmatprep.mubr.msk.bf16.mxu0 %vm5583_vm0, %v5581_v3 }
 0x8e4   :  { %2298 = vmatpush1.bf16.msra.mxu1 %v5351_v32 }
 0x8e5   :  { %2299 = vmatprep.subr.bf16.mxu1 %v5357_v47 }
 0x8e8   :  { %2300 = vmatpush1.bf16.msra.mxu1 %v5355_v48 }
 0x8e9   :  { %2301 = vmatprep.subr.bf16.mxu1 %v5361_v49 }
 0x8ec   :  { %2302 = vmatpush1.bf16.msra.mxu1 %v5359_v50 }
 0x8ed   :  { %2303 = vmatprep.subr.bf16.mxu1 %v5365_v52 }
 0x8f0   :  { %2304 = vmatpush1.bf16.msra.mxu1 %v5363_v53 }
 0x8f1   :  { %2305 = vmatprep.subr.bf16.mxu1 %v5369_v39 }
 0x8f4   :  { %2306 = vmatpush1.bf16.msra.mxu1 %v5367_v55 }
 0x8f5   :  { %2307 = vmatprep.subr.bf16.mxu1 %v5373_v59 }
 0x8f8   :  { %2308 = vmatpush1.bf16.msra.mxu1 %v5371_v60 }
 0x8f9   :  { %2309 = vmatprep.subr.bf16.mxu1 %v5377_v63 }
 0x8fc   :  { %2310 = vmatpush1.bf16.msra.mxu1 %v5375_v62 }
 0x8fd   :  { %2311 = vmatprep.subr.bf16.mxu1 %v5381_v2 }
 0x900   :  { %2312 = vmatpush1.bf16.msra.mxu1 %v5379_v4 }
 0x901   :  { %5079 = vmatprep.subr.bf16.mxu1 %v5581_v3 }
 0x9a2   :  { %v4801_v9 = vpop.f32.mrf.mxu1  ;;  %v4823_v11 = vpop.f32.mrf.mxu0 }
 0x9a4   :  { %v4802_v13 = vpop.f32.mrf.mxu1  ;;  %v4824_v14 = vpop.f32.mrf.mxu0 }
 0x9a5   :  { %v4803_v15 = vadd.f32 %v4802_v13, %v4801_v9  ;;  %v4825_v19 = vadd.f32 %v4824_v14, %v4823_v11  ;;  %v4451_v14 = vld [vmem:[%s6886_s2 + $0x1] ss:$0 sm:$0xff] }
 0x9a6   :  { %v4804_v16 = vpop.f32.mrf.mxu1  ;;  %v4826_v17 = vpop.f32.mrf.mxu0 }
 0x9a7   :  { %v2044_v18 = vadd.f32 %v4803_v15, %v4415_v12 }
 0x9a8   :  { %v4805_v20 = vpop.f32.mrf.mxu1  ;;  %v4827_v21 = vpop.f32.mrf.mxu0 }
 0x9a9   :  { %v2085_v22 = vadd.f32 %v4825_v19, %v2044_v18  ;;  %v4806_v23 = vadd.f32 %v4805_v20, %v4804_v16  ;;  %v4828_v26 = vadd.f32 %v4827_v21, %v4826_v17 }
 0x9ab   :  { %v2047_v24 = vadd.f32 %v4806_v23, %v4415_v12  ;;  %v6260_v28 = vadd.f32 %v2085_v22, %v6016_v58  ;;  %v5354_v58 = vld [vmem:[%s6884_s3 + $0x170] ss:$12 sps:$4 sm:$0xff]   ;;  %v4450_v12 = vld [vmem:[%s6885_s1 + $0x1] ss:$0 sm:$0xff] }
 0x9ac   :  { %5060 = vmatpush3.bf16.msra.mxu0 %v5354_v58 }
 0x9ad   :  { %v2088_v30 = vadd.f32 %v4828_v26, %v2047_v24  ;;  %2097 = vadd.xlane.f32.xlu1 %v6260_v28  ;;  %5061 = vmatprep.subr.bf16.mxu0 %v5581_v3 }
 0x9af   :  { %v6264_v31 = vadd.f32 %v2088_v30, %v6022_v0 }
 0x9b0   :  { %5062 = vmatpush3.bf16.msra.mxu0 %v5358_v46 }
 0x9b1   :  { %2099 = vadd.xlane.f32.xlu0 %v6264_v31  ;;  %5063 = vmatprep.subr.bf16.mxu0 %v5581_v3 }
 0x9b4   :  { %5064 = vmatpush3.bf16.msra.mxu0 %v5362_v51 }
 0x9b5   :  { %5065 = vmatprep.subr.bf16.mxu0 %v5581_v3 }
 0x9b8   :  { %5066 = vmatpush3.bf16.msra.mxu0 %v5366_v54 }
 0x9b9   :  { %5067 = vmatprep.subr.bf16.mxu0 %v5581_v3 }
 0x9bc   :  { %5068 = vmatpush3.bf16.msra.mxu0 %v5370_v57 }
 0x9bd   :  { %5069 = vmatprep.subr.bf16.mxu0 %v5581_v3 }
 0x9c0   :  { %5070 = vmatpush3.bf16.msra.mxu0 %v5374_v61 }
 0x9c1   :  { %5071 = vmatprep.subr.bf16.mxu0 %v5581_v3 }
 0x9c4   :  { %5072 = vmatpush3.bf16.msra.mxu0 %v5378_v1 }
 0x9c5   :  { %5073 = vmatprep.subr.bf16.mxu0 %v5581_v3 }
 0x9c8   :  { %5074 = vmatpush3.bf16.msra.mxu0 %v5382_v5 }
 0x9c9   :  { %5103 = vmatprep.subr.bf16.mxu0 %v5581_v3 }
 0xa36   :  { %v2098_v0 = vpop.xlane.xlu1 %2097 }
 0xa37   :  { %v2101_v38 = vmul.f32 0.0078125, %v2098_v0 }
 0xa39   :  { %v6278_v40 = vsub.f32 %v6260_v28, %v2101_v38 }
 0xa3a   :  { %v2100_v41 = vpop.xlane.xlu0 %2099 }
 0xa3b   :  { %v2102_v42 = vmul.f32 0.0078125, %v2100_v41  ;;  %v2105_v43 = vmul.f32 %v6278_v40, %v6278_v40 }
 0xa3d   :  { %v6283_v44 = vsub.f32 %v6264_v31, %v2102_v42  ;;  %2107 = vadd.xlane.f32.xlu1 %v2105_v43 }
 0xa3f   :  { %v2106_v45 = vmul.f32 %v6283_v44, %v6283_v44 }
 0xa41   :  { %2109 = vadd.xlane.f32.xlu0 %v2106_v45 }
 0xac6   :  { %v2108_v6 = vpop.xlane.xlu1 %2107 }
 0xac7   :  { %v2111_v7 = vmul.f32 0.0078125, %v2108_v6 }
 0xac9   :  { %v2113_v8 = vadd.f32 1e-05, %v2111_v7 }
 0xaca   :  { %v2110_v56 = vpop.xlane.xlu0 %2109 }
 0xacb   :  { %5535 = vrsqrt.f32 %v2113_v8  ;;  %v2112_v10 = vmul.f32 0.0078125, %v2110_v56 }
 0xacd   :  { %v2114_v9 = vadd.f32 1e-05, %v2112_v10 }
 0xacf   :  { %5537 = vrsqrt.f32 %v2114_v9 }
 0xad8   :  { %v5536_v11 = vpop.eup %5535 }
 0xad9   :  { %v2117_v13 = vmul.f32 %v5536_v11, %v6278_v40 }
 0xadb   :  { %v2125_v15 = vmul.f32 %v4450_v12, %v2117_v13 }
 0xadc   :  { %v5538_v16 = vpop.eup %5537 }
 0xadd   :  { %v2118_v17 = vmul.f32 %v5538_v16, %v6283_v44  ;;  %v2133_v18 = vadd.f32 %v4451_v14, %v2125_v15 }
 0xadf   :  { %v2126_v19 = vmul.f32 %v4450_v12, %v2118_v17 }
 0xae1   :  { %v2134_v20 = vadd.f32 %v4451_v14, %v2126_v19 }
 0xae3   :  { %v2135_v21 = vpack.c.bf16 %v2134_v20, %v2133_v18 }
 0xae5   :  { %2330 = vmatmul.mubr.bf16.vlgmr.msra.gmra.mxu1 %v2135_v21  ;;  %5076 = vmatmul.mubr.bf16.vlgmr.msra.gmra.mxu0 %v2135_v21 }
 0xae6   :  { %5081 = vmatprep.mubr.msk.bf16.mxu1 %vm5583_vm0, %v5581_v3  ;;  %5105 = vmatprep.mubr.msk.bf16.mxu0 %vm5583_vm0, %v5581_v3 }
 0xba5   :  { %v2331_v22 = vpop.f32.mrf.mxu1  ;;  %v2374_v23 = vpop.f32.mrf.mxu0 }
 0xba6   :  { %v6374_v0 = vpack.c.bf16 %v2374_v23, %v2374_v23  ;;  %v2381_v38 = vpack.c.bf16 %v2331_v22, %v2331_v22 }
 0xba7   :  { %v2333_v24 = vpop.f32.mrf.mxu1  ;;  %v5077_v26 = vpop.f32.mrf.mxu0 }
 0xba8   :  { %v2382_v30 = vpack.c.bf16 %v2333_v24, %v2333_v24  ;;  %v2448_v40 = vsel %vm415_vm1, %v6374_v0, 0 }
 0xba9   :  { %v6370_v32 = vpop.f32.mrf.mxu0  ;;  %v2335_v41 = vpop.f32.mrf.mxu1 }
 0xbaa   :  { %v2388_v33 = vsel %vm350_vm2, %v2382_v30, 0  ;;  %v2844_v62 = vpack.c.bf16 %v2335_v41, %v2335_v41 }
 0xbab   :  { %v5078_v58 = vpop.f32.mrf.mxu0  ;;  %5080 = vmatpush3.bf16.xpose.msra.mxu1 %v2388_v33  ;;  %v2337_v42 = vpop.f32.mrf.mxu1 }
 0xbac   :  { %5085 = vmatprep.subr.bf16.mxu1 %v5581_v3  ;;  %v2845_v50 = vpack.c.bf16 %v2337_v42, %v2337_v42 }
 0xbae   :  { %v2851_v5 = vsel %vm350_vm2, %v2845_v50, 0 }
 0xbb2   :  { %5082 = vmatmul.mubr.msk.bf16.vlgmr.msra.gmra.mxu1 %vm350_vm2, %v2381_v38 }
 0xbb3   :  { %5086 = vmatpush3.bf16.msra.mxu1 %v2448_v40  ;;  %5087 = vmatprep.mubr.msk.bf16.mxu1 %vm5583_vm0, %v5581_v3 }
 0xbb4   :  { %5091 = vmatprep.subr.bf16.mxu1 %v5581_v3 }
 0xc72   :  { %v2424_v43 = vpop.f32.mrf.mxu1 }
 0xc73   :  { %v2430_v44 = vmul.f32 0.17677669, %v2424_v43 }
 0xc74   :  { %v5083_v45 = vpop.f32.mrf.mxu1 }
 0xc75   :  { %v2431_v47 = vsel %vm5845_vm3, %v2430_v44, -1e+30 }
 0xc76   :  { %v2427_v48 = vpop.f32.mrf.mxu1  ;;  %v2432_v46 = vsel %vm399_vm4, %v2431_v47, -inf }
 0xc77   :  { %2433 = vmax.xlane.f32.xlu1 %v2432_v46 }
 0xc78   :  { %v5084_v49 = vpop.f32.mrf.mxu1 }
 0xc88   :  { %2494 = vrot.lane.b32.xlu1 %v2382_v30, %s5584_s21 }
 0xc8c   :  { %2607 = vrot.lane.b32.xlu1 %v2382_v30, %s5585_s22 }
 0xc90   :  { %2605 = vrot.lane.b32.xlu1 %v2381_v38, %s5585_s22 }
 0xc94   :  { %2719 = vrot.lane.b32.xlu1 %v2382_v30, %s5586_s24 }
 0xc98   :  { %2957 = vrot.lane.b32.xlu1 %v2845_v50, %s5584_s21 }
 0xc9c   :  { %3070 = vrot.lane.b32.xlu1 %v2845_v50, %s5585_s22 }
 0xca0   :  { %3182 = vrot.lane.b32.xlu1 %v2845_v50, %s5586_s24 }
 0xd00   :  { %v2434_v51 = vpop.xlane.xlu1 %2433 }
 0xd01   :  { %v2435_v52 = vsub.f32 %v2431_v47, %v2434_v51 }
 0xd03   :  { %v2436_v53 = vmul.f32 1.442695, %v2435_v52 }
 0xd04   :  { %v2495_v54 = vpop.permute.xlu1 %2494 }
 0xd05   :  { %5539 = vpow2.f32 %v2436_v53  ;;  %v2500_v9 = vsel %vm350_vm2, %v2495_v54, 0 }
 0xd08   :  { %v2608_v39 = vpop.permute.xlu1 %2607 }
 0xd09   :  { %v2613_v55 = vsel %vm350_vm2, %v2608_v39, 0 }
 0xd0a   :  { %5104 = vmatpush3.bf16.xpose.msra.mxu0 %v2613_v55 }
 0xd0b   :  { %5115 = vmatprep.subr.bf16.mxu0 %v5581_v3 }
 0xd0c   :  { %v2606_v57 = vpop.permute.xlu1 %2605 }
 0xd10   :  { %v2720_v59 = vpop.permute.xlu1 %2719 }
 0xd11   :  { %v2725_v60 = vsel %vm350_vm2, %v2720_v59, 0  ;;  %5106 = vmatmul.mubr.msk.bf16.vlgmr.msra.gmra.mxu0 %vm350_vm2, %v2606_v57 }
 0xd12   :  { %v5540_v61 = vpop.eup %5539  ;;  %5116 = vmatpush3.bf16.xpose.msra.mxu0 %v2725_v60  ;;  %5117 = vmatprep.mubr.msk.bf16.mxu0 %vm5583_vm0, %v5581_v3 }
 0xd13   :  { %v2438_v63 = vsel %vm399_vm4, %v5540_v61, 0.0  ;;  %5127 = vmatprep.subr.bf16.mxu0 %v5581_v3 }
 0xd14   :  { %2439 = vadd.xlane.f32.xlu0 %v2438_v63  ;;  %v2958_v7 = vpop.permute.xlu1 %2957 }
 0xd15   :  { %v2963_v56 = vsel %vm350_vm2, %v2958_v7, 0 }
 0xd18   :  { %v3071_v11 = vpop.permute.xlu1 %3070 }
 0xd19   :  { %v3076_v13 = vsel %vm350_vm2, %v3071_v11, 0 }
 0xd1c   :  { %v3183_v14 = vpop.permute.xlu1 %3182 }
 0xd1d   :  { %v3188_v16 = vsel %vm350_vm2, %v3183_v14, 0 }
 0xd2a   :  { %2491 = vrot.lane.b32.xlu0 %v2381_v38, %s5584_s21 }
 0xd2e   :  { %2717 = vrot.lane.b32.xlu0 %v2381_v38, %s5586_s24 }
 0xd32   :  { %2954 = vrot.lane.b32.xlu0 %v2844_v62, %s5584_s21 }
 0xd36   :  { %3068 = vrot.lane.b32.xlu0 %v2844_v62, %s5585_s22 }
 0xd3a   :  { %3180 = vrot.lane.b32.xlu0 %v2844_v62, %s5586_s24 }
 0xd9d   :  { %v2440_v1 = vpop.xlane.xlu0 %2439 }
 0xd9e   :  { %5541 = vrcp.f32 %v2440_v1 }
 0xda1   :  { %v2492_v2 = vpop.permute.xlu0 %2491 }
 0xda5   :  { %v2718_v4 = vpop.permute.xlu0 %2717 }
 0xda6   :  { %5118 = vmatmul.mubr.msk.bf16.vlgmr.msra.gmra.mxu0 %vm350_vm2, %v2718_v4 }
 0xda7   :  { %5128 = vmatpush3.bf16.xpose.msra.mxu0 %v2851_v5  ;;  %5129 = vmatprep.mubr.msk.bf16.mxu0 %vm5583_vm0, %v5581_v3 }
 0xda8   :  { %5139 = vmatprep.subr.bf16.mxu0 %v5581_v3 }
 0xda9   :  { %v2955_v12 = vpop.permute.xlu0 %2954 }
 0xdab   :  { %v5542_v6 = vpop.eup %5541 }
 0xdac   :  { %v2442_v8 = vmul.f32 %v5542_v6, %v5540_v61 }
 0xdad   :  { %v3069_v15 = vpop.permute.xlu0 %3068 }
 0xdae   :  { %5130 = vmatmul.mubr.msk.bf16.vlgmr.msra.gmra.mxu0 %vm350_vm2, %v2844_v62  ;;  %v2443_v10 = vpack.c.bf16 %v2442_v8, %v2442_v8 }
 0xdaf   :  { %5140 = vmatpush3.bf16.xpose.msra.mxu0 %v2963_v56  ;;  %5141 = vmatprep.mubr.msk.bf16.mxu0 %vm5583_vm0, %v5581_v3 }
 0xdb0   :  { %5088 = vmatmul.mubr.msk.bf16.vlgmr.msra.gmra.mxu1 %vm399_vm4, %v2443_v10  ;;  %5151 = vmatprep.subr.bf16.mxu0 %v5581_v3 }
 0xdb1   :  { %5092 = vmatpush3.bf16.xpose.msra.mxu1 %v2500_v9  ;;  %5093 = vmatprep.mubr.msk.bf16.mxu1 %vm5583_vm0, %v5581_v3  ;;  %v3181_v17 = vpop.permute.xlu0 %3180 }
 0xdb2   :  { %5097 = vmatprep.subr.bf16.mxu1 %v5581_v3 }
 0xdb6   :  { %5142 = vmatmul.mubr.msk.bf16.vlgmr.msra.gmra.mxu0 %vm350_vm2, %v2955_v12 }
 0xdb7   :  { %5152 = vmatpush3.bf16.xpose.msra.mxu0 %v3076_v13  ;;  %5153 = vmatprep.mubr.msk.bf16.mxu0 %vm5583_vm0, %v5581_v3 }
 0xdb8   :  { %5094 = vmatmul.mubr.msk.bf16.vlgmr.msra.gmra.mxu1 %vm350_vm2, %v2492_v2  ;;  %5163 = vmatprep.subr.bf16.mxu0 %v5581_v3 }
 0xdb9   :  { %5099 = vmatprep.mubr.msk.bf16.mxu1 %vm5583_vm0, %v5581_v3 }
 0xdbe   :  { %5154 = vmatmul.mubr.msk.bf16.vlgmr.msra.gmra.mxu0 %vm350_vm2, %v3069_v15 }
 0xdbf   :  { %5164 = vmatpush3.bf16.xpose.msra.mxu0 %v3188_v16  ;;  %5165 = vmatprep.mubr.msk.bf16.mxu0 %vm5583_vm0, %v5581_v3 }
 0xdc0   :  { %5175 = vmatprep.subr.bf16.mxu0 %v5581_v3 }
 0xdc6   :  { %5166 = vmatmul.mubr.msk.bf16.vlgmr.msra.gmra.mxu0 %vm350_vm2, %v3181_v17 }
 0xdc7   :  { %5191 = vmatprep.mubr.msk.bf16.mxu0 %vm5583_vm0, %v5581_v3 }
 0xdd1   :  { %v2649_v18 = vpop.f32.mrf.mxu0 }
 0xdd2   :  { %v2655_v19 = vmul.f32 0.17677669, %v2649_v18 }
 0xdd3   :  { %v5107_v20 = vpop.f32.mrf.mxu0 }
 0xdd4   :  { %v2656_v21 = vsel %vm5845_vm3, %v2655_v19, -1e+30 }
 0xdd5   :  { %v2652_v22 = vpop.f32.mrf.mxu0  ;;  %v2657_v23 = vsel %vm399_vm4, %v2656_v21, -inf }
 0xdd6   :  { %2658 = vmax.xlane.f32.xlu0 %v2657_v23 }
 0xdd7   :  { %v5108_v24 = vpop.f32.mrf.mxu0 }
 0xe5f   :  { %v2659_v50 = vpop.xlane.xlu0 %2658 }
 0xe60   :  { %v2660_v53 = vsub.f32 %v2656_v21, %v2659_v50 }
 0xe62   :  { %v2661_v61 = vmul.f32 1.442695, %v2660_v53 }
 0xe64   :  { %5543 = vpow2.f32 %v2661_v61 }
 0xe66   :  { %v2761_v26 = vpop.f32.mrf.mxu0 }
 0xe67   :  { %v2767_v30 = vmul.f32 0.17677669, %v2761_v26 }
 0xe68   :  { %v5119_v33 = vpop.f32.mrf.mxu0 }
 0xe69   :  { %v2768_v58 = vsel %vm5845_vm3, %v2767_v30, -1e+30 }
 0xe6a   :  { %v2764_v38 = vpop.f32.mrf.mxu0  ;;  %v2769_v40 = vsel %vm399_vm4, %v2768_v58, -inf }
 0xe6b   :  { %2770 = vmax.xlane.f32.xlu0 %v2769_v40 }
 0xe6c   :  { %v5120_v41 = vpop.f32.mrf.mxu0 }
 0xe6e   :  { %v2887_v42 = vpop.f32.mrf.mxu0 }
 0xe6f   :  { %v2893_v43 = vmul.f32 0.17677669, %v2887_v42 }
 0xe70   :  { %v6442_v44 = vpop.f32.mrf.mxu1  ;;  %v5131_v45 = vpop.f32.mrf.mxu0 }
 0xe71   :  { %v2894_v47 = vsel %vm5845_vm3, %v2893_v43, -1e+30  ;;  %v6459_v21 = vpop.eup %5543 }
 0xe72   :  { %v5089_v48 = vpop.f32.mrf.mxu1  ;;  %v2890_v46 = vpop.f32.mrf.mxu0  ;;  %v2895_v49 = vsel %vm399_vm4, %v2894_v47, -inf  ;;  %v2663_v23 = vsel %vm399_vm4, %v6459_v21, 0.0 }
 0xe73   :  { %2896 = vmax.xlane.f32.xlu0 %v2895_v49 }
 0xe74   :  { %v2487_v51 = vpop.f32.mrf.mxu1  ;;  %v5132_v52 = vpop.f32.mrf.mxu0 }
 0xe76   :  { %v5090_v54 = vpop.f32.mrf.mxu1  ;;  %v2999_v39 = vpop.f32.mrf.mxu0 }
 0xe77   :  { %v3005_v59 = vmul.f32 0.17677669, %v2999_v39 }
 0xe78   :  { %v2536_v55 = vpop.f32.mrf.mxu1  ;;  %v5143_v57 = vpop.f32.mrf.mxu0 }
 0xe79   :  { %v2542_v60 = vmul.f32 0.17677669, %v2536_v55  ;;  %v3006_v6 = vsel %vm5845_vm3, %v3005_v59, -1e+30 }
 0xe7a   :  { %v5095_v63 = vpop.f32.mrf.mxu1  ;;  %v3002_v62 = vpop.f32.mrf.mxu0  ;;  %v3007_v9 = vsel %vm399_vm4, %v3006_v6, -inf }
 0xe7b   :  { %v2543_v1 = vsel %vm5845_vm3, %v2542_v60, -1e+30  ;;  %v2846_v62 = vpack.c.bf16 %v6370_v32, %v6370_v32 }
 0xe7c   :  { %v2539_v2 = vpop.f32.mrf.mxu1  ;;  %v5144_v4 = vpop.f32.mrf.mxu0  ;;  %v2544_v5 = vsel %vm399_vm4, %v2543_v1, -inf }
 0xe7d   :  { %2545 = vmax.xlane.f32.xlu1 %v2544_v5 }
 0xe7e   :  { %v5096_v7 = vpop.f32.mrf.mxu1  ;;  %v3112_v8 = vpop.f32.mrf.mxu0 }
 0xe7f   :  { %v3118_v56 = vmul.f32 0.17677669, %v3112_v8 }
 0xe80   :  { %v5155_v10 = vpop.f32.mrf.mxu0 }
 0xe81   :  { %3008 = vmax.xlane.f32.xlu1 %v3007_v9  ;;  %v3119_v11 = vsel %vm5845_vm3, %v3118_v56, -1e+30 }
 0xe82   :  { %v3115_v12 = vpop.f32.mrf.mxu0  ;;  %v3120_v13 = vsel %vm399_vm4, %v3119_v11, -inf }
 0xe83   :  { %3121 = vmax.xlane.f32.xlu0 %v3120_v13 }
 0xe84   :  { %v5156_v14 = vpop.f32.mrf.mxu0 }
 0xe86   :  { %v3224_v15 = vpop.f32.mrf.mxu0 }
 0xe87   :  { %v3230_v16 = vmul.f32 0.17677669, %v3224_v15 }
 0xe88   :  { %v5167_v17 = vpop.f32.mrf.mxu0 }
 0xe89   :  { %v3231_v18 = vsel %vm5845_vm3, %v3230_v16, -1e+30 }
 0xe8a   :  { %v3227_v19 = vpop.f32.mrf.mxu0  ;;  %v3232_v20 = vsel %vm399_vm4, %v3231_v18, -inf }
 0xe8b   :  { %3233 = vmax.xlane.f32.xlu1 %v3232_v20 }
 0xe8c   :  { %v5168_v22 = vpop.f32.mrf.mxu0 }
 0xe8f   :  { %2664 = vadd.xlane.f32.xlu1 %v2663_v23 }
 0xef4   :  { %v2771_v24 = vpop.xlane.xlu0 %2770 }
 0xef5   :  { %v2772_v26 = vsub.f32 %v2768_v58, %v2771_v24 }
 0xef7   :  { %v2773_v30 = vmul.f32 1.442695, %v2772_v26 }
 0xef9   :  { %5545 = vpow2.f32 %v2773_v30 }
 0xefc   :  { %v2897_v33 = vpop.xlane.xlu0 %2896 }
 0xefd   :  { %v2898_v38 = vsub.f32 %v2894_v47, %v2897_v33 }
 0xeff   :  { %v2899_v40 = vmul.f32 1.442695, %v2898_v38 }
 0xf01   :  { %5547 = vpow2.f32 %v2899_v40 }
 0xf06   :  { %v6463_v29 = vpop.eup %5545  ;;  %v2546_v41 = vpop.xlane.xlu1 %2545 }
 0xf07   :  { %v2775_v42 = vsel %vm399_vm4, %v6463_v29, 0.0  ;;  %v2547_v50 = vsub.f32 %v2543_v1, %v2546_v41 }
 0xf08   :  { %2776 = vadd.xlane.f32.xlu0 %v2775_v42 }
 0xf09   :  { %v2548_v51 = vmul.f32 1.442695, %v2547_v50 }
 0xf0a   :  { %v3009_v43 = vpop.xlane.xlu1 %3008 }
 0xf0b   :  { %v3010_v45 = vsub.f32 %v3006_v6, %v3009_v43 }
 0xf0c   :  { %v3122_v52 = vpop.xlane.xlu0 %3121 }
 0xf0d   :  { %v3011_v48 = vmul.f32 1.442695, %v3010_v45  ;;  %v3123_v54 = vsub.f32 %v3119_v11, %v3122_v52  ;;  %v5383_v52 = vld [vmem:[%s6887_s4 + $0x78] sm:$0xff]  }
 0xf0e   :  { %v6467_v46 = vpop.eup %5547  ;;  %5176 = vmatpush3.bf16.msra.mxu0 %v5383_v52  ;;  %v4541_v52 = vld [vmem:[%s6888_s5 + $0x1] ss:$0 sm:$0xff] }
 0xf0f   :  { %5549 = vpow2.f32 %v3011_v48  ;;  %v2901_v58 = vsel %vm399_vm4, %v6467_v46, 0.0  ;;  %v3124_v55 = vmul.f32 1.442695, %v3123_v54  ;;  %5177 = vmatprep.subr.bf16.mxu0 %v5581_v3  ;;  %v5385_v54 = vld [vmem:[%s6887_s4 + $0x68] sm:$0xff]  }
 0xf10   :  { %2902 = vadd.xlane.f32.xlu1 %v2901_v58  ;;  %5551 = vpow2.f32 %v2548_v51 }
 0xf11   :  { %5553 = vpow2.f32 %v3124_v55 }
 0xf14   :  { %v3234_v60 = vpop.xlane.xlu1 %3233 }
 0xf15   :  { %v3235_v61 = vsub.f32 %v3231_v18, %v3234_v60 }
 0xf17   :  { %v3236_v63 = vmul.f32 1.442695, %v3235_v61 }
 0xf18   :  { %v2665_v6 = vpop.xlane.xlu1 %2664 }
 0xf19   :  { %5555 = vpow2.f32 %v3236_v63 }
 0xf1c   :  { %v6471_v47 = vpop.eup %5549 }
 0xf1d   :  { %v3013_v49 = vsel %vm399_vm4, %v6471_v47, 0.0  ;;  %v5552_v53 = vpop.eup %5551 }
 0xf1e   :  { %2557 = vrot.lane.b32.xlu0 %v6374_v0, %s5584_s21  ;;  %3014 = vadd.xlane.f32.xlu1 %v3013_v49  ;;  %v2550_v39 = vsel %vm399_vm4, %v5552_v53, 0.0  ;;  %v6480_v57 = vpop.eup %5553 }
 0xf1f   :  { %v3126_v59 = vsel %vm399_vm4, %v6480_v57, 0.0 }
 0xf26   :  { %v6490_v1 = vpop.eup %5555 }
 0xf27   :  { %v3238_v2 = vsel %vm399_vm4, %v6490_v1, 0.0 }
 0xf2f   :  { %2669 = vrot.lane.b32.xlu1 %v6374_v0, %s5585_s22 }
 0xf3d   :  { %2551 = vadd.xlane.f32.xlu0 %v2550_v39 }
 0xf53   :  { %2781 = vrot.lane.b32.xlu0 %v6374_v0, %s5586_s24  ;;  %3127 = vadd.xlane.f32.xlu1 %v3126_v59 }
 0xf64   :  { %3132 = vrot.lane.b32.xlu1 %v2846_v62, %s5585_s22 }
 0xf68   :  { %3244 = vrot.lane.b32.xlu1 %v2846_v62, %s5586_s24 }
 0xf72   :  { %3239 = vadd.xlane.f32.xlu0 %v3238_v2 }
 0xf88   :  { %3020 = vrot.lane.b32.xlu0 %v2846_v62, %s5584_s21 }
 0xf91   :  { %v2777_v0 = vpop.xlane.xlu0 %2776 }
 0xf95   :  { %v2558_v4 = vpop.permute.xlu0 %2557 }
 0xf96   :  { %v2563_v5 = vsel %vm415_vm1, %v2558_v4, 0 }
 0xf97   :  { %5098 = vmatpush3.bf16.msra.mxu1 %v2563_v5 }
 0xf98   :  { %5109 = vmatprep.subr.bf16.mxu1 %v5581_v3 }
 0xf99   :  { %v2903_v7 = vpop.xlane.xlu1 %2902 }
 0xfa7   :  { %v3015_v8 = vpop.xlane.xlu1 %3014 }
 0xfab   :  { %v2670_v9 = vpop.permute.xlu1 %2669 }
 0xfac   :  { %v2675_v13 = vsel %vm415_vm1, %v2670_v9, 0  ;;  %v5388_v9 = vld [vmem:[%s6887_s4 + $0x50] sm:$0xff]  }
 0xfc6   :  { %v2552_v32 = vpop.xlane.xlu0 %2551 }
 0xfc7   :  { %5557 = vrcp.f32 %v2552_v32 }
 0xfc8   :  { %5559 = vrcp.f32 %v2665_v6 }
 0xfc9   :  { %5561 = vrcp.f32 %v2777_v0 }
 0xfca   :  { %5563 = vrcp.f32 %v2903_v7  ;;  %v2782_v15 = vpop.permute.xlu0 %2781 }
 0xfcb   :  { %v2787_v18 = vsel %vm415_vm1, %v2782_v15, 0  ;;  %5565 = vrcp.f32 %v3015_v8  ;;  %v5386_v8 = vld [vmem:[%s6887_s4 + $0x60] sm:$0xff]  }
 0xfd4   :  { %v5558_v56 = vpop.eup %5557 }
 0xfd5   :  { %v2554_v10 = vmul.f32 %v5558_v56, %v5552_v53  ;;  %v5560_v12 = vpop.eup %5559  ;;  %v5384_v53 = vld [vmem:[%s6887_s4 + $0x70] sm:$0xff]   ;;  %v5387_v56 = vld [vmem:[%s6887_s4 + $0x58] sm:$0xff]  }
 0xfd6   :  { %v2667_v14 = vmul.f32 %v5560_v12, %v6459_v21  ;;  %v5562_v17 = vpop.eup %5561  ;;  %v2911_v21 = vsel %vm415_vm1, %v2846_v62, 0  ;;  %5178 = vmatpush3.bf16.msra.mxu0 %v5384_v53 }
 0xfd7   :  { %v2555_v11 = vpack.c.bf16 %v2554_v10, %v2554_v10  ;;  %v2779_v19 = vmul.f32 %v5562_v17, %v6463_v29  ;;  %v5564_v22 = vpop.eup %5563  ;;  %5179 = vmatprep.subr.bf16.mxu0 %v5581_v3  ;;  %v5390_v17 = vld [vmem:[%s6887_s4 + $0x40] sm:$0xff]  }
 0xfd8   :  { %v2668_v16 = vpack.c.bf16 %v2667_v14, %v2667_v14  ;;  %v2905_v23 = vmul.f32 %v5564_v22, %v6467_v46  ;;  %v5566_v30 = vpop.eup %5565 }
 0xfd9   :  { %5100 = vmatmul.mubr.msk.bf16.vlgmr.msra.gmra.mxu1 %vm399_vm4, %v2555_v11  ;;  %v2780_v20 = vpack.c.bf16 %v2779_v19, %v2779_v19  ;;  %v3017_v38 = vmul.f32 %v5566_v30, %v6471_v47 }
 0xfda   :  { %5110 = vmatpush3.bf16.msra.mxu1 %v2675_v13  ;;  %5111 = vmatprep.mubr.msk.bf16.mxu1 %vm5583_vm0, %v5581_v3  ;;  %v2906_v24 = vpack.c.bf16 %v2905_v23, %v2905_v23  ;;  %v5389_v13 = vld [vmem:[%s6887_s4 + $0x48] sm:$0xff]  }
 0xfdb   :  { %5121 = vmatprep.subr.bf16.mxu1 %v5581_v3  ;;  %v3018_v42 = vpack.c.bf16 %v3017_v38, %v3017_v38  ;;  %5180 = vmatpush3.bf16.msra.mxu0 %v5385_v54 }
 0xfdc   :  { %v3128_v26 = vpop.xlane.xlu1 %3127  ;;  %5181 = vmatprep.subr.bf16.mxu0 %v5581_v3 }
 0xfdd   :  { %5567 = vrcp.f32 %v3128_v26 }
 0xfdf   :  { %5182 = vmatpush3.bf16.msra.mxu0 %v5386_v8  ;;  %v5402_v8 = vld [vmem:[%s6889_s8 + $0x1cc] ss:$16 sps:$4 sm:$0xff]  }
 0xfe0   :  { %v3133_v41 = vpop.permute.xlu1 %3132  ;;  %5183 = vmatprep.subr.bf16.mxu0 %v5581_v3 }
 0xfe1   :  { %5112 = vmatmul.mubr.msk.bf16.vlgmr.msra.gmra.mxu1 %vm399_vm4, %v2668_v16  ;;  %v3138_v45 = vsel %vm415_vm1, %v3133_v41, 0 }
 0xfe2   :  { %5122 = vmatpush3.bf16.msra.mxu1 %v2787_v18  ;;  %5123 = vmatprep.mubr.msk.bf16.mxu1 %vm5583_vm0, %v5581_v3 }
 0xfe3   :  { %5133 = vmatprep.subr.bf16.mxu1 %v5581_v3  ;;  %5184 = vmatpush3.bf16.msra.mxu0 %v5387_v56  ;;  %v5397_v56 = vld [vmem:[%s6889_s8 + $0x1c0] ss:$16 sps:$4 sm:$0xff]  }
 0xfe4   :  { %v3245_v46 = vpop.permute.xlu1 %3244  ;;  %5185 = vmatprep.subr.bf16.mxu0 %v5581_v3 }
 0xfe5   :  { %v3250_v49 = vsel %vm415_vm1, %v3245_v46, 0 }
 0xfe7   :  { %5186 = vmatpush3.bf16.msra.mxu0 %v5388_v9  ;;  %v5405_v9 = vld [vmem:[%s6889_s8 + $0x1a4] ss:$16 sps:$4 sm:$0xff]  }
 0xfe8   :  { %5187 = vmatprep.subr.bf16.mxu0 %v5581_v3 }
 0xfe9   :  { %5124 = vmatmul.mubr.msk.bf16.vlgmr.msra.gmra.mxu1 %vm399_vm4, %v2780_v20 }
 0xfea   :  { %5134 = vmatpush3.bf16.msra.mxu1 %v2911_v21  ;;  %5135 = vmatprep.mubr.msk.bf16.mxu1 %vm5583_vm0, %v5581_v3  ;;  %v5568_v43 = vpop.eup %5567 }
 0xfeb   :  { %5145 = vmatprep.subr.bf16.mxu1 %v5581_v3  ;;  %v3130_v48 = vmul.f32 %v5568_v43, %v6480_v57  ;;  %5188 = vmatpush3.bf16.msra.mxu0 %v5389_v13  ;;  %v5406_v13 = vld [vmem:[%s6889_s8 + $0x1a8] ss:$16 sps:$4 sm:$0xff]  }
 0xfec   :  { %5189 = vmatprep.subr.bf16.mxu0 %v5581_v3 }
 0xfed   :  { %v3131_v58 = vpack.c.bf16 %v3130_v48, %v3130_v48 }
 0xfef   :  { %5190 = vmatpush3.bf16.msra.mxu0 %v5390_v17  ;;  %v5414_v17 = vld [vmem:[%s6889_s8 + $0x18c] ss:$16 sps:$4 sm:$0xff]  }
 0xff1   :  { %5136 = vmatmul.mubr.msk.bf16.vlgmr.msra.gmra.mxu1 %vm399_vm4, %v2906_v24 }
 0xff2   :  { %5147 = vmatprep.mubr.msk.bf16.mxu1 %vm5583_vm0, %v5581_v3 }
 0xffb   :  { %v3240_v33 = vpop.xlane.xlu0 %3239 }
 0xffc   :  { %5569 = vrcp.f32 %v3240_v33 }
 0xfff   :  { %v3021_v40 = vpop.permute.xlu0 %3020 }
0x1000   :  { %v3026_v29 = vsel %vm415_vm1, %v3021_v40, 0 }
0x1001   :  { %5146 = vmatpush3.bf16.msra.mxu1 %v3026_v29 }
0x1002   :  { %5157 = vmatprep.subr.bf16.mxu1 %v5581_v3 }
0x1004   :  { %5148 = vmatmul.mubr.msk.bf16.vlgmr.msra.gmra.mxu1 %vm399_vm4, %v3018_v42 }
0x1005   :  { %5158 = vmatpush3.bf16.msra.mxu1 %v3138_v45  ;;  %5159 = vmatprep.mubr.msk.bf16.mxu1 %vm5583_vm0, %v5581_v3 }
0x1006   :  { %5169 = vmatprep.subr.bf16.mxu1 %v5581_v3 }
0x1009   :  { %v5570_v47 = vpop.eup %5569 }
0x100a   :  { %v3242_v50 = vmul.f32 %v5570_v47, %v6490_v1 }
0x100c   :  { %5160 = vmatmul.mubr.msk.bf16.vlgmr.msra.gmra.mxu1 %vm399_vm4, %v3131_v58  ;;  %v3243_v51 = vpack.c.bf16 %v3242_v50, %v3242_v50 }
0x100d   :  { %5170 = vmatpush3.bf16.msra.mxu1 %v3250_v49  ;;  %5171 = vmatprep.mubr.msk.bf16.mxu1 %vm5583_vm0, %v5581_v3 }
0x1014   :  { %5172 = vmatmul.mubr.msk.bf16.vlgmr.msra.gmra.mxu1 %vm399_vm4, %v3243_v51 }
0x1015   :  { %3715 = vmatprep.mubr.bf16.mxu1 %v5582_v27 }
0x1099   :  { %v2599_v39 = vpop.f32.mrf.mxu1 }
0x109b   :  { %v5101_v55 = vpop.f32.mrf.mxu1 }
0x109d   :  { %v2602_v57 = vpop.f32.mrf.mxu1 }
0x109f   :  { %v5102_v59 = vpop.f32.mrf.mxu1 }
0x10a1   :  { %v2711_v60 = vpop.f32.mrf.mxu1 }
0x10a3   :  { %v5113_v61 = vpop.f32.mrf.mxu1 }
0x10a4   :  { %v5391_v61 = vld [vmem:[%s6889_s8 + $0x1e0] ss:$16 sps:$4 sm:$0xff]  }
0x10a5   :  { %v2714_v63 = vpop.f32.mrf.mxu1 }
0x10a6   :  { %v5393_v63 = vld [vmem:[%s6889_s8 + $0x1e4] ss:$16 sps:$4 sm:$0xff]  }
0x10a7   :  { %v5114_v62 = vpop.f32.mrf.mxu1  ;;  %3683 = vmatprep.subr.bf16.mxu1 %v5393_v63 }
0x10a8   :  { %v5396_v62 = vld [vmem:[%s6889_s8 + $0x1ec] ss:$16 sps:$4 sm:$0xff]   ;;  %3684 = vmatpush1.bf16.msra.mxu1 %v5391_v61 }
0x10a9   :  { %v2823_v1 = vpop.f32.mrf.mxu1  ;;  %3726 = vmatprep.subr.bf16.mxu0 %v5396_v62  ;;  %v5442_v62 = vld [vmem:[%s6890_s10 + $0x1b8] sm:$0xff]  }
0x10ab   :  { %v5125_v2 = vpop.f32.mrf.mxu1 }
0x10ad   :  { %v2826_v0 = vpop.f32.mrf.mxu1 }
0x10af   :  { %v5126_v4 = vpop.f32.mrf.mxu1 }
0x10b1   :  { %v2947_v5 = vpop.f32.mrf.mxu1 }
0x10b3   :  { %v5137_v32 = vpop.f32.mrf.mxu1 }
0x10b5   :  { %v2950_v6 = vpop.f32.mrf.mxu1 }
0x10b7   :  { %v5138_v7 = vpop.f32.mrf.mxu1 }
0x10b8   :  { %v5399_v7 = vld [vmem:[%s6889_s8 + $0x1c4] ss:$16 sps:$4 sm:$0xff]  }
0x10b9   :  { %3685 = vmatprep.subr.bf16.mxu1 %v5399_v7  ;;  %v5450_v7 = vld [vmem:[%s6890_s10 + $0x1a8] sm:$0xff]  }
0x10ba   :  { %3686 = vmatpush1.bf16.msra.mxu1 %v5397_v56  ;;  %v5452_v56 = vld [vmem:[%s6890_s10 + $0x1e0] sm:$0xff]  }
0x10bb   :  { %3687 = vmatprep.subr.bf16.mxu1 %v5405_v9  ;;  %v5454_v9 = vld [vmem:[%s6890_s10 + $0x1a0] sm:$0xff]  }
0x10c4   :  { %v3062_v10 = vpop.f32.mrf.mxu1 }
0x10c5   :  { %v5216_v11 = vpack.i.bf16 %v3062_v10, %v2599_v39  ;;  %v5400_v10 = vld [vmem:[%s6889_s8 + $0x1c8] ss:$16 sps:$4 sm:$0xff]  }
0x10c6   :  { %v5149_v12 = vpop.f32.mrf.mxu1 }
0x10c7   :  { %5217 = vrot.lane.b32.xlu1 %v5216_v11, %s5586_s24  ;;  %v5408_v11 = vld [vmem:[%s6889_s8 + $0x1ac] ss:$16 sps:$4 sm:$0xff]   ;;  %v5403_v12 = vld [vmem:[%s6889_s8 + $0x1a0] ss:$16 sps:$4 sm:$0xff]  }
0x10c8   :  { %v3065_v14 = vpop.f32.mrf.mxu1  ;;  %3688 = vmatpush1.bf16.msra.mxu1 %v5403_v12  ;;  %v5456_v12 = vld [vmem:[%s6890_s10 + $0x1d8] sm:$0xff]  }
0x10c9   :  { %v5411_v14 = vld [vmem:[%s6889_s8 + $0x184] ss:$16 sps:$4 sm:$0xff]  }
0x10ca   :  { %v5150_v15 = vpop.f32.mrf.mxu1  ;;  %3689 = vmatprep.subr.bf16.mxu1 %v5411_v14  ;;  %v5458_v14 = vld [vmem:[%s6890_s10 + $0x198] sm:$0xff]  }
0x10cb   :  { %v5409_v15 = vld [vmem:[%s6889_s8 + $0x180] ss:$16 sps:$4 sm:$0xff]  }
0x10cc   :  { %v3174_v16 = vpop.f32.mrf.mxu1  ;;  %3690 = vmatpush1.bf16.msra.mxu1 %v5409_v15  ;;  %v5459_v15 = vld [vmem:[%s6890_s10 + $0x150] sm:$0xff]  }
0x10cd   :  { %v5221_v18 = vpack.i.bf16 %v3174_v16, %v2711_v60  ;;  %v5412_v16 = vld [vmem:[%s6889_s8 + $0x188] ss:$16 sps:$4 sm:$0xff]  }
0x10ce   :  { %v5161_v19 = vpop.f32.mrf.mxu1 }
0x10cf   :  { %5222 = vrot.lane.b32.xlu0 %v5221_v18, %s5585_s22  ;;  %v5417_v18 = vld [vmem:[%s6889_s8 + $0x164] ss:$16 sps:$4 sm:$0xff]   ;;  %v5420_v19 = vld [vmem:[%s6889_s8 + $0x16c] ss:$16 sps:$4 sm:$0xff]  }
0x10d0   :  { %v3177_v20 = vpop.f32.mrf.mxu1  ;;  %3691 = vmatprep.subr.bf16.mxu1 %v5417_v18  ;;  %v5462_v18 = vld [vmem:[%s6890_s10 + $0x190] sm:$0xff]  }
0x10d1   :  { %v5415_v20 = vld [vmem:[%s6889_s8 + $0x160] ss:$16 sps:$4 sm:$0xff]  }
0x10d2   :  { %v5162_v22 = vpop.f32.mrf.mxu1  ;;  %3692 = vmatpush1.bf16.msra.mxu1 %v5415_v20  ;;  %v5464_v20 = vld [vmem:[%s6890_s10 + $0x1c8] sm:$0xff]  }
0x10d3   :  { %v5418_v22 = vld [vmem:[%s6889_s8 + $0x168] ss:$16 sps:$4 sm:$0xff]  }
0x10d4   :  { %v3286_v21 = vpop.f32.mrf.mxu1 }
0x10d5   :  { %v5226_v23 = vpack.i.bf16 %v3286_v21, %v2823_v1  ;;  %v5423_v21 = vld [vmem:[%s6889_s8 + $0x144] ss:$16 sps:$4 sm:$0xff]  }
0x10d6   :  { %v5173_v24 = vpop.f32.mrf.mxu1  ;;  %3693 = vmatprep.subr.bf16.mxu1 %v5423_v21  ;;  %v5466_v21 = vld [vmem:[%s6890_s10 + $0x188] sm:$0xff]  }
0x10d7   :  { %5227 = vrot.lane.b32.xlu1 %v5226_v23, %s5584_s21  ;;  %v5426_v23 = vld [vmem:[%s6889_s8 + $0x14c] ss:$16 sps:$4 sm:$0xff]   ;;  %v5421_v24 = vld [vmem:[%s6889_s8 + $0x140] ss:$16 sps:$4 sm:$0xff]  }
0x10d8   :  { %v3289_v26 = vpop.f32.mrf.mxu1  ;;  %3694 = vmatpush1.bf16.msra.mxu1 %v5421_v24  ;;  %v5468_v24 = vld [vmem:[%s6890_s10 + $0x1c0] sm:$0xff]  }
0x10d9   :  { %v5424_v26 = vld [vmem:[%s6889_s8 + $0x148] ss:$16 sps:$4 sm:$0xff]  }
0x10da   :  { %v5174_v30 = vpop.f32.mrf.mxu1 }
0x10db   :  { %v5429_v30 = vld [vmem:[%s6889_s8 + $0x124] ss:$16 sps:$4 sm:$0xff]  }
0x10dc   :  { %3695 = vmatprep.subr.bf16.mxu1 %v5429_v30  ;;  %v5470_v30 = vld [vmem:[%s6890_s10 + $0x180] sm:$0xff]  }
0x1139   :  { %v5218_v3 = vpop.permute.xlu1 %5217 }
0x113a   :  { %v5220_v38 = vunpack.i.h.bf16 %v5218_v3  ;;  %v5219_v40 = vunpack.i.l.bf16 %v5218_v3  ;;  %v5432_v3 = vld [vmem:[%s6889_s8 + $0x12c] ss:$16 sps:$4 sm:$0xff]  }
0x113c   :  { %v3304_v43 = vsel %vm350_vm2, %v2947_v5, %v5220_v38  ;;  %v2841_v45 = vsel %vm350_vm2, %v6442_v44, %v5219_v40  ;;  %v5430_v38 = vld [vmem:[%s6889_s8 + $0x128] ss:$16 sps:$4 sm:$0xff]   ;;  %v5435_v40 = vld [vmem:[%s6889_s8 + $0x104] ss:$16 sps:$4 sm:$0xff]  }
0x1141   :  { %v5223_v33 = vpop.permute.xlu0 %5222 }
0x1142   :  { %v5225_v29 = vunpack.i.h.bf16 %v5223_v33  ;;  %v5224_v41 = vunpack.i.l.bf16 %v5223_v33  ;;  %v5427_v33 = vld [vmem:[%s6889_s8 + $0x120] ss:$16 sps:$4 sm:$0xff]  }
0x1143   :  { %3696 = vmatpush1.bf16.msra.mxu1 %v5427_v33 }
0x1144   :  { %v3305_v58 = vsel %vm811_vm5, %v3304_v43, %v5225_v29  ;;  %v2842_v47 = vsel %vm811_vm5, %v2841_v45, %v5224_v41  ;;  %v5438_v29 = vld [vmem:[%s6889_s8 + $0x10c] ss:$16 sps:$4 sm:$0xff]   ;;  %v5433_v41 = vld [vmem:[%s6889_s8 + $0x100] ss:$16 sps:$4 sm:$0xff]   ;;  %3697 = vmatprep.subr.bf16.mxu1 %v5435_v40 }
0x1145   :  { %v5439_v43 = vld [vmem:[%s6890_s10 + $0x178] sm:$0xff]  }
0x1146   :  { %v5440_v45 = vld [vmem:[%s6890_s10 + $0x1f8] sm:$0xff]  }
0x1147   :  { %3698 = vmatpush1.bf16.msra.mxu1 %v5433_v41 }
0x1148   :  { %4879 = vmatprep.subr.bf16.mxu1 %v5439_v43 }
0x1149   :  { %v5228_v42 = vpop.permute.xlu1 %5227 }
0x114a   :  { %v5230_v48 = vunpack.i.h.bf16 %v5228_v42  ;;  %v5229_v46 = vunpack.i.l.bf16 %v5228_v42  ;;  %v5436_v42 = vld [vmem:[%s6889_s8 + $0x108] ss:$16 sps:$4 sm:$0xff]  }
0x114c   :  { %v3306_v49 = vsel %vm813_vm6, %v3305_v58, %v5230_v48  ;;  %v2843_v50 = vsel %vm813_vm6, %v2842_v47, %v5229_v46 }
0x114d   :  { %v3307_v51 = vpack.c.bf16 %v3306_v49, %v2843_v50 }
0x114f   :  { %5192 = vmatmul.mubr.bf16.vlgmr.msra.gmra.mxu0 %v3307_v51 }
0x1150   :  { %3758 = vmatprep.mubr.bf16.mxu0 %v5582_v27 }
0x120f   :  { %v3415_v53 = vpop.f32.mrf.mxu0 }
0x1210   :  { %v3416_v44 = vadd.f32 %v4541_v52, %v3415_v53  ;;  %v4552_v53 = vld [vmem:[%s6891_s6 + $0x1] ss:$0 sm:$0xff] }
0x1211   :  { %v5193_v54 = vpop.f32.mrf.mxu0 }
0x1212   :  { %v6580_v39 = vadd.f32 %v3416_v44, %v6260_v28  ;;  %v5394_v28 = vld [vmem:[%s6889_s8 + $0x1e8] ss:$16 sps:$4 sm:$0xff]  }
0x1213   :  { %v3418_v55 = vpop.f32.mrf.mxu0  ;;  %3727 = vmatpush1.bf16.msra.mxu0 %v5394_v28  ;;  %v5441_v28 = vld [vmem:[%s6890_s10 + $0x138] sm:$0xff]  }
0x1214   :  { %v3419_v57 = vadd.f32 %v4541_v52, %v3418_v55  ;;  %3428 = vadd.xlane.f32.xlu0 %v6580_v39  ;;  %3728 = vmatprep.subr.bf16.mxu0 %v5402_v8  ;;  %v5451_v8 = vld [vmem:[%s6890_s10 + $0x160] sm:$0xff]  }
0x1215   :  { %v5194_v59 = vpop.f32.mrf.mxu0 }
0x1216   :  { %v6584_v60 = vadd.f32 %v3419_v57, %v6264_v31  ;;  %v4553_v57 = vld [vmem:[%s6892_s7 + $0x1] ss:$0 sm:$0xff] }
0x1217   :  { %3729 = vmatpush1.bf16.msra.mxu0 %v5400_v10  ;;  %v5453_v10 = vld [vmem:[%s6890_s10 + $0x120] sm:$0xff]  }
0x1218   :  { %3430 = vadd.xlane.f32.xlu1 %v6584_v60  ;;  %3730 = vmatprep.subr.bf16.mxu0 %v5408_v11  ;;  %v5455_v11 = vld [vmem:[%s6890_s10 + $0x158] sm:$0xff]  }
0x121b   :  { %3731 = vmatpush1.bf16.msra.mxu0 %v5406_v13  ;;  %v5457_v13 = vld [vmem:[%s6890_s10 + $0x118] sm:$0xff]  }
0x121c   :  { %3732 = vmatprep.subr.bf16.mxu0 %v5414_v17  ;;  %v5461_v17 = vld [vmem:[%s6890_s10 + $0x110] sm:$0xff]  }
0x121f   :  { %3733 = vmatpush1.bf16.msra.mxu0 %v5412_v16  ;;  %v5460_v16 = vld [vmem:[%s6890_s10 + $0x1d0] sm:$0xff]  }
0x1220   :  { %3734 = vmatprep.subr.bf16.mxu0 %v5420_v19  ;;  %v5463_v19 = vld [vmem:[%s6890_s10 + $0x148] sm:$0xff]  }
0x1223   :  { %3735 = vmatpush1.bf16.msra.mxu0 %v5418_v22  ;;  %v5465_v22 = vld [vmem:[%s6890_s10 + $0x108] sm:$0xff]  }
0x1224   :  { %3736 = vmatprep.subr.bf16.mxu0 %v5426_v23  ;;  %v5467_v23 = vld [vmem:[%s6890_s10 + $0x140] sm:$0xff]  }
0x1227   :  { %3737 = vmatpush1.bf16.msra.mxu0 %v5424_v26  ;;  %v5469_v26 = vld [vmem:[%s6890_s10 + $0x100] sm:$0xff]  }
0x1228   :  { %3738 = vmatprep.subr.bf16.mxu0 %v5432_v3  ;;  %v4586_v3 = vld [vmem:[%s6893_s9 + $0x4] sm:$0xf] }
0x1229   :  { %v3510_v40 = vrot.slane %v4586_v3, %v6237_v34  ;;  %v3506_v41 = vrot.slane %v4586_v3, %v6241_v36 }
0x122b   :  { %3739 = vmatpush1.bf16.msra.mxu0 %v5430_v38 }
0x122c   :  { %3740 = vmatprep.subr.bf16.mxu0 %v5438_v29  ;;  %v3518_v29 = vrot.slane %v4586_v3, %v1482_v35 }
0x122f   :  { %3741 = vmatpush1.bf16.msra.mxu0 %v5436_v42  ;;  %v3514_v42 = vrot.slane %v4586_v3, %v1478_v37  ;;  %v5476_v3 = vld [vmem:[%s6895_s14 + $0x64] ss:$8 sps:$4 sm:$0xff]  }
0x1230   :  { %4901 = vmatprep.subr.bf16.mxu0 %v5440_v45 }
0x129d   :  { %v3429_v31 = vpop.xlane.xlu0 %3428 }
0x129e   :  { %v3432_v1 = vmul.f32 0.0078125, %v3429_v31 }
0x12a0   :  { %v6600_v2 = vsub.f32 %v6580_v39, %v3432_v1  ;;  %v5443_v1 = vld [vmem:[%s6890_s10 + $0x170] sm:$0xff]  }
0x12a1   :  { %v3431_v0 = vpop.xlane.xlu1 %3430 }
0x12a2   :  { %v3433_v4 = vmul.f32 0.0078125, %v3431_v0  ;;  %v3436_v5 = vmul.f32 %v6600_v2, %v6600_v2  ;;  %v5445_v0 = vld [vmem:[%s6890_s10 + $0x130] sm:$0xff]  }
0x12a4   :  { %v6605_v32 = vsub.f32 %v6584_v60, %v3433_v4  ;;  %3438 = vadd.xlane.f32.xlu0 %v3436_v5  ;;  %v5446_v4 = vld [vmem:[%s6890_s10 + $0x1b0] sm:$0xff]   ;;  %v5447_v5 = vld [vmem:[%s6890_s10 + $0x168] sm:$0xff]  }
0x12a6   :  { %v3437_v6 = vmul.f32 %v6605_v32, %v6605_v32 }
0x12a8   :  { %3440 = vadd.xlane.f32.xlu0 %v3437_v6  ;;  %v5449_v6 = vld [vmem:[%s6890_s10 + $0x128] sm:$0xff]  }
0x132d   :  { %v3439_v48 = vpop.xlane.xlu0 %3438 }
0x132e   :  { %v3442_v46 = vmul.f32 0.0078125, %v3439_v48 }
0x1330   :  { %v3444_v58 = vadd.f32 1e-05, %v3442_v46 }
0x1331   :  { %v3441_v47 = vpop.xlane.xlu0 %3440 }
0x1332   :  { %5571 = vrsqrt.f32 %v3444_v58  ;;  %v3443_v49 = vmul.f32 0.0078125, %v3441_v47 }
0x1334   :  { %v3445_v50 = vadd.f32 1e-05, %v3443_v49 }
0x1336   :  { %5573 = vrsqrt.f32 %v3445_v50 }
0x133f   :  { %v5572_v51 = vpop.eup %5571 }
0x1340   :  { %v3448_v52 = vmul.f32 %v5572_v51, %v6600_v2  ;;  %v5444_v2 = vld [vmem:[%s6890_s10 + $0x1f0] sm:$0xff]  }
0x1342   :  { %v3456_v55 = vmul.f32 %v4552_v53, %v3448_v52 }
0x1343   :  { %v5574_v44 = vpop.eup %5573 }
0x1344   :  { %v3449_v54 = vmul.f32 %v5574_v44, %v6605_v32  ;;  %v3464_v61 = vadd.f32 %v4553_v57, %v3456_v55  ;;  %v5448_v32 = vld [vmem:[%s6890_s10 + $0x1e8] sm:$0xff]  }
0x1346   :  { %v3457_v59 = vmul.f32 %v4552_v53, %v3449_v54 }
0x1348   :  { %v3465_v63 = vadd.f32 %v4553_v57, %v3457_v59 }
0x134a   :  { %v3466_v31 = vpack.c.bf16 %v3465_v63, %v3464_v61 }
0x134c   :  { %3716 = vmatmul.mubr.bf16.vlgmr.msra.gmra.mxu1 %v3466_v31  ;;  %3759 = vmatmul.mubr.bf16.vlgmr.msra.gmra.mxu0 %v3466_v31 }
0x134d   :  { %4880 = vmatpush3.bf16.msra.mxu1 %v5441_v28  ;;  %4902 = vmatpush3.bf16.msra.mxu0 %v5442_v62 }
0x134e   :  { %4881 = vmatprep.subr.bf16.mxu1 %v5443_v1  ;;  %4903 = vmatprep.subr.bf16.mxu0 %v5444_v2 }
0x1351   :  { %4882 = vmatpush3.bf16.msra.mxu1 %v5445_v0  ;;  %4904 = vmatpush3.bf16.msra.mxu0 %v5446_v4 }
0x1352   :  { %4883 = vmatprep.subr.bf16.mxu1 %v5447_v5  ;;  %4905 = vmatprep.subr.bf16.mxu0 %v5448_v32  ;;  %v4684_v5 = vld [vmem:[%s6894_s11 + $0x1] ss:$0 sm:$0xff] }
0x1355   :  { %4884 = vmatpush3.bf16.msra.mxu1 %v5449_v6  ;;  %4906 = vmatpush3.bf16.msra.mxu0 %v5450_v7 }
0x1356   :  { %4885 = vmatprep.subr.bf16.mxu1 %v5451_v8  ;;  %4907 = vmatprep.subr.bf16.mxu0 %v5452_v56 }
0x1359   :  { %4886 = vmatpush3.bf16.msra.mxu1 %v5453_v10  ;;  %4908 = vmatpush3.bf16.msra.mxu0 %v5454_v9 }
0x135a   :  { %4887 = vmatprep.subr.bf16.mxu1 %v5455_v11  ;;  %4909 = vmatprep.subr.bf16.mxu0 %v5456_v12 }
0x135d   :  { %4888 = vmatpush3.bf16.msra.mxu1 %v5457_v13  ;;  %4910 = vmatpush3.bf16.msra.mxu0 %v5458_v14 }
0x135e   :  { %4889 = vmatprep.subr.bf16.mxu1 %v5459_v15  ;;  %4911 = vmatprep.subr.bf16.mxu0 %v5460_v16 }
0x1361   :  { %4890 = vmatpush3.bf16.msra.mxu1 %v5461_v17  ;;  %4912 = vmatpush3.bf16.msra.mxu0 %v5462_v18 }
0x1362   :  { %4891 = vmatprep.subr.bf16.mxu1 %v5463_v19  ;;  %4913 = vmatprep.subr.bf16.mxu0 %v5464_v20  ;;  %v5471_v19 = vld [vmem:[%s6895_s14 + $0x70] ss:$8 sps:$4 sm:$0xff]   ;;  %v5473_v20 = vld [vmem:[%s6895_s14 + $0x74] ss:$8 sps:$4 sm:$0xff]  }
0x1365   :  { %4892 = vmatpush3.bf16.msra.mxu1 %v5465_v22  ;;  %4914 = vmatpush3.bf16.msra.mxu0 %v5466_v21 }
0x1366   :  { %4893 = vmatprep.subr.bf16.mxu1 %v5467_v23  ;;  %4915 = vmatprep.subr.bf16.mxu0 %v5468_v24 }
0x1369   :  { %4894 = vmatpush3.bf16.msra.mxu1 %v5469_v26  ;;  %4916 = vmatpush3.bf16.msra.mxu0 %v5470_v30 }
0x136a   :  { %4279 = vmatprep.subr.bf16.mxu1 %v5473_v20 }
0x140c   :  { %v3717_v33 = vpop.f32.mrf.mxu1  ;;  %v3760_v38 = vpop.f32.mrf.mxu0 }
0x140d   :  { %v3718_v51 = vadd.f32 %v3717_v33, %v3506_v41  ;;  %v3761_v52 = vadd.f32 %v3760_v38, %v3514_v42  ;;  %v5474_v33 = vld [vmem:[%s6895_s14 + $0x60] ss:$8 sps:$4 sm:$0xff]   ;;  %v5479_v38 = vld [vmem:[%s6895_s14 + $0x54] ss:$8 sps:$4 sm:$0xff]  }
0x140e   :  { %v3719_v43 = vpop.f32.mrf.mxu1  ;;  %v3762_v45 = vpop.f32.mrf.mxu0 }
0x140f   :  { %v3720_v58 = vadd.f32 %v3719_v43, %v3510_v40  ;;  %v3763_v47 = vadd.f32 %v3762_v45, %v3518_v29  ;;  %v3769_v63 = vmax.f32 %v3718_v51, 0.0  ;;  %v3771_v28 = vmax.f32 %v3761_v52, 0.0  ;;  %v5483_v43 = vld [vmem:[%s6895_s14 + $0x30] ss:$8 sps:$4 sm:$0xff]   ;;  %v5488_v45 = vld [vmem:[%s6895_s14 + $0x24] ss:$8 sps:$4 sm:$0xff]  }
0x1410   :  { %v3721_v48 = vpop.f32.mrf.mxu1  ;;  %v3764_v46 = vpop.f32.mrf.mxu0 }
0x1411   :  { %v3722_v49 = vadd.f32 %v3721_v48, %v3506_v41  ;;  %v3765_v50 = vadd.f32 %v3764_v46, %v3514_v42  ;;  %v3770_v59 = vmax.f32 %v3720_v58, 0.0  ;;  %v3772_v61 = vmax.f32 %v3763_v47, 0.0  ;;  %v5480_v41 = vld [vmem:[%s6895_s14 + $0x40] ss:$8 sps:$4 sm:$0xff]   ;;  %v5485_v42 = vld [vmem:[%s6895_s14 + $0x34] ss:$8 sps:$4 sm:$0xff]  }
0x1412   :  { %v3723_v53 = vpop.f32.mrf.mxu1  ;;  %v3766_v44 = vpop.f32.mrf.mxu0  ;;  %v5486_v48 = vld [vmem:[%s6895_s14 + $0x20] ss:$8 sps:$4 sm:$0xff]   ;;  %v5491_v46 = vld [vmem:[%s6895_s14 + $0x14] ss:$8 sps:$4 sm:$0xff]   ;;  %v5489_v58 = vld [vmem:[%s6895_s14 + $0x10] ss:$8 sps:$4 sm:$0xff]  }
0x1413   :  { %v3724_v54 = vadd.f32 %v3723_v53, %v3510_v40  ;;  %v3767_v55 = vadd.f32 %v3766_v44, %v3518_v29  ;;  %v3773_v35 = vmax.f32 %v3722_v49, 0.0  ;;  %v3775_v57 = vmax.f32 %v3765_v50, 0.0  ;;  %v5477_v40 = vld [vmem:[%s6895_s14 + $0x50] ss:$8 sps:$4 sm:$0xff]   ;;  %v5482_v29 = vld [vmem:[%s6895_s14 + $0x44] ss:$8 sps:$4 sm:$0xff]  }
0x1414   :  { %v5494_v47 = vld [vmem:[%s6895_s14 + $0x4] ss:$8 sps:$4 sm:$0xff]   ;;  %v5492_v49 = vld [vmem:[%s6895_s14] ss:$8 sps:$4 sm:$0xff]  }
0x1415   :  { %v3774_v25 = vmax.f32 %v3724_v54, 0.0  ;;  %v3776_v37 = vmax.f32 %v3767_v55, 0.0  ;;  %v3777_v1 = vpack.c.bf16 %v3773_v35, %v3769_v63  ;;  %v3779_v2 = vpack.c.bf16 %v3775_v57, %v3771_v28  ;;  %v4717_v57 = vld [vmem:[%s6896_s12] ss:$0 sm:$0xff] }
0x1417   :  { %v3778_v62 = vpack.c.bf16 %v3774_v25, %v3770_v59  ;;  %v3780_v31 = vpack.c.bf16 %v3776_v37, %v3772_v61  ;;  %v4718_v37 = vld [vmem:[%s6897_s13] ss:$0 sm:$0xff] }
0x1419   :  { %4078 = vmatprep.mubr.bf16.mxu1 %v3778_v62  ;;  %4119 = vmatprep.mubr.bf16.mxu0 %v3780_v31 }
0x141a   :  { %4079 = vmatmul.mubr.bf16.vlgmr.msra.gmra.mxu1 %v3777_v1  ;;  %4120 = vmatmul.mubr.bf16.vlgmr.msra.gmra.mxu0 %v3779_v2  ;;  %v4187_v1 = vld [vmem:[%s6898_s15] sm:$0x3] }
0x141b   :  { %4311 = vmatprep.mubr.bf16.mxu1 %v5582_v27  ;;  %4280 = vmatpush1.bf16.msra.mxu1 %v5471_v19  ;;  %v4192_v2 = vrot.slane %v4187_v1, %v6241_v36 }
0x141c   :  { %4281 = vmatprep.subr.bf16.mxu1 %v5476_v3 }
0x141f   :  { %4282 = vmatpush1.bf16.msra.mxu1 %v5474_v33 }
0x1420   :  { %4283 = vmatprep.subr.bf16.mxu1 %v5479_v38 }
0x1423   :  { %4284 = vmatpush1.bf16.msra.mxu1 %v5477_v40 }
0x1424   :  { %4285 = vmatprep.subr.bf16.mxu1 %v5482_v29 }
0x1427   :  { %4286 = vmatpush1.bf16.msra.mxu1 %v5480_v41 }
0x1428   :  { %4287 = vmatprep.subr.bf16.mxu1 %v5485_v42 }
0x142b   :  { %4288 = vmatpush1.bf16.msra.mxu1 %v5483_v43 }
0x142c   :  { %4289 = vmatprep.subr.bf16.mxu1 %v5488_v45 }
0x142f   :  { %4290 = vmatpush1.bf16.msra.mxu1 %v5486_v48 }
0x1430   :  { %4291 = vmatprep.subr.bf16.mxu1 %v5491_v46 }
0x1433   :  { %4292 = vmatpush1.bf16.msra.mxu1 %v5489_v58 }
0x1434   :  { %4293 = vmatprep.subr.bf16.mxu1 %v5494_v47 }
0x1437   :  { %4294 = vmatpush1.bf16.msra.mxu1 %v5492_v49 }
0x14da   :  { %v4895_v0 = vpop.f32.mrf.mxu1  ;;  %v4917_v4 = vpop.f32.mrf.mxu0 }
0x14dc   :  { %v4896_v32 = vpop.f32.mrf.mxu1  ;;  %v4918_v6 = vpop.f32.mrf.mxu0 }
0x14dd   :  { %v4897_v7 = vadd.f32 %v4896_v32, %v4895_v0  ;;  %v4919_v9 = vadd.f32 %v4918_v6, %v4917_v4  ;;  %v4196_v0 = vrot.slane %v4187_v1, %v6237_v34 }
0x14de   :  { %v4898_v8 = vpop.f32.mrf.mxu1  ;;  %v4920_v56 = vpop.f32.mrf.mxu0 }
0x14df   :  { %v4081_v10 = vadd.f32 %v4897_v7, %v4684_v5 }
0x14e0   :  { %v4899_v11 = vpop.f32.mrf.mxu1  ;;  %v4921_v12 = vpop.f32.mrf.mxu0 }
0x14e1   :  { %v4122_v13 = vadd.f32 %v4919_v9, %v4081_v10  ;;  %v4900_v14 = vadd.f32 %v4899_v11, %v4898_v8  ;;  %v4922_v16 = vadd.f32 %v4921_v12, %v4920_v56 }
0x14e3   :  { %v4084_v15 = vadd.f32 %v4900_v14, %v4684_v5  ;;  %v4128_v27 = vadd.f32 %v4122_v13, %v6580_v39 }
0x14e5   :  { %v4125_v17 = vadd.f32 %v4922_v16, %v4084_v15  ;;  %4132 = vadd.xlane.f32.xlu0 %v4128_v27 }
0x14e7   :  { %v4129_v18 = vadd.f32 %v4125_v17, %v6584_v60 }
0x14e9   :  { %4134 = vadd.xlane.f32.xlu1 %v4129_v18 }
0x156e   :  { %v4133_v22 = vpop.xlane.xlu0 %4132 }
0x156f   :  { %v4136_v21 = vmul.f32 0.0078125, %v4133_v22 }
0x1571   :  { %v4138_v23 = vsub.f32 %v4128_v27, %v4136_v21 }
0x1572   :  { %v4135_v24 = vpop.xlane.xlu1 %4134 }
0x1573   :  { %v4137_v39 = vmul.f32 0.0078125, %v4135_v24  ;;  %v4140_v26 = vmul.f32 %v4138_v23, %v4138_v23 }
0x1575   :  { %v4139_v30 = vsub.f32 %v4129_v18, %v4137_v39  ;;  %4142 = vadd.xlane.f32.xlu0 %v4140_v26 }
0x1577   :  { %v4141_v60 = vmul.f32 %v4139_v30, %v4139_v30 }
0x1579   :  { %4144 = vadd.xlane.f32.xlu1 %v4141_v60 }
0x15fe   :  { %v4143_v50 = vpop.xlane.xlu0 %4142 }
0x15ff   :  { %v4146_v51 = vmul.f32 0.0078125, %v4143_v50 }
0x1601   :  { %v4148_v52 = vadd.f32 1e-05, %v4146_v51 }
0x1602   :  { %v4145_v53 = vpop.xlane.xlu1 %4144 }
0x1603   :  { %5575 = vrsqrt.f32 %v4148_v52  ;;  %v4147_v44 = vmul.f32 0.0078125, %v4145_v53 }
0x1605   :  { %v4149_v54 = vadd.f32 1e-05, %v4147_v44 }
0x1607   :  { %5577 = vrsqrt.f32 %v4149_v54 }
0x1610   :  { %v5576_v55 = vpop.eup %5575 }
0x1611   :  { %v4152_v35 = vmul.f32 %v5576_v55, %v4138_v23 }
0x1613   :  { %v4160_v25 = vmul.f32 %v4717_v57, %v4152_v35 }
0x1614   :  { %v5578_v59 = vpop.eup %5577 }
0x1615   :  { %v4153_v61 = vmul.f32 %v5578_v59, %v4139_v30  ;;  %v4168_v28 = vadd.f32 %v4718_v37, %v4160_v25 }
0x1617   :  { %v4161_v63 = vmul.f32 %v4717_v57, %v4153_v61 }
0x1619   :  { %v4169_v62 = vadd.f32 %v4718_v37, %v4161_v63 }
0x161b   :  { %v4170_v31 = vpack.c.bf16 %v4169_v62, %v4168_v28 }
0x161d   :  { %4312 = vmatmul.mubr.bf16.vlgmr.msra.gmra.mxu1 %v4170_v31 }
0x16dd   :  { %v4313_v4 = vpop.f32.mrf.mxu1 }
0x16de   :  { %v4314_v5 = vadd.f32 %v4313_v4, %v4192_v2 }
0x16df   :  { %v4315_v32 = vpop.f32.mrf.mxu1 }
0x16e0   :  { %4322 = vst [vmem:[%s6899_s16] sm:$0xff] %v4314_v5  ;;  %v4316_v6 = vadd.f32 %v4315_v32, %v4196_v0 }
0x16e1   :  { %v4317_v7 = vpop.f32.mrf.mxu1 }
0x16e2   :  { %4323 = vst [vmem:[%s6899_s16 + $0x8] sm:$0xff] %v4316_v6  ;;  %v4318_v8 = vadd.f32 %v4317_v7, %v4192_v2 }
0x16e3   :  { %v4319_v56 = vpop.f32.mrf.mxu1 }
0x16e4   :  { %4324 = vst [vmem:[%s6899_s16 + $0x10] sm:$0xff] %v4318_v8  ;;  %v4320_v34 = vadd.f32 %v4319_v56, %v4196_v0 }
0x16e6   :  { %4325 = vst [vmem:[%s6899_s16 + $0x18] sm:$0xff] %v4320_v34 }

</bundles_post_ra>
